<compile_context>
chip_gen: v7x
topology: tpu7x:2x2x1
jax: 0.10.0
libtpu: 0.0.40
codegen_flags: <defaults>
</compile_context>

<pallas_src>
import functools

import jax
import jax.numpy as jnp
from jax.experimental import pallas as pl
from jax.experimental.pallas import tpu as pltpu

K = 5                 # conv filter size used everywhere in the module
PAD = (K - 1) // 2    # 'same' padding
F_MULT = 8            # `f` in the PyTorch module


# ---------------------------------------------------------------------------
# Fused kernel: entire Generator forward, activations resident in VMEM.
# ---------------------------------------------------------------------------
def generator_fused_kernel(
    x_ref,                                   # (B, L) f32       input (channel dim squeezed)
    w1_ref, b1_ref,                          # (C1, K) f32, (C1, 1) f32
    w2_ref, b2_ref,                          # (C2, K*C1) bf16 (im2col, k*C1+c), (C2, 1) f32
    w3_ref, b3_ref,                          # (C2, L, F3) bf16 (torch c*L+l), (1, F3) f32
    w4_ref, b4_ref, g4_ref, be4_ref,         # (F3, F4) bf16, (1, F4) f32 x3
    w5_ref, b5_ref, g5_ref, be5_ref,
    w6_ref, b6_ref, g6_ref, be6_ref,
    w7_ref, b7_ref,                          # (F6, L) bf16, (1, L) f32
    o_ref,                                   # (B, L) f32
    xp1_ref,                                 # scratch (B, L+K-1) f32       padded input
    y1p_ref,                                 # scratch (B, C1, L+K-1) f32   padded conv1 out
    *, L, eps):
  B = x_ref.shape[0]
  C1 = w1_ref.shape[0]
  C2 = w2_ref.shape[0]
  F3 = w3_ref.shape[-1]
  f32, bf16 = jnp.float32, jnp.bfloat16

  def leaky(y, slope):
    return jnp.where(y >= 0, y, slope * y)

  # ---------------- g1: Conv1d(1 -> C1) + LeakyReLU(0.2), VPU, batched ------
  # 'same' padding via a VMEM halo scratch; only the halo columns are zeroed.
  xp1_ref[:, :PAD] = jnp.zeros((B, PAD), f32)
  xp1_ref[:, PAD + L:] = jnp.zeros((B, PAD), f32)
  xp1_ref[:, PAD:PAD + L] = x_ref[...]
  xp1 = xp1_ref[...]                         # (B, L+K-1)
  w1 = w1_ref[...]                           # (C1, K)

  acc1 = jnp.zeros((B, C1, L), f32)
  for k in range(K):                         # K static; C_in == 1 -> pure VPU broadcast MACs
    acc1 = acc1 + w1[None, :, k:k + 1] * xp1[:, None, k:k + L]
  y1 = leaky(acc1 + b1_ref[...][None, :, :], 0.2)          # (B, C1, L)

  # conv2 reads a padded copy of conv1's output -> zero only the halo columns.
  y1p_ref[:, :, :PAD] = jnp.zeros((B, C1, PAD), f32)
  y1p_ref[:, :, PAD + L:] = jnp.zeros((B, C1, PAD), f32)
  y1p_ref[:, :, PAD:PAD + L] = y1

  # -------- g2: Conv1d(C1 -> C2) + LeakyReLU(0.2): one im2col matmul / sample
  w2i = w2_ref[...]                          # (C2, K*C1) bf16
  y2_list = []
  for b in range(B):                         # TODO(synk): batched einsum / grid axis for large B
    y1pb = y1p_ref[b]                        # (C1, L+K-1)
    # im2col patches, feature order k*C1 + c (matches w2i prep in the wrapper)
    pat = jnp.concatenate([y1pb[:, k:k + L] for k in range(K)], axis=0)   # (K*C1, L)
    y2_list.append(jnp.dot(w2i, pat.astype(bf16), preferred_element_type=f32))
  y2 = jnp.stack(y2_list, axis=0)            # (B, C2, L) f32
  y2 = leaky(y2 + b2_ref[...][None, :, :], 0.2)

  # -------- g3: Linear(C2*L -> F3) + LeakyReLU(0.2) --------------------------
  # torch Flatten (feature = c*L + l) is absorbed into the contraction: sum over
  # channels of (B, L) x (L, F3) dots against w3 reshaped to (C2, L, F3).
  # No lane-sparse scatter stores, no flatten scratch.
  acc3 = jnp.zeros((B, F3), f32)
  for c in range(C2):
    acc3 = acc3 + jnp.dot(y2[:, c, :].astype(bf16), w3_ref[c],
                          preferred_element_type=f32)
  x = leaky(acc3 + b3_ref[...], 0.2)

  def linear(v, w_r, b_r):
    return jnp.dot(v.astype(bf16), w_r[...], preferred_element_type=f32) + b_r[...]

  def batchnorm(v, g_r, be_r):
    # PyTorch BatchNorm1d training mode: batch mean, biased batch variance.
    mean = jnp.mean(v, axis=0, keepdims=True)
    var = jnp.mean((v - mean) ** 2, axis=0, keepdims=True)
    return (v - mean) * jax.lax.rsqrt(var + eps) * g_r[...] + be_r[...]

  # ------------------------------- g4 .. g7 ---------------------------------
  x = leaky(batchnorm(linear(x, w4_ref, b4_ref), g4_ref, be4_ref), 0.2)   # g4
  x = leaky(batchnorm(linear(x, w5_ref, b5_ref), g5_ref, be5_ref), 0.2)   # g5
  x = leaky(batchnorm(linear(x, w6_ref, b6_ref), g6_ref, be6_ref), 0.2)   # g6
  x = leaky(linear(x, w7_ref, b7_ref), 0.01)                              # g7
  o_ref[...] = x.astype(o_ref.dtype)


# ---------------------------------------------------------------------------
# Wrapper: single pallas_call for the whole forward pass.
# ---------------------------------------------------------------------------
def _vmem_capacity_bytes(default=64 * 1024 * 1024):
  try:
    cap = getattr(pltpu.get_tpu_info(), "vmem_capacity_bytes", None)
    return int(cap) if cap else default
  except Exception:
    return default


def generator_forward(params, aggregate):
  B, c_in, L = aggregate.shape
  assert c_in == 1
  f = F_MULT
  C1, C2 = 2 * f, 3 * f
  F3, F4, F5, F6 = 4 * f * L, 6 * f * L, 4 * f * L, 3 * f * L
  wdt = jnp.bfloat16   # weight transport/MXU dtype; accumulation stays f32

  w1, b1 = params["g1"]
  w2, b2 = params["g2"]
  w3, b3 = params["g3"]
  w4, b4 = params["g4"]
  w5, b5 = params["g5"]
  w6, b6 = params["g6"]
  w7, b7 = params["g7"]
  g4, be4 = params["bn4"]
  g5, be5 = params["bn5"]
  g6, be6 = params["bn6"]

  # Free XLA-side layout plumbing (done once at trace time, before DMA).
  w2i = jnp.transpose(w2, (0, 2, 1)).reshape(C2, K * C1)    # im2col order k*C1 + c
  w3r = w3.reshape(C2, L, F3)                               # torch flatten order c*L + l

  args = (
      aggregate.reshape(B, L).astype(jnp.float32),
      w1.reshape(C1, K).astype(jnp.float32), b1.reshape(C1, 1).astype(jnp.float32),
      w2i.astype(wdt), b2.reshape(C2, 1).astype(jnp.float32),
      w3r.astype(wdt), b3.reshape(1, F3),
      w4.astype(wdt), b4.reshape(1, F4), g4.reshape(1, F4), be4.reshape(1, F4),
      w5.astype(wdt), b5.reshape(1, F5), g5.reshape(1, F5), be5.reshape(1, F5),
      w6.astype(wdt), b6.reshape(1, F6), g6.reshape(1, F6), be6.reshape(1, F6),
      w7.astype(wdt), b7.reshape(1, L),
  )

  vmem_spec = pl.BlockSpec(memory_space=pltpu.MemorySpace.VMEM)
  scratch_shapes = [
      pltpu.VMEM((B, L + K - 1), jnp.float32),
      pltpu.VMEM((B, C1, L + K - 1), jnp.float32),
  ]

  arg_bytes = sum(int(a.size) * a.dtype.itemsize for a in args)
  scratch_bytes = 4 * (B * (L + K - 1) + B * C1 * (L + K - 1))
  out_bytes = 4 * B * L
  cap = _vmem_capacity_bytes()
  vmem_limit = int(min(max(2.0 * (arg_bytes + scratch_bytes + out_bytes),
                           16 * 1024 * 1024), 0.75 * cap))

  flops = 2 * B * (C1 * K * L + C2 * C1 * K * L + C2 * L * F3
                   + F3 * F4 + F4 * F5 + F5 * F6 + F6 * L)
  cost = pl.CostEstimate(flops=flops, transcendentals=F4 + F5 + F6,
                         bytes_accessed=arg_bytes + out_bytes)

  kern = functools.partial(generator_fused_kernel, L=L, eps=0.9)
  return pl.pallas_call(
      kern,
      out_shape=jax.ShapeDtypeStruct((B, L), jnp.float32),
      in_specs=[vmem_spec] * len(args),
      out_specs=vmem_spec,
      scratch_shapes=scratch_shapes,
      compiler_params=pltpu.CompilerParams(vmem_limit_bytes=vmem_limit),
      cost_estimate=cost,
  )(*args)


# ---------------------------------------------------------------------------
# Parameter init (deterministic, PyTorch-default-style uniform bounds)
# ---------------------------------------------------------------------------
def _linear_init(key, fin, fout):
  k1, k2 = jax.random.split(key)
  bound = 1.0 / (fin ** 0.5)
  w = jax.random.uniform(k1, (fin, fout), jnp.float32, -bound, bound)
  b = jax.random.uniform(k2, (fout,), jnp.float32, -bound, bound)
  return w, b


def _conv_init(key, cin, cout, ksz):
  k1, k2 = jax.random.split(key)
  bound = 1.0 / ((cin * ksz) ** 0.5)
  w = jax.random.uniform(k1, (cout, cin, ksz), jnp.float32, -bound, bound)
  b = jax.random.uniform(k2, (cout,), jnp.float32, -bound, bound)
  return w, b


def init_generator_params(key, sig_len):
  f = F_MULT
  keys = jax.random.split(key, 7)
  p = {}
  p["g1"] = _conv_init(keys[0], 1, f * 2, K)
  p["g2"] = _conv_init(keys[1], f * 2, f * 3, K)
  p["g3"] = _linear_init(keys[2], sig_len * f * 3, sig_len * f * 4)
  p["g4"] = _linear_init(keys[3], sig_len * f * 4, sig_len * f * 6)
  p["g5"] = _linear_init(keys[4], sig_len * f * 6, sig_len * f * 4)
  p["g6"] = _linear_init(keys[5], sig_len * f * 4, sig_len * f * 3)
  p["g7"] = _linear_init(keys[6], sig_len * f * 3, sig_len)
  # BatchNorm affine params (PyTorch default init: gamma=1, beta=0)
  p["bn4"] = (jnp.ones(sig_len * f * 6, jnp.float32), jnp.zeros(sig_len * f * 6, jnp.float32))
  p["bn5"] = (jnp.ones(sig_len * f * 4, jnp.float32), jnp.zeros(sig_len * f * 4, jnp.float32))
  p["bn6"] = (jnp.ones(sig_len * f * 3, jnp.float32), jnp.zeros(sig_len * f * 3, jnp.float32))
  return p


# ---------------------------------------------------------------------------
if __name__ == "__main__":
  sig_len = 16
  batch = 2

  key = jax.random.PRNGKey(0)
  kp, kx = jax.random.split(key)
  params = init_generator_params(kp, sig_len)

  # PyTorch Conv1d input: (B, C_in=1, sig_len)
  aggregate = jax.random.normal(kx, (batch, 1, sig_len), jnp.float32)

  out = generator_forward(params, aggregate)
  out = jax.block_until_ready(out)

  assert out.shape == (batch, sig_len), out.shape
  assert bool(jnp.all(jnp.isfinite(out)))
  print("KERNEL_OK")
</pallas_src>

<mosaic_0001>
module attributes {stable_mosaic.version = 11 : i64} {
  func.func @generator_fused_kernel(%arg0: memref<2x16xf32, #tpu.memory_space<vmem>>, %arg1: memref<16x5xf32, #tpu.memory_space<vmem>>, %arg2: memref<16x1xf32, #tpu.memory_space<vmem>>, %arg3: memref<24x80xbf16, #tpu.memory_space<vmem>>, %arg4: memref<24x1xf32, #tpu.memory_space<vmem>>, %arg5: memref<24x16x512xbf16, #tpu.memory_space<vmem>>, %arg6: memref<1x512xf32, #tpu.memory_space<vmem>>, %arg7: memref<512x768xbf16, #tpu.memory_space<vmem>>, %arg8: memref<1x768xf32, #tpu.memory_space<vmem>>, %arg9: memref<1x768xf32, #tpu.memory_space<vmem>>, %arg10: memref<1x768xf32, #tpu.memory_space<vmem>>, %arg11: memref<768x512xbf16, #tpu.memory_space<vmem>>, %arg12: memref<1x512xf32, #tpu.memory_space<vmem>>, %arg13: memref<1x512xf32, #tpu.memory_space<vmem>>, %arg14: memref<1x512xf32, #tpu.memory_space<vmem>>, %arg15: memref<512x384xbf16, #tpu.memory_space<vmem>>, %arg16: memref<1x384xf32, #tpu.memory_space<vmem>>, %arg17: memref<1x384xf32, #tpu.memory_space<vmem>>, %arg18: memref<1x384xf32, #tpu.memory_space<vmem>>, %arg19: memref<384x16xbf16, #tpu.memory_space<vmem>>, %arg20: memref<1x16xf32, #tpu.memory_space<vmem>>, %arg21: memref<2x16xf32, #tpu.memory_space<vmem>>, %arg22: memref<2x20xf32, #tpu.memory_space<vmem>>, %arg23: memref<2x16x20xf32, #tpu.memory_space<vmem>>) attributes {dimension_semantics = [], scalar_prefetch = 0 : i64, scratch_operands = 2 : i64, tpu.core_type = #tpu.core_type<tc>} {
    %cst = arith.constant 0.000000e+00 : f32
    %0 = vector.broadcast %cst : f32 to vector<2x2xf32>
    %c0 = arith.constant 0 : index
    %c0_0 = arith.constant 0 : index
    %1 = vector.load %arg22[%c0, %c0_0] : memref<2x20xf32, #tpu.memory_space<vmem>>, vector<2x2xf32>
    tpu.vector_store %arg22[%c0, %c0_0], %0 {strides = array<i32>} : memref<2x20xf32, #tpu.memory_space<vmem>>, vector<2x2xf32>,
    %cst_1 = arith.constant 0.000000e+00 : f32
    %2 = vector.broadcast %cst_1 : f32 to vector<2x2xf32>
    %c0_2 = arith.constant 0 : index
    %c18 = arith.constant 18 : index
    %3 = vector.load %arg22[%c0_2, %c18] : memref<2x20xf32, #tpu.memory_space<vmem>>, vector<2x2xf32>
    tpu.vector_store %arg22[%c0_2, %c18], %2 {strides = array<i32>} : memref<2x20xf32, #tpu.memory_space<vmem>>, vector<2x2xf32>,
    %c0_3 = arith.constant 0 : index
    %c0_4 = arith.constant 0 : index
    %4 = vector.load %arg0[%c0_3, %c0_4] : memref<2x16xf32, #tpu.memory_space<vmem>>, vector<2x16xf32>
    %c0_5 = arith.constant 0 : index
    %c2 = arith.constant 2 : index
    %5 = vector.load %arg22[%c0_5, %c2] : memref<2x20xf32, #tpu.memory_space<vmem>>, vector<2x16xf32>
    tpu.vector_store %arg22[%c0_5, %c2], %4 {strides = array<i32>} : memref<2x20xf32, #tpu.memory_space<vmem>>, vector<2x16xf32>,
    %c0_6 = arith.constant 0 : index
    %c0_7 = arith.constant 0 : index
    %6 = vector.load %arg22[%c0_6, %c0_7] : memref<2x20xf32, #tpu.memory_space<vmem>>, vector<2x20xf32>
    %c0_8 = arith.constant 0 : index
    %c0_9 = arith.constant 0 : index
    %7 = vector.load %arg1[%c0_8, %c0_9] : memref<16x5xf32, #tpu.memory_space<vmem>>, vector<16x5xf32>
    %cst_10 = arith.constant 0.000000e+00 : f32
    %8 = vector.broadcast %cst_10 : f32 to vector<2x16x16xf32>
    %9 = vector.extract_strided_slice %7 {offsets = [0, 0], sizes = [16, 1], strides = [1, 1]} : vector<16x5xf32> to vector<16x1xf32>
    %10 = vector.shape_cast %9 : vector<16x1xf32> to vector<1x16x1xf32>
    %11 = vector.extract_strided_slice %6 {offsets = [0, 0], sizes = [2, 16], strides = [1, 1]} : vector<2x20xf32> to vector<2x16xf32>
    %12 = vector.shape_cast %11 : vector<2x16xf32> to vector<2x1x16xf32>
    %13 = vector.broadcast %10 : vector<1x16x1xf32> to vector<2x16x16xf32>
    %14 = vector.broadcast %12 : vector<2x1x16xf32> to vector<2x16x16xf32>
    %15 = arith.mulf %13, %14 : vector<2x16x16xf32>
    %16 = arith.addf %8, %15 : vector<2x16x16xf32>
    %17 = vector.extract_strided_slice %7 {offsets = [0, 1], sizes = [16, 1], strides = [1, 1]} : vector<16x5xf32> to vector<16x1xf32>
    %18 = vector.shape_cast %17 : vector<16x1xf32> to vector<1x16x1xf32>
    %19 = vector.extract_strided_slice %6 {offsets = [0, 1], sizes = [2, 16], strides = [1, 1]} : vector<2x20xf32> to vector<2x16xf32>
    %20 = vector.shape_cast %19 : vector<2x16xf32> to vector<2x1x16xf32>
    %21 = vector.broadcast %18 : vector<1x16x1xf32> to vector<2x16x16xf32>
    %22 = vector.broadcast %20 : vector<2x1x16xf32> to vector<2x16x16xf32>
    %23 = arith.mulf %21, %22 : vector<2x16x16xf32>
    %24 = arith.addf %16, %23 : vector<2x16x16xf32>
    %25 = vector.extract_strided_slice %7 {offsets = [0, 2], sizes = [16, 1], strides = [1, 1]} : vector<16x5xf32> to vector<16x1xf32>
    %26 = vector.shape_cast %25 : vector<16x1xf32> to vector<1x16x1xf32>
    %27 = vector.extract_strided_slice %6 {offsets = [0, 2], sizes = [2, 16], strides = [1, 1]} : vector<2x20xf32> to vector<2x16xf32>
    %28 = vector.shape_cast %27 : vector<2x16xf32> to vector<2x1x16xf32>
    %29 = vector.broadcast %26 : vector<1x16x1xf32> to vector<2x16x16xf32>
    %30 = vector.broadcast %28 : vector<2x1x16xf32> to vector<2x16x16xf32>
    %31 = arith.mulf %29, %30 : vector<2x16x16xf32>
    %32 = arith.addf %24, %31 : vector<2x16x16xf32>
    %33 = vector.extract_strided_slice %7 {offsets = [0, 3], sizes = [16, 1], strides = [1, 1]} : vector<16x5xf32> to vector<16x1xf32>
    %34 = vector.shape_cast %33 : vector<16x1xf32> to vector<1x16x1xf32>
    %35 = vector.extract_strided_slice %6 {offsets = [0, 3], sizes = [2, 16], strides = [1, 1]} : vector<2x20xf32> to vector<2x16xf32>
    %36 = vector.shape_cast %35 : vector<2x16xf32> to vector<2x1x16xf32>
    %37 = vector.broadcast %34 : vector<1x16x1xf32> to vector<2x16x16xf32>
    %38 = vector.broadcast %36 : vector<2x1x16xf32> to vector<2x16x16xf32>
    %39 = arith.mulf %37, %38 : vector<2x16x16xf32>
    %40 = arith.addf %32, %39 : vector<2x16x16xf32>
    %41 = vector.extract_strided_slice %7 {offsets = [0, 4], sizes = [16, 1], strides = [1, 1]} : vector<16x5xf32> to vector<16x1xf32>
    %42 = vector.shape_cast %41 : vector<16x1xf32> to vector<1x16x1xf32>
    %43 = vector.extract_strided_slice %6 {offsets = [0, 4], sizes = [2, 16], strides = [1, 1]} : vector<2x20xf32> to vector<2x16xf32>
    %44 = vector.shape_cast %43 : vector<2x16xf32> to vector<2x1x16xf32>
    %45 = vector.broadcast %42 : vector<1x16x1xf32> to vector<2x16x16xf32>
    %46 = vector.broadcast %44 : vector<2x1x16xf32> to vector<2x16x16xf32>
    %47 = arith.mulf %45, %46 : vector<2x16x16xf32>
    %48 = arith.addf %40, %47 : vector<2x16x16xf32>
    %c0_11 = arith.constant 0 : index
    %c0_12 = arith.constant 0 : index
    %49 = vector.load %arg2[%c0_11, %c0_12] : memref<16x1xf32, #tpu.memory_space<vmem>>, vector<16x1xf32>
    %50 = vector.shape_cast %49 : vector<16x1xf32> to vector<1x16x1xf32>
    %51 = vector.broadcast %50 : vector<1x16x1xf32> to vector<2x16x16xf32>
    %52 = arith.addf %48, %51 : vector<2x16x16xf32>
    %cst_13 = arith.constant 0.000000e+00 : f32
    %53 = vector.broadcast %cst_13 : f32 to vector<2x16x16xf32>
    %54 = arith.cmpf oge, %52, %53 : vector<2x16x16xf32>
    %cst_14 = arith.constant 2.000000e-01 : f32
    %55 = vector.broadcast %cst_14 : f32 to vector<2x16x16xf32>
    %56 = arith.mulf %55, %52 : vector<2x16x16xf32>
    %57 = arith.select %54, %52, %56 : vector<2x16x16xi1>, vector<2x16x16xf32>
    %cst_15 = arith.constant 0.000000e+00 : f32
    %58 = vector.broadcast %cst_15 : f32 to vector<2x16x2xf32>
    %c0_16 = arith.constant 0 : index
    %c0_17 = arith.constant 0 : index
    %c0_18 = arith.constant 0 : index
    %59 = vector.load %arg23[%c0_16, %c0_17, %c0_18] : memref<2x16x20xf32, #tpu.memory_space<vmem>>, vector<2x16x2xf32>
    tpu.vector_store %arg23[%c0_16, %c0_17, %c0_18], %58 {strides = array<i32>} : memref<2x16x20xf32, #tpu.memory_space<vmem>>, vector<2x16x2xf32>,
    %cst_19 = arith.constant 0.000000e+00 : f32
    %60 = vector.broadcast %cst_19 : f32 to vector<2x16x2xf32>
    %c0_20 = arith.constant 0 : index
    %c0_21 = arith.constant 0 : index
    %c18_22 = arith.constant 18 : index
    %61 = vector.load %arg23[%c0_20, %c0_21, %c18_22] : memref<2x16x20xf32, #tpu.memory_space<vmem>>, vector<2x16x2xf32>
    tpu.vector_store %arg23[%c0_20, %c0_21, %c18_22], %60 {strides = array<i32>} : memref<2x16x20xf32, #tpu.memory_space<vmem>>, vector<2x16x2xf32>,
    %c0_23 = arith.constant 0 : index
    %c0_24 = arith.constant 0 : index
    %c2_25 = arith.constant 2 : index
    %62 = vector.load %arg23[%c0_23, %c0_24, %c2_25] : memref<2x16x20xf32, #tpu.memory_space<vmem>>, vector<2x16x16xf32>
    tpu.vector_store %arg23[%c0_23, %c0_24, %c2_25], %57 {strides = array<i32>} : memref<2x16x20xf32, #tpu.memory_space<vmem>>, vector<2x16x16xf32>,
    %c0_26 = arith.constant 0 : index
    %c0_27 = arith.constant 0 : index
    %63 = vector.load %arg3[%c0_26, %c0_27] : memref<24x80xbf16, #tpu.memory_space<vmem>>, vector<24x80xbf16>
    %c0_28 = arith.constant 0 : index
    %c0_29 = arith.constant 0 : index
    %c0_30 = arith.constant 0 : index
    %64 = vector.load %arg23[%c0_28, %c0_29, %c0_30] : memref<2x16x20xf32, #tpu.memory_space<vmem>>, vector<1x16x20xf32>
    %65 = vector.shape_cast %64 : vector<1x16x20xf32> to vector<16x20xf32>
    %66 = vector.extract_strided_slice %65 {offsets = [0, 0], sizes = [16, 16], strides = [1, 1]} : vector<16x20xf32> to vector<16x16xf32>
    %67 = vector.extract_strided_slice %65 {offsets = [0, 1], sizes = [16, 16], strides = [1, 1]} : vector<16x20xf32> to vector<16x16xf32>
    %68 = vector.extract_strided_slice %65 {offsets = [0, 2], sizes = [16, 16], strides = [1, 1]} : vector<16x20xf32> to vector<16x16xf32>
    %69 = vector.extract_strided_slice %65 {offsets = [0, 3], sizes = [16, 16], strides = [1, 1]} : vector<16x20xf32> to vector<16x16xf32>
    %70 = vector.extract_strided_slice %65 {offsets = [0, 4], sizes = [16, 16], strides = [1, 1]} : vector<16x20xf32> to vector<16x16xf32>
    %71 = tpu.concatenate %66, %67, %68, %69, %70 in 0 : vector<16x16xf32>, vector<16x16xf32>, vector<16x16xf32>, vector<16x16xf32>, vector<16x16xf32> -> vector<80x16xf32>
    %72 = arith.truncf %71 : vector<80x16xf32> to vector<80x16xbf16>
    %cst_31 = arith.constant dense<0.000000e+00> : vector<24x16xf32>
    %73 = tpu.matmul %63, %72, %cst_31 {dimension_numbers = #tpu.dot_dimension_numbers<[1], [0], [0], [1], [0, 0, 1, 1], [], []>} : vector<24x80xbf16>, vector<80x16xbf16>, vector<24x16xf32> -> vector<24x16xf32>
    %c1 = arith.constant 1 : index
    %c0_32 = arith.constant 0 : index
    %c0_33 = arith.constant 0 : index
    %74 = vector.load %arg23[%c1, %c0_32, %c0_33] : memref<2x16x20xf32, #tpu.memory_space<vmem>>, vector<1x16x20xf32>
    %75 = vector.shape_cast %74 : vector<1x16x20xf32> to vector<16x20xf32>
    %76 = vector.extract_strided_slice %75 {offsets = [0, 0], sizes = [16, 16], strides = [1, 1]} : vector<16x20xf32> to vector<16x16xf32>
    %77 = vector.extract_strided_slice %75 {offsets = [0, 1], sizes = [16, 16], strides = [1, 1]} : vector<16x20xf32> to vector<16x16xf32>
    %78 = vector.extract_strided_slice %75 {offsets = [0, 2], sizes = [16, 16], strides = [1, 1]} : vector<16x20xf32> to vector<16x16xf32>
    %79 = vector.extract_strided_slice %75 {offsets = [0, 3], sizes = [16, 16], strides = [1, 1]} : vector<16x20xf32> to vector<16x16xf32>
    %80 = vector.extract_strided_slice %75 {offsets = [0, 4], sizes = [16, 16], strides = [1, 1]} : vector<16x20xf32> to vector<16x16xf32>
    %81 = tpu.concatenate %76, %77, %78, %79, %80 in 0 : vector<16x16xf32>, vector<16x16xf32>, vector<16x16xf32>, vector<16x16xf32>, vector<16x16xf32> -> vector<80x16xf32>
    %82 = arith.truncf %81 : vector<80x16xf32> to vector<80x16xbf16>
    %cst_34 = arith.constant dense<0.000000e+00> : vector<24x16xf32>
    %83 = tpu.matmul %63, %82, %cst_34 {dimension_numbers = #tpu.dot_dimension_numbers<[1], [0], [0], [1], [0, 0, 1, 1], [], []>} : vector<24x80xbf16>, vector<80x16xbf16>, vector<24x16xf32> -> vector<24x16xf32>
    %84 = vector.shape_cast %73 : vector<24x16xf32> to vector<1x24x16xf32>
    %85 = vector.shape_cast %83 : vector<24x16xf32> to vector<1x24x16xf32>
    %86 = tpu.concatenate %84, %85 in 0 : vector<1x24x16xf32>, vector<1x24x16xf32> -> vector<2x24x16xf32>
    %c0_35 = arith.constant 0 : index
    %c0_36 = arith.constant 0 : index
    %87 = vector.load %arg4[%c0_35, %c0_36] : memref<24x1xf32, #tpu.memory_space<vmem>>, vector<24x1xf32>
    %88 = vector.shape_cast %87 : vector<24x1xf32> to vector<1x24x1xf32>
    %89 = vector.broadcast %88 : vector<1x24x1xf32> to vector<2x24x16xf32>
    %90 = arith.addf %86, %89 : vector<2x24x16xf32>
    %cst_37 = arith.constant 0.000000e+00 : f32
    %91 = vector.broadcast %cst_37 : f32 to vector<2x24x16xf32>
    %92 = arith.cmpf oge, %90, %91 : vector<2x24x16xf32>
    %cst_38 = arith.constant 2.000000e-01 : f32
    %93 = vector.broadcast %cst_38 : f32 to vector<2x24x16xf32>
    %94 = arith.mulf %93, %90 : vector<2x24x16xf32>
    %95 = arith.select %92, %90, %94 : vector<2x24x16xi1>, vector<2x24x16xf32>
    %cst_39 = arith.constant 0.000000e+00 : f32
    %96 = vector.broadcast %cst_39 : f32 to vector<2x512xf32>
    %97 = vector.extract_strided_slice %95 {offsets = [0, 0, 0], sizes = [2, 1, 16], strides = [1, 1, 1]} : vector<2x24x16xf32> to vector<2x1x16xf32>
    %98 = vector.shape_cast %97 : vector<2x1x16xf32> to vector<2x16xf32>
    %99 = arith.truncf %98 : vector<2x16xf32> to vector<2x16xbf16>
    %c0_40 = arith.constant 0 : index
    %c0_41 = arith.constant 0 : index
    %c0_42 = arith.constant 0 : index
    %100 = vector.load %arg5[%c0_40, %c0_41, %c0_42] : memref<24x16x512xbf16, #tpu.memory_space<vmem>>, vector<1x16x512xbf16>
    %101 = vector.shape_cast %100 : vector<1x16x512xbf16> to vector<16x512xbf16>
    %cst_43 = arith.constant dense<0.000000e+00> : vector<2x512xf32>
    %102 = tpu.matmul %99, %101, %cst_43 {dimension_numbers = #tpu.dot_dimension_numbers<[1], [0], [0], [1], [0, 0, 1, 1], [], []>} : vector<2x16xbf16>, vector<16x512xbf16>, vector<2x512xf32> -> vector<2x512xf32>
    %103 = arith.addf %96, %102 : vector<2x512xf32>
    %104 = vector.extract_strided_slice %95 {offsets = [0, 1, 0], sizes = [2, 1, 16], strides = [1, 1, 1]} : vector<2x24x16xf32> to vector<2x1x16xf32>
    %105 = vector.shape_cast %104 : vector<2x1x16xf32> to vector<2x16xf32>
    %106 = arith.truncf %105 : vector<2x16xf32> to vector<2x16xbf16>
    %c1_44 = arith.constant 1 : index
    %c0_45 = arith.constant 0 : index
    %c0_46 = arith.constant 0 : index
    %107 = vector.load %arg5[%c1_44, %c0_45, %c0_46] : memref<24x16x512xbf16, #tpu.memory_space<vmem>>, vector<1x16x512xbf16>
    %108 = vector.shape_cast %107 : vector<1x16x512xbf16> to vector<16x512xbf16>
    %cst_47 = arith.constant dense<0.000000e+00> : vector<2x512xf32>
    %109 = tpu.matmul %106, %108, %cst_47 {dimension_numbers = #tpu.dot_dimension_numbers<[1], [0], [0], [1], [0, 0, 1, 1], [], []>} : vector<2x16xbf16>, vector<16x512xbf16>, vector<2x512xf32> -> vector<2x512xf32>
    %110 = arith.addf %103, %109 : vector<2x512xf32>
    %111 = vector.extract_strided_slice %95 {offsets = [0, 2, 0], sizes = [2, 1, 16], strides = [1, 1, 1]} : vector<2x24x16xf32> to vector<2x1x16xf32>
    %112 = vector.shape_cast %111 : vector<2x1x16xf32> to vector<2x16xf32>
    %113 = arith.truncf %112 : vector<2x16xf32> to vector<2x16xbf16>
    %c2_48 = arith.constant 2 : index
    %c0_49 = arith.constant 0 : index
    %c0_50 = arith.constant 0 : index
    %114 = vector.load %arg5[%c2_48, %c0_49, %c0_50] : memref<24x16x512xbf16, #tpu.memory_space<vmem>>, vector<1x16x512xbf16>
    %115 = vector.shape_cast %114 : vector<1x16x512xbf16> to vector<16x512xbf16>
    %cst_51 = arith.constant dense<0.000000e+00> : vector<2x512xf32>
    %116 = tpu.matmul %113, %115, %cst_51 {dimension_numbers = #tpu.dot_dimension_numbers<[1], [0], [0], [1], [0, 0, 1, 1], [], []>} : vector<2x16xbf16>, vector<16x512xbf16>, vector<2x512xf32> -> vector<2x512xf32>
    %117 = arith.addf %110, %116 : vector<2x512xf32>
    %118 = vector.extract_strided_slice %95 {offsets = [0, 3, 0], sizes = [2, 1, 16], strides = [1, 1, 1]} : vector<2x24x16xf32> to vector<2x1x16xf32>
    %119 = vector.shape_cast %118 : vector<2x1x16xf32> to vector<2x16xf32>
    %120 = arith.truncf %119 : vector<2x16xf32> to vector<2x16xbf16>
    %c3 = arith.constant 3 : index
    %c0_52 = arith.constant 0 : index
    %c0_53 = arith.constant 0 : index
    %121 = vector.load %arg5[%c3, %c0_52, %c0_53] : memref<24x16x512xbf16, #tpu.memory_space<vmem>>, vector<1x16x512xbf16>
    %122 = vector.shape_cast %121 : vector<1x16x512xbf16> to vector<16x512xbf16>
    %cst_54 = arith.constant dense<0.000000e+00> : vector<2x512xf32>
    %123 = tpu.matmul %120, %122, %cst_54 {dimension_numbers = #tpu.dot_dimension_numbers<[1], [0], [0], [1], [0, 0, 1, 1], [], []>} : vector<2x16xbf16>, vector<16x512xbf16>, vector<2x512xf32> -> vector<2x512xf32>
    %124 = arith.addf %117, %123 : vector<2x512xf32>
    %125 = vector.extract_strided_slice %95 {offsets = [0, 4, 0], sizes = [2, 1, 16], strides = [1, 1, 1]} : vector<2x24x16xf32> to vector<2x1x16xf32>
    %126 = vector.shape_cast %125 : vector<2x1x16xf32> to vector<2x16xf32>
    %127 = arith.truncf %126 : vector<2x16xf32> to vector<2x16xbf16>
    %c4 = arith.constant 4 : index
    %c0_55 = arith.constant 0 : index
    %c0_56 = arith.constant 0 : index
    %128 = vector.load %arg5[%c4, %c0_55, %c0_56] : memref<24x16x512xbf16, #tpu.memory_space<vmem>>, vector<1x16x512xbf16>
    %129 = vector.shape_cast %128 : vector<1x16x512xbf16> to vector<16x512xbf16>
    %cst_57 = arith.constant dense<0.000000e+00> : vector<2x512xf32>
    %130 = tpu.matmul %127, %129, %cst_57 {dimension_numbers = #tpu.dot_dimension_numbers<[1], [0], [0], [1], [0, 0, 1, 1], [], []>} : vector<2x16xbf16>, vector<16x512xbf16>, vector<2x512xf32> -> vector<2x512xf32>
    %131 = arith.addf %124, %130 : vector<2x512xf32>
    %132 = vector.extract_strided_slice %95 {offsets = [0, 5, 0], sizes = [2, 1, 16], strides = [1, 1, 1]} : vector<2x24x16xf32> to vector<2x1x16xf32>
    %133 = vector.shape_cast %132 : vector<2x1x16xf32> to vector<2x16xf32>
    %134 = arith.truncf %133 : vector<2x16xf32> to vector<2x16xbf16>
    %c5 = arith.constant 5 : index
    %c0_58 = arith.constant 0 : index
    %c0_59 = arith.constant 0 : index
    %135 = vector.load %arg5[%c5, %c0_58, %c0_59] : memref<24x16x512xbf16, #tpu.memory_space<vmem>>, vector<1x16x512xbf16>
    %136 = vector.shape_cast %135 : vector<1x16x512xbf16> to vector<16x512xbf16>
    %cst_60 = arith.constant dense<0.000000e+00> : vector<2x512xf32>
    %137 = tpu.matmul %134, %136, %cst_60 {dimension_numbers = #tpu.dot_dimension_numbers<[1], [0], [0], [1], [0, 0, 1, 1], [], []>} : vector<2x16xbf16>, vector<16x512xbf16>, vector<2x512xf32> -> vector<2x512xf32>
    %138 = arith.addf %131, %137 : vector<2x512xf32>
    %139 = vector.extract_strided_slice %95 {offsets = [0, 6, 0], sizes = [2, 1, 16], strides = [1, 1, 1]} : vector<2x24x16xf32> to vector<2x1x16xf32>
    %140 = vector.shape_cast %139 : vector<2x1x16xf32> to vector<2x16xf32>
    %141 = arith.truncf %140 : vector<2x16xf32> to vector<2x16xbf16>
    %c6 = arith.constant 6 : index
    %c0_61 = arith.constant 0 : index
    %c0_62 = arith.constant 0 : index
    %142 = vector.load %arg5[%c6, %c0_61, %c0_62] : memref<24x16x512xbf16, #tpu.memory_space<vmem>>, vector<1x16x512xbf16>
    %143 = vector.shape_cast %142 : vector<1x16x512xbf16> to vector<16x512xbf16>
    %cst_63 = arith.constant dense<0.000000e+00> : vector<2x512xf32>
    %144 = tpu.matmul %141, %143, %cst_63 {dimension_numbers = #tpu.dot_dimension_numbers<[1], [0], [0], [1], [0, 0, 1, 1], [], []>} : vector<2x16xbf16>, vector<16x512xbf16>, vector<2x512xf32> -> vector<2x512xf32>
    %145 = arith.addf %138, %144 : vector<2x512xf32>
    %146 = vector.extract_strided_slice %95 {offsets = [0, 7, 0], sizes = [2, 1, 16], strides = [1, 1, 1]} : vector<2x24x16xf32> to vector<2x1x16xf32>
    %147 = vector.shape_cast %146 : vector<2x1x16xf32> to vector<2x16xf32>
    %148 = arith.truncf %147 : vector<2x16xf32> to vector<2x16xbf16>
    %c7 = arith.constant 7 : index
    %c0_64 = arith.constant 0 : index
    %c0_65 = arith.constant 0 : index
    %149 = vector.load %arg5[%c7, %c0_64, %c0_65] : memref<24x16x512xbf16, #tpu.memory_space<vmem>>, vector<1x16x512xbf16>
    %150 = vector.shape_cast %149 : vector<1x16x512xbf16> to vector<16x512xbf16>
    %cst_66 = arith.constant dense<0.000000e+00> : vector<2x512xf32>
    %151 = tpu.matmul %148, %150, %cst_66 {dimension_numbers = #tpu.dot_dimension_numbers<[1], [0], [0], [1], [0, 0, 1, 1], [], []>} : vector<2x16xbf16>, vector<16x512xbf16>, vector<2x512xf32> -> vector<2x512xf32>
    %152 = arith.addf %145, %151 : vector<2x512xf32>
    %153 = vector.extract_strided_slice %95 {offsets = [0, 8, 0], sizes = [2, 1, 16], strides = [1, 1, 1]} : vector<2x24x16xf32> to vector<2x1x16xf32>
    %154 = vector.shape_cast %153 : vector<2x1x16xf32> to vector<2x16xf32>
    %155 = arith.truncf %154 : vector<2x16xf32> to vector<2x16xbf16>
    %c8 = arith.constant 8 : index
    %c0_67 = arith.constant 0 : index
    %c0_68 = arith.constant 0 : index
    %156 = vector.load %arg5[%c8, %c0_67, %c0_68] : memref<24x16x512xbf16, #tpu.memory_space<vmem>>, vector<1x16x512xbf16>
    %157 = vector.shape_cast %156 : vector<1x16x512xbf16> to vector<16x512xbf16>
    %cst_69 = arith.constant dense<0.000000e+00> : vector<2x512xf32>
    %158 = tpu.matmul %155, %157, %cst_69 {dimension_numbers = #tpu.dot_dimension_numbers<[1], [0], [0], [1], [0, 0, 1, 1], [], []>} : vector<2x16xbf16>, vector<16x512xbf16>, vector<2x512xf32> -> vector<2x512xf32>
    %159 = arith.addf %152, %158 : vector<2x512xf32>
    %160 = vector.extract_strided_slice %95 {offsets = [0, 9, 0], sizes = [2, 1, 16], strides = [1, 1, 1]} : vector<2x24x16xf32> to vector<2x1x16xf32>
    %161 = vector.shape_cast %160 : vector<2x1x16xf32> to vector<2x16xf32>
    %162 = arith.truncf %161 : vector<2x16xf32> to vector<2x16xbf16>
    %c9 = arith.constant 9 : index
    %c0_70 = arith.constant 0 : index
    %c0_71 = arith.constant 0 : index
    %163 = vector.load %arg5[%c9, %c0_70, %c0_71] : memref<24x16x512xbf16, #tpu.memory_space<vmem>>, vector<1x16x512xbf16>
    %164 = vector.shape_cast %163 : vector<1x16x512xbf16> to vector<16x512xbf16>
    %cst_72 = arith.constant dense<0.000000e+00> : vector<2x512xf32>
    %165 = tpu.matmul %162, %164, %cst_72 {dimension_numbers = #tpu.dot_dimension_numbers<[1], [0], [0], [1], [0, 0, 1, 1], [], []>} : vector<2x16xbf16>, vector<16x512xbf16>, vector<2x512xf32> -> vector<2x512xf32>
    %166 = arith.addf %159, %165 : vector<2x512xf32>
    %167 = vector.extract_strided_slice %95 {offsets = [0, 10, 0], sizes = [2, 1, 16], strides = [1, 1, 1]} : vector<2x24x16xf32> to vector<2x1x16xf32>
    %168 = vector.shape_cast %167 : vector<2x1x16xf32> to vector<2x16xf32>
    %169 = arith.truncf %168 : vector<2x16xf32> to vector<2x16xbf16>
    %c10 = arith.constant 10 : index
    %c0_73 = arith.constant 0 : index
    %c0_74 = arith.constant 0 : index
    %170 = vector.load %arg5[%c10, %c0_73, %c0_74] : memref<24x16x512xbf16, #tpu.memory_space<vmem>>, vector<1x16x512xbf16>
    %171 = vector.shape_cast %170 : vector<1x16x512xbf16> to vector<16x512xbf16>
    %cst_75 = arith.constant dense<0.000000e+00> : vector<2x512xf32>
    %172 = tpu.matmul %169, %171, %cst_75 {dimension_numbers = #tpu.dot_dimension_numbers<[1], [0], [0], [1], [0, 0, 1, 1], [], []>} : vector<2x16xbf16>, vector<16x512xbf16>, vector<2x512xf32> -> vector<2x512xf32>
    %173 = arith.addf %166, %172 : vector<2x512xf32>
    %174 = vector.extract_strided_slice %95 {offsets = [0, 11, 0], sizes = [2, 1, 16], strides = [1, 1, 1]} : vector<2x24x16xf32> to vector<2x1x16xf32>
    %175 = vector.shape_cast %174 : vector<2x1x16xf32> to vector<2x16xf32>
    %176 = arith.truncf %175 : vector<2x16xf32> to vector<2x16xbf16>
    %c11 = arith.constant 11 : index
    %c0_76 = arith.constant 0 : index
    %c0_77 = arith.constant 0 : index
    %177 = vector.load %arg5[%c11, %c0_76, %c0_77] : memref<24x16x512xbf16, #tpu.memory_space<vmem>>, vector<1x16x512xbf16>
    %178 = vector.shape_cast %177 : vector<1x16x512xbf16> to vector<16x512xbf16>
    %cst_78 = arith.constant dense<0.000000e+00> : vector<2x512xf32>
    %179 = tpu.matmul %176, %178, %cst_78 {dimension_numbers = #tpu.dot_dimension_numbers<[1], [0], [0], [1], [0, 0, 1, 1], [], []>} : vector<2x16xbf16>, vector<16x512xbf16>, vector<2x512xf32> -> vector<2x512xf32>
    %180 = arith.addf %173, %179 : vector<2x512xf32>
    %181 = vector.extract_strided_slice %95 {offsets = [0, 12, 0], sizes = [2, 1, 16], strides = [1, 1, 1]} : vector<2x24x16xf32> to vector<2x1x16xf32>
    %182 = vector.shape_cast %181 : vector<2x1x16xf32> to vector<2x16xf32>
    %183 = arith.truncf %182 : vector<2x16xf32> to vector<2x16xbf16>
    %c12 = arith.constant 12 : index
    %c0_79 = arith.constant 0 : index
    %c0_80 = arith.constant 0 : index
    %184 = vector.load %arg5[%c12, %c0_79, %c0_80] : memref<24x16x512xbf16, #tpu.memory_space<vmem>>, vector<1x16x512xbf16>
    %185 = vector.shape_cast %184 : vector<1x16x512xbf16> to vector<16x512xbf16>
    %cst_81 = arith.constant dense<0.000000e+00> : vector<2x512xf32>
    %186 = tpu.matmul %183, %185, %cst_81 {dimension_numbers = #tpu.dot_dimension_numbers<[1], [0], [0], [1], [0, 0, 1, 1], [], []>} : vector<2x16xbf16>, vector<16x512xbf16>, vector<2x512xf32> -> vector<2x512xf32>
    %187 = arith.addf %180, %186 : vector<2x512xf32>
    %188 = vector.extract_strided_slice %95 {offsets = [0, 13, 0], sizes = [2, 1, 16], strides = [1, 1, 1]} : vector<2x24x16xf32> to vector<2x1x16xf32>
    %189 = vector.shape_cast %188 : vector<2x1x16xf32> to vector<2x16xf32>
    %190 = arith.truncf %189 : vector<2x16xf32> to vector<2x16xbf16>
    %c13 = arith.constant 13 : index
    %c0_82 = arith.constant 0 : index
    %c0_83 = arith.constant 0 : index
    %191 = vector.load %arg5[%c13, %c0_82, %c0_83] : memref<24x16x512xbf16, #tpu.memory_space<vmem>>, vector<1x16x512xbf16>
    %192 = vector.shape_cast %191 : vector<1x16x512xbf16> to vector<16x512xbf16>
    %cst_84 = arith.constant dense<0.000000e+00> : vector<2x512xf32>
    %193 = tpu.matmul %190, %192, %cst_84 {dimension_numbers = #tpu.dot_dimension_numbers<[1], [0], [0], [1], [0, 0, 1, 1], [], []>} : vector<2x16xbf16>, vector<16x512xbf16>, vector<2x512xf32> -> vector<2x512xf32>
    %194 = arith.addf %187, %193 : vector<2x512xf32>
    %195 = vector.extract_strided_slice %95 {offsets = [0, 14, 0], sizes = [2, 1, 16], strides = [1, 1, 1]} : vector<2x24x16xf32> to vector<2x1x16xf32>
    %196 = vector.shape_cast %195 : vector<2x1x16xf32> to vector<2x16xf32>
    %197 = arith.truncf %196 : vector<2x16xf32> to vector<2x16xbf16>
    %c14 = arith.constant 14 : index
    %c0_85 = arith.constant 0 : index
    %c0_86 = arith.constant 0 : index
    %198 = vector.load %arg5[%c14, %c0_85, %c0_86] : memref<24x16x512xbf16, #tpu.memory_space<vmem>>, vector<1x16x512xbf16>
    %199 = vector.shape_cast %198 : vector<1x16x512xbf16> to vector<16x512xbf16>
    %cst_87 = arith.constant dense<0.000000e+00> : vector<2x512xf32>
    %200 = tpu.matmul %197, %199, %cst_87 {dimension_numbers = #tpu.dot_dimension_numbers<[1], [0], [0], [1], [0, 0, 1, 1], [], []>} : vector<2x16xbf16>, vector<16x512xbf16>, vector<2x512xf32> -> vector<2x512xf32>
    %201 = arith.addf %194, %200 : vector<2x512xf32>
    %202 = vector.extract_strided_slice %95 {offsets = [0, 15, 0], sizes = [2, 1, 16], strides = [1, 1, 1]} : vector<2x24x16xf32> to vector<2x1x16xf32>
    %203 = vector.shape_cast %202 : vector<2x1x16xf32> to vector<2x16xf32>
    %204 = arith.truncf %203 : vector<2x16xf32> to vector<2x16xbf16>
    %c15 = arith.constant 15 : index
    %c0_88 = arith.constant 0 : index
    %c0_89 = arith.constant 0 : index
    %205 = vector.load %arg5[%c15, %c0_88, %c0_89] : memref<24x16x512xbf16, #tpu.memory_space<vmem>>, vector<1x16x512xbf16>
    %206 = vector.shape_cast %205 : vector<1x16x512xbf16> to vector<16x512xbf16>
    %cst_90 = arith.constant dense<0.000000e+00> : vector<2x512xf32>
    %207 = tpu.matmul %204, %206, %cst_90 {dimension_numbers = #tpu.dot_dimension_numbers<[1], [0], [0], [1], [0, 0, 1, 1], [], []>} : vector<2x16xbf16>, vector<16x512xbf16>, vector<2x512xf32> -> vector<2x512xf32>
    %208 = arith.addf %201, %207 : vector<2x512xf32>
    %209 = vector.extract_strided_slice %95 {offsets = [0, 16, 0], sizes = [2, 1, 16], strides = [1, 1, 1]} : vector<2x24x16xf32> to vector<2x1x16xf32>
    %210 = vector.shape_cast %209 : vector<2x1x16xf32> to vector<2x16xf32>
    %211 = arith.truncf %210 : vector<2x16xf32> to vector<2x16xbf16>
    %c16 = arith.constant 16 : index
    %c0_91 = arith.constant 0 : index
    %c0_92 = arith.constant 0 : index
    %212 = vector.load %arg5[%c16, %c0_91, %c0_92] : memref<24x16x512xbf16, #tpu.memory_space<vmem>>, vector<1x16x512xbf16>
    %213 = vector.shape_cast %212 : vector<1x16x512xbf16> to vector<16x512xbf16>
    %cst_93 = arith.constant dense<0.000000e+00> : vector<2x512xf32>
    %214 = tpu.matmul %211, %213, %cst_93 {dimension_numbers = #tpu.dot_dimension_numbers<[1], [0], [0], [1], [0, 0, 1, 1], [], []>} : vector<2x16xbf16>, vector<16x512xbf16>, vector<2x512xf32> -> vector<2x512xf32>
    %215 = arith.addf %208, %214 : vector<2x512xf32>
    %216 = vector.extract_strided_slice %95 {offsets = [0, 17, 0], sizes = [2, 1, 16], strides = [1, 1, 1]} : vector<2x24x16xf32> to vector<2x1x16xf32>
    %217 = vector.shape_cast %216 : vector<2x1x16xf32> to vector<2x16xf32>
    %218 = arith.truncf %217 : vector<2x16xf32> to vector<2x16xbf16>
    %c17 = arith.constant 17 : index
    %c0_94 = arith.constant 0 : index
    %c0_95 = arith.constant 0 : index
    %219 = vector.load %arg5[%c17, %c0_94, %c0_95] : memref<24x16x512xbf16, #tpu.memory_space<vmem>>, vector<1x16x512xbf16>
    %220 = vector.shape_cast %219 : vector<1x16x512xbf16> to vector<16x512xbf16>
    %cst_96 = arith.constant dense<0.000000e+00> : vector<2x512xf32>
    %221 = tpu.matmul %218, %220, %cst_96 {dimension_numbers = #tpu.dot_dimension_numbers<[1], [0], [0], [1], [0, 0, 1, 1], [], []>} : vector<2x16xbf16>, vector<16x512xbf16>, vector<2x512xf32> -> vector<2x512xf32>
    %222 = arith.addf %215, %221 : vector<2x512xf32>
    %223 = vector.extract_strided_slice %95 {offsets = [0, 18, 0], sizes = [2, 1, 16], strides = [1, 1, 1]} : vector<2x24x16xf32> to vector<2x1x16xf32>
    %224 = vector.shape_cast %223 : vector<2x1x16xf32> to vector<2x16xf32>
    %225 = arith.truncf %224 : vector<2x16xf32> to vector<2x16xbf16>
    %c18_97 = arith.constant 18 : index
    %c0_98 = arith.constant 0 : index
    %c0_99 = arith.constant 0 : index
    %226 = vector.load %arg5[%c18_97, %c0_98, %c0_99] : memref<24x16x512xbf16, #tpu.memory_space<vmem>>, vector<1x16x512xbf16>
    %227 = vector.shape_cast %226 : vector<1x16x512xbf16> to vector<16x512xbf16>
    %cst_100 = arith.constant dense<0.000000e+00> : vector<2x512xf32>
    %228 = tpu.matmul %225, %227, %cst_100 {dimension_numbers = #tpu.dot_dimension_numbers<[1], [0], [0], [1], [0, 0, 1, 1], [], []>} : vector<2x16xbf16>, vector<16x512xbf16>, vector<2x512xf32> -> vector<2x512xf32>
    %229 = arith.addf %222, %228 : vector<2x512xf32>
    %230 = vector.extract_strided_slice %95 {offsets = [0, 19, 0], sizes = [2, 1, 16], strides = [1, 1, 1]} : vector<2x24x16xf32> to vector<2x1x16xf32>
    %231 = vector.shape_cast %230 : vector<2x1x16xf32> to vector<2x16xf32>
    %232 = arith.truncf %231 : vector<2x16xf32> to vector<2x16xbf16>
    %c19 = arith.constant 19 : index
    %c0_101 = arith.constant 0 : index
    %c0_102 = arith.constant 0 : index
    %233 = vector.load %arg5[%c19, %c0_101, %c0_102] : memref<24x16x512xbf16, #tpu.memory_space<vmem>>, vector<1x16x512xbf16>
    %234 = vector.shape_cast %233 : vector<1x16x512xbf16> to vector<16x512xbf16>
    %cst_103 = arith.constant dense<0.000000e+00> : vector<2x512xf32>
    %235 = tpu.matmul %232, %234, %cst_103 {dimension_numbers = #tpu.dot_dimension_numbers<[1], [0], [0], [1], [0, 0, 1, 1], [], []>} : vector<2x16xbf16>, vector<16x512xbf16>, vector<2x512xf32> -> vector<2x512xf32>
    %236 = arith.addf %229, %235 : vector<2x512xf32>
    %237 = vector.extract_strided_slice %95 {offsets = [0, 20, 0], sizes = [2, 1, 16], strides = [1, 1, 1]} : vector<2x24x16xf32> to vector<2x1x16xf32>
    %238 = vector.shape_cast %237 : vector<2x1x16xf32> to vector<2x16xf32>
    %239 = arith.truncf %238 : vector<2x16xf32> to vector<2x16xbf16>
    %c20 = arith.constant 20 : index
    %c0_104 = arith.constant 0 : index
    %c0_105 = arith.constant 0 : index
    %240 = vector.load %arg5[%c20, %c0_104, %c0_105] : memref<24x16x512xbf16, #tpu.memory_space<vmem>>, vector<1x16x512xbf16>
    %241 = vector.shape_cast %240 : vector<1x16x512xbf16> to vector<16x512xbf16>
    %cst_106 = arith.constant dense<0.000000e+00> : vector<2x512xf32>
    %242 = tpu.matmul %239, %241, %cst_106 {dimension_numbers = #tpu.dot_dimension_numbers<[1], [0], [0], [1], [0, 0, 1, 1], [], []>} : vector<2x16xbf16>, vector<16x512xbf16>, vector<2x512xf32> -> vector<2x512xf32>
    %243 = arith.addf %236, %242 : vector<2x512xf32>
    %244 = vector.extract_strided_slice %95 {offsets = [0, 21, 0], sizes = [2, 1, 16], strides = [1, 1, 1]} : vector<2x24x16xf32> to vector<2x1x16xf32>
    %245 = vector.shape_cast %244 : vector<2x1x16xf32> to vector<2x16xf32>
    %246 = arith.truncf %245 : vector<2x16xf32> to vector<2x16xbf16>
    %c21 = arith.constant 21 : index
    %c0_107 = arith.constant 0 : index
    %c0_108 = arith.constant 0 : index
    %247 = vector.load %arg5[%c21, %c0_107, %c0_108] : memref<24x16x512xbf16, #tpu.memory_space<vmem>>, vector<1x16x512xbf16>
    %248 = vector.shape_cast %247 : vector<1x16x512xbf16> to vector<16x512xbf16>
    %cst_109 = arith.constant dense<0.000000e+00> : vector<2x512xf32>
    %249 = tpu.matmul %246, %248, %cst_109 {dimension_numbers = #tpu.dot_dimension_numbers<[1], [0], [0], [1], [0, 0, 1, 1], [], []>} : vector<2x16xbf16>, vector<16x512xbf16>, vector<2x512xf32> -> vector<2x512xf32>
    %250 = arith.addf %243, %249 : vector<2x512xf32>
    %251 = vector.extract_strided_slice %95 {offsets = [0, 22, 0], sizes = [2, 1, 16], strides = [1, 1, 1]} : vector<2x24x16xf32> to vector<2x1x16xf32>
    %252 = vector.shape_cast %251 : vector<2x1x16xf32> to vector<2x16xf32>
    %253 = arith.truncf %252 : vector<2x16xf32> to vector<2x16xbf16>
    %c22 = arith.constant 22 : index
    %c0_110 = arith.constant 0 : index
    %c0_111 = arith.constant 0 : index
    %254 = vector.load %arg5[%c22, %c0_110, %c0_111] : memref<24x16x512xbf16, #tpu.memory_space<vmem>>, vector<1x16x512xbf16>
    %255 = vector.shape_cast %254 : vector<1x16x512xbf16> to vector<16x512xbf16>
    %cst_112 = arith.constant dense<0.000000e+00> : vector<2x512xf32>
    %256 = tpu.matmul %253, %255, %cst_112 {dimension_numbers = #tpu.dot_dimension_numbers<[1], [0], [0], [1], [0, 0, 1, 1], [], []>} : vector<2x16xbf16>, vector<16x512xbf16>, vector<2x512xf32> -> vector<2x512xf32>
    %257 = arith.addf %250, %256 : vector<2x512xf32>
    %258 = vector.extract_strided_slice %95 {offsets = [0, 23, 0], sizes = [2, 1, 16], strides = [1, 1, 1]} : vector<2x24x16xf32> to vector<2x1x16xf32>
    %259 = vector.shape_cast %258 : vector<2x1x16xf32> to vector<2x16xf32>
    %260 = arith.truncf %259 : vector<2x16xf32> to vector<2x16xbf16>
    %c23 = arith.constant 23 : index
    %c0_113 = arith.constant 0 : index
    %c0_114 = arith.constant 0 : index
    %261 = vector.load %arg5[%c23, %c0_113, %c0_114] : memref<24x16x512xbf16, #tpu.memory_space<vmem>>, vector<1x16x512xbf16>
    %262 = vector.shape_cast %261 : vector<1x16x512xbf16> to vector<16x512xbf16>
    %cst_115 = arith.constant dense<0.000000e+00> : vector<2x512xf32>
    %263 = tpu.matmul %260, %262, %cst_115 {dimension_numbers = #tpu.dot_dimension_numbers<[1], [0], [0], [1], [0, 0, 1, 1], [], []>} : vector<2x16xbf16>, vector<16x512xbf16>, vector<2x512xf32> -> vector<2x512xf32>
    %264 = arith.addf %257, %263 : vector<2x512xf32>
    %c0_116 = arith.constant 0 : index
    %c0_117 = arith.constant 0 : index
    %265 = vector.load %arg6[%c0_116, %c0_117] : memref<1x512xf32, #tpu.memory_space<vmem>>, vector<1x512xf32>
    %266 = vector.broadcast %265 : vector<1x512xf32> to vector<2x512xf32>
    %267 = arith.addf %264, %266 : vector<2x512xf32>
    %cst_118 = arith.constant 0.000000e+00 : f32
    %268 = vector.broadcast %cst_118 : f32 to vector<2x512xf32>
    %269 = arith.cmpf oge, %267, %268 : vector<2x512xf32>
    %cst_119 = arith.constant 2.000000e-01 : f32
    %270 = vector.broadcast %cst_119 : f32 to vector<2x512xf32>
    %271 = arith.mulf %270, %267 : vector<2x512xf32>
    %272 = arith.select %269, %267, %271 : vector<2x512xi1>, vector<2x512xf32>
    %273 = arith.truncf %272 : vector<2x512xf32> to vector<2x512xbf16>
    %c0_120 = arith.constant 0 : index
    %c0_121 = arith.constant 0 : index
    %274 = vector.load %arg7[%c0_120, %c0_121] : memref<512x768xbf16, #tpu.memory_space<vmem>>, vector<512x768xbf16>
    %cst_122 = arith.constant dense<0.000000e+00> : vector<2x768xf32>
    %275 = tpu.matmul %273, %274, %cst_122 {dimension_numbers = #tpu.dot_dimension_numbers<[1], [0], [0], [1], [0, 0, 1, 1], [], []>} : vector<2x512xbf16>, vector<512x768xbf16>, vector<2x768xf32> -> vector<2x768xf32>
    %c0_123 = arith.constant 0 : index
    %c0_124 = arith.constant 0 : index
    %276 = vector.load %arg8[%c0_123, %c0_124] : memref<1x768xf32, #tpu.memory_space<vmem>>, vector<1x768xf32>
    %277 = vector.broadcast %276 : vector<1x768xf32> to vector<2x768xf32>
    %278 = arith.addf %275, %277 : vector<2x768xf32>
    %cst_125 = arith.constant dense<0.000000e+00> : vector<768xf32>
    %279 = vector.multi_reduction <add>, %278, %cst_125 [0] : vector<2x768xf32> to vector<768xf32>
    %280 = vector.shape_cast %279 : vector<768xf32> to vector<1x768xf32>
    %cst_126 = arith.constant 2.000000e+00 : f32
    %281 = vector.broadcast %cst_126 : f32 to vector<1x768xf32>
    %282 = arith.divf %280, %281 : vector<1x768xf32>
    %283 = vector.broadcast %282 : vector<1x768xf32> to vector<2x768xf32>
    %284 = arith.subf %278, %283 : vector<2x768xf32>
    %285 = arith.mulf %284, %284 : vector<2x768xf32>
    %cst_127 = arith.constant dense<0.000000e+00> : vector<768xf32>
    %286 = vector.multi_reduction <add>, %285, %cst_127 [0] : vector<2x768xf32> to vector<768xf32>
    %287 = vector.shape_cast %286 : vector<768xf32> to vector<1x768xf32>
    %cst_128 = arith.constant 2.000000e+00 : f32
    %288 = vector.broadcast %cst_128 : f32 to vector<1x768xf32>
    %289 = arith.divf %287, %288 : vector<1x768xf32>
    %290 = vector.broadcast %282 : vector<1x768xf32> to vector<2x768xf32>
    %291 = arith.subf %278, %290 : vector<2x768xf32>
    %cst_129 = arith.constant 0.899999976 : f32
    %292 = vector.broadcast %cst_129 : f32 to vector<1x768xf32>
    %293 = arith.addf %289, %292 : vector<1x768xf32>
    %294 = math.rsqrt %293 : vector<1x768xf32>
    %295 = vector.broadcast %294 : vector<1x768xf32> to vector<2x768xf32>
    %296 = arith.mulf %291, %295 : vector<2x768xf32>
    %c0_130 = arith.constant 0 : index
    %c0_131 = arith.constant 0 : index
    %297 = vector.load %arg9[%c0_130, %c0_131] : memref<1x768xf32, #tpu.memory_space<vmem>>, vector<1x768xf32>
    %298 = vector.broadcast %297 : vector<1x768xf32> to vector<2x768xf32>
    %299 = arith.mulf %296, %298 : vector<2x768xf32>
    %c0_132 = arith.constant 0 : index
    %c0_133 = arith.constant 0 : index
    %300 = vector.load %arg10[%c0_132, %c0_133] : memref<1x768xf32, #tpu.memory_space<vmem>>, vector<1x768xf32>
    %301 = vector.broadcast %300 : vector<1x768xf32> to vector<2x768xf32>
    %302 = arith.addf %299, %301 : vector<2x768xf32>
    %cst_134 = arith.constant 0.000000e+00 : f32
    %303 = vector.broadcast %cst_134 : f32 to vector<2x768xf32>
    %304 = arith.cmpf oge, %302, %303 : vector<2x768xf32>
    %cst_135 = arith.constant 2.000000e-01 : f32
    %305 = vector.broadcast %cst_135 : f32 to vector<2x768xf32>
    %306 = arith.mulf %305, %302 : vector<2x768xf32>
    %307 = arith.select %304, %302, %306 : vector<2x768xi1>, vector<2x768xf32>
    %308 = arith.truncf %307 : vector<2x768xf32> to vector<2x768xbf16>
    %c0_136 = arith.constant 0 : index
    %c0_137 = arith.constant 0 : index
    %309 = vector.load %arg11[%c0_136, %c0_137] : memref<768x512xbf16, #tpu.memory_space<vmem>>, vector<768x512xbf16>
    %cst_138 = arith.constant dense<0.000000e+00> : vector<2x512xf32>
    %310 = tpu.matmul %308, %309, %cst_138 {dimension_numbers = #tpu.dot_dimension_numbers<[1], [0], [0], [1], [0, 0, 1, 1], [], []>} : vector<2x768xbf16>, vector<768x512xbf16>, vector<2x512xf32> -> vector<2x512xf32>
    %c0_139 = arith.constant 0 : index
    %c0_140 = arith.constant 0 : index
    %311 = vector.load %arg12[%c0_139, %c0_140] : memref<1x512xf32, #tpu.memory_space<vmem>>, vector<1x512xf32>
    %312 = vector.broadcast %311 : vector<1x512xf32> to vector<2x512xf32>
    %313 = arith.addf %310, %312 : vector<2x512xf32>
    %cst_141 = arith.constant dense<0.000000e+00> : vector<512xf32>
    %314 = vector.multi_reduction <add>, %313, %cst_141 [0] : vector<2x512xf32> to vector<512xf32>
    %315 = vector.shape_cast %314 : vector<512xf32> to vector<1x512xf32>
    %cst_142 = arith.constant 2.000000e+00 : f32
    %316 = vector.broadcast %cst_142 : f32 to vector<1x512xf32>
    %317 = arith.divf %315, %316 : vector<1x512xf32>
    %318 = vector.broadcast %317 : vector<1x512xf32> to vector<2x512xf32>
    %319 = arith.subf %313, %318 : vector<2x512xf32>
    %320 = arith.mulf %319, %319 : vector<2x512xf32>
    %cst_143 = arith.constant dense<0.000000e+00> : vector<512xf32>
    %321 = vector.multi_reduction <add>, %320, %cst_143 [0] : vector<2x512xf32> to vector<512xf32>
    %322 = vector.shape_cast %321 : vector<512xf32> to vector<1x512xf32>
    %cst_144 = arith.constant 2.000000e+00 : f32
    %323 = vector.broadcast %cst_144 : f32 to vector<1x512xf32>
    %324 = arith.divf %322, %323 : vector<1x512xf32>
    %325 = vector.broadcast %317 : vector<1x512xf32> to vector<2x512xf32>
    %326 = arith.subf %313, %325 : vector<2x512xf32>
    %cst_145 = arith.constant 0.899999976 : f32
    %327 = vector.broadcast %cst_145 : f32 to vector<1x512xf32>
    %328 = arith.addf %324, %327 : vector<1x512xf32>
    %329 = math.rsqrt %328 : vector<1x512xf32>
    %330 = vector.broadcast %329 : vector<1x512xf32> to vector<2x512xf32>
    %331 = arith.mulf %326, %330 : vector<2x512xf32>
    %c0_146 = arith.constant 0 : index
    %c0_147 = arith.constant 0 : index
    %332 = vector.load %arg13[%c0_146, %c0_147] : memref<1x512xf32, #tpu.memory_space<vmem>>, vector<1x512xf32>
    %333 = vector.broadcast %332 : vector<1x512xf32> to vector<2x512xf32>
    %334 = arith.mulf %331, %333 : vector<2x512xf32>
    %c0_148 = arith.constant 0 : index
    %c0_149 = arith.constant 0 : index
    %335 = vector.load %arg14[%c0_148, %c0_149] : memref<1x512xf32, #tpu.memory_space<vmem>>, vector<1x512xf32>
    %336 = vector.broadcast %335 : vector<1x512xf32> to vector<2x512xf32>
    %337 = arith.addf %334, %336 : vector<2x512xf32>
    %cst_150 = arith.constant 0.000000e+00 : f32
    %338 = vector.broadcast %cst_150 : f32 to vector<2x512xf32>
    %339 = arith.cmpf oge, %337, %338 : vector<2x512xf32>
    %cst_151 = arith.constant 2.000000e-01 : f32
    %340 = vector.broadcast %cst_151 : f32 to vector<2x512xf32>
    %341 = arith.mulf %340, %337 : vector<2x512xf32>
    %342 = arith.select %339, %337, %341 : vector<2x512xi1>, vector<2x512xf32>
    %343 = arith.truncf %342 : vector<2x512xf32> to vector<2x512xbf16>
    %c0_152 = arith.constant 0 : index
    %c0_153 = arith.constant 0 : index
    %344 = vector.load %arg15[%c0_152, %c0_153] : memref<512x384xbf16, #tpu.memory_space<vmem>>, vector<512x384xbf16>
    %cst_154 = arith.constant dense<0.000000e+00> : vector<2x384xf32>
    %345 = tpu.matmul %343, %344, %cst_154 {dimension_numbers = #tpu.dot_dimension_numbers<[1], [0], [0], [1], [0, 0, 1, 1], [], []>} : vector<2x512xbf16>, vector<512x384xbf16>, vector<2x384xf32> -> vector<2x384xf32>
    %c0_155 = arith.constant 0 : index
    %c0_156 = arith.constant 0 : index
    %346 = vector.load %arg16[%c0_155, %c0_156] : memref<1x384xf32, #tpu.memory_space<vmem>>, vector<1x384xf32>
    %347 = vector.broadcast %346 : vector<1x384xf32> to vector<2x384xf32>
    %348 = arith.addf %345, %347 : vector<2x384xf32>
    %cst_157 = arith.constant dense<0.000000e+00> : vector<384xf32>
    %349 = vector.multi_reduction <add>, %348, %cst_157 [0] : vector<2x384xf32> to vector<384xf32>
    %350 = vector.shape_cast %349 : vector<384xf32> to vector<1x384xf32>
    %cst_158 = arith.constant 2.000000e+00 : f32
    %351 = vector.broadcast %cst_158 : f32 to vector<1x384xf32>
    %352 = arith.divf %350, %351 : vector<1x384xf32>
    %353 = vector.broadcast %352 : vector<1x384xf32> to vector<2x384xf32>
    %354 = arith.subf %348, %353 : vector<2x384xf32>
    %355 = arith.mulf %354, %354 : vector<2x384xf32>
    %cst_159 = arith.constant dense<0.000000e+00> : vector<384xf32>
    %356 = vector.multi_reduction <add>, %355, %cst_159 [0] : vector<2x384xf32> to vector<384xf32>
    %357 = vector.shape_cast %356 : vector<384xf32> to vector<1x384xf32>
    %cst_160 = arith.constant 2.000000e+00 : f32
    %358 = vector.broadcast %cst_160 : f32 to vector<1x384xf32>
    %359 = arith.divf %357, %358 : vector<1x384xf32>
    %360 = vector.broadcast %352 : vector<1x384xf32> to vector<2x384xf32>
    %361 = arith.subf %348, %360 : vector<2x384xf32>
    %cst_161 = arith.constant 0.899999976 : f32
    %362 = vector.broadcast %cst_161 : f32 to vector<1x384xf32>
    %363 = arith.addf %359, %362 : vector<1x384xf32>
    %364 = math.rsqrt %363 : vector<1x384xf32>
    %365 = vector.broadcast %364 : vector<1x384xf32> to vector<2x384xf32>
    %366 = arith.mulf %361, %365 : vector<2x384xf32>
    %c0_162 = arith.constant 0 : index
    %c0_163 = arith.constant 0 : index
    %367 = vector.load %arg17[%c0_162, %c0_163] : memref<1x384xf32, #tpu.memory_space<vmem>>, vector<1x384xf32>
    %368 = vector.broadcast %367 : vector<1x384xf32> to vector<2x384xf32>
    %369 = arith.mulf %366, %368 : vector<2x384xf32>
    %c0_164 = arith.constant 0 : index
    %c0_165 = arith.constant 0 : index
    %370 = vector.load %arg18[%c0_164, %c0_165] : memref<1x384xf32, #tpu.memory_space<vmem>>, vector<1x384xf32>
    %371 = vector.broadcast %370 : vector<1x384xf32> to vector<2x384xf32>
    %372 = arith.addf %369, %371 : vector<2x384xf32>
    %cst_166 = arith.constant 0.000000e+00 : f32
    %373 = vector.broadcast %cst_166 : f32 to vector<2x384xf32>
    %374 = arith.cmpf oge, %372, %373 : vector<2x384xf32>
    %cst_167 = arith.constant 2.000000e-01 : f32
    %375 = vector.broadcast %cst_167 : f32 to vector<2x384xf32>
    %376 = arith.mulf %375, %372 : vector<2x384xf32>
    %377 = arith.select %374, %372, %376 : vector<2x384xi1>, vector<2x384xf32>
    %378 = arith.truncf %377 : vector<2x384xf32> to vector<2x384xbf16>
    %c0_168 = arith.constant 0 : index
    %c0_169 = arith.constant 0 : index
    %379 = vector.load %arg19[%c0_168, %c0_169] : memref<384x16xbf16, #tpu.memory_space<vmem>>, vector<384x16xbf16>
    %cst_170 = arith.constant dense<0.000000e+00> : vector<2x16xf32>
    %380 = tpu.matmul %378, %379, %cst_170 {dimension_numbers = #tpu.dot_dimension_numbers<[1], [0], [0], [1], [0, 0, 1, 1], [], []>} : vector<2x384xbf16>, vector<384x16xbf16>, vector<2x16xf32> -> vector<2x16xf32>
    %c0_171 = arith.constant 0 : index
    %c0_172 = arith.constant 0 : index
    %381 = vector.load %arg20[%c0_171, %c0_172] : memref<1x16xf32, #tpu.memory_space<vmem>>, vector<1x16xf32>
    %382 = vector.broadcast %381 : vector<1x16xf32> to vector<2x16xf32>
    %383 = arith.addf %380, %382 : vector<2x16xf32>
    %cst_173 = arith.constant 0.000000e+00 : f32
    %384 = vector.broadcast %cst_173 : f32 to vector<2x16xf32>
    %385 = arith.cmpf oge, %383, %384 : vector<2x16xf32>
    %cst_174 = arith.constant 0.00999999977 : f32
    %386 = vector.broadcast %cst_174 : f32 to vector<2x16xf32>
    %387 = arith.mulf %386, %383 : vector<2x16xf32>
    %388 = arith.select %385, %383, %387 : vector<2x16xi1>, vector<2x16xf32>
    %c0_175 = arith.constant 0 : index
    %c0_176 = arith.constant 0 : index
    %389 = vector.load %arg21[%c0_175, %c0_176] : memref<2x16xf32, #tpu.memory_space<vmem>>, vector<2x16xf32>
    tpu.vector_store %arg21[%c0_175, %c0_176], %388 {strides = array<i32>} : memref<2x16xf32, #tpu.memory_space<vmem>>, vector<2x16xf32>,
    return
  }
}

</mosaic_0001>

<bundles_post_ra>
// kernel: tpu_custom_call.1
= control target key start
LH: loop header
LB: loop body
LE: loop exit
PB: predicated region body
PF: predicated region fallthrough
CT: control target
= control target key end

     0   :  { %s10721_s0 = inlined_call_operand.vmem [shape: f32[2,16], index: 0, kind: input, shape index: {}]   ;;  %s10722_s1 = inlined_call_operand.vmem [shape: f32[16,5], index: 1, kind: input, shape index: {}]   ;;  %s10723_s2 = inlined_call_operand.vmem [shape: f32[16,1], index: 2, kind: input, shape index: {}]   ;;  %s10724_s3 = inlined_call_operand.vmem [shape: bf16[24,80], index: 3, kind: input, shape index: {}]   ;;  %s10725_s4 = inlined_call_operand.vmem [shape: f32[24,1], index: 4, kind: input, shape index: {}]   ;;  %s10726_s5 = inlined_call_operand.hbm [shape: bf16[24,16,512], index: 5, kind: input, shape index: {}]   ;;  %s10727_s6 = inlined_call_operand.vmem [shape: f32[1,512], index: 6, kind: input, shape index: {}]   ;;  %s10728_s7 = inlined_call_operand.hbm [shape: bf16[512,768], index: 7, kind: input, shape index: {}]   ;;  %s10729_s8 = inlined_call_operand.vmem [shape: f32[1,768], index: 8, kind: input, shape index: {}]   ;;  %s10730_s9 = inlined_call_operand.vmem [shape: f32[1,768], index: 9, kind: input, shape index: {}]   ;;  %s10731_s10 = inlined_call_operand.vmem [shape: f32[1,768], index: 10, kind: input, shape index: {}]   ;;  %s10732_s11 = inlined_call_operand.hbm [shape: bf16[768,512], index: 11, kind: input, shape index: {}]   ;;  %s10733_s12 = inlined_call_operand.vmem [shape: f32[1,512], index: 12, kind: input, shape index: {}]   ;;  %s10734_s13 = inlined_call_operand.vmem [shape: f32[1,512], index: 13, kind: input, shape index: {}]   ;;  %s10735_s14 = inlined_call_operand.vmem [shape: f32[1,512], index: 14, kind: input, shape index: {}]   ;;  %s10736_s15 = inlined_call_operand.hbm [shape: bf16[512,384], index: 15, kind: input, shape index: {}]   ;;  %s10737_s16 = inlined_call_operand.vmem [shape: f32[1,384], index: 16, kind: input, shape index: {}]   ;;  %s10738_s17 = inlined_call_operand.vmem [shape: f32[1,384], index: 17, kind: input, shape index: {}]   ;;  %s10739_s18 = inlined_call_operand.vmem [shape: f32[1,384], index: 18, kind: input, shape index: {}]   ;;  %s10740_s19 = inlined_call_operand.vmem [shape: bf16[384,16], index: 19, kind: input, shape index: {}]   ;;  %s10741_s20 = inlined_call_operand.vmem [shape: f32[1,16], index: 20, kind: input, shape index: {}]   ;;  %s10742_s21 = inlined_call_operand.hbm [shape: f32[2,16], index: 21, kind: output, shape index: {}]  }
   0x1   :  { %10749 = sst [smem:[#allocation17_spill]] %s10721_s0 }
   0x2   :  { %10750 = sst [smem:[#allocation18_spill]] %s10722_s1 }
   0x3   :  { %10751 = sst [smem:[#allocation19_spill]] %s10723_s2 }
   0x4   :  { %10752 = sst [smem:[#allocation20_spill]] %s10724_s3 }
   0x5   :  { %10753 = sst [smem:[#allocation21_spill]] %s10725_s4 }
   0x6   :  { %10754 = sst [smem:[#allocation22_spill]] %s10726_s5 }
   0x7   :  { %10755 = sst [smem:[#allocation23_spill]] %s10742_s21 }
   0x8   :  { %26 = vsyncpa [#allocation5], 0 }
   0x9   :  { %27 = vsyncpa [#allocation8], 0 }
   0xa   :  { %28 = vsyncpa [#allocation11], 0 }
   0xb   :  { %29 = vsyncpa [#allocation6], 0  ;;  %s9872_s2 = smov [#allocation7]   ;;  %s9754_s3 = scalar_lea.hbm %s10728_s7, 24576 }
   0xc   :  { %s59_s25 = sshll.u32 %s9872_s2, 4  ;;  %p9755_p0 = scmp.ne.s32.totalorder %s10728_s7, %s9754_s3  ;;  %s60_s25 = int_to_ptr.vmem [resolvable:$true] %s59_s25 }
   0xd   :  { %p9758_p1 = scmp.lt.u32.totalorder %s9754_s3, %s10728_s7 }
   0xf   :  { %p9760_p2 = pnand %p9758_p1, %p9755_p0 }
  0x11   :  { %9763 = shalt.err (!%p9760_p2)
}
  0x12   :  { %s9764_s30 = scalar_lea.vmem %s60_s25, 24576  ;;  %p9769_p4 = scmp.lt.s32.totalorder %s60_s25, %s60_s25 }
  0x13   :  { %p9765_p3 = scmp.ne.s32.totalorder %s60_s25, %s9764_s30  ;;  %p9770_p5 = scmp.lt.s32.totalorder %s9764_s30, %s9764_s30 }
  0x15   :  { %p9771_p6 = por %p9770_p5, %p9769_p4 }
  0x17   :  { %p9772_p7 = pnand %p9771_p6, %p9765_p3 }
  0x19   :  { %9775 = shalt.err (!%p9772_p7)
}
  0x1a   :  { %s9873_s5 = smov 384   ;;  %s9874_s22 = smov 24  }
  0x1b   :  { %65 = dma.hbm_to_vmem [thread:$0]  %s10728_s7, 24576, %s60_s25, [#allocation8], %s9873_s5, %s9873_s5, %s9874_s22  }
  0x1c   :  { %s9875_s24 = smov [#allocation4]   ;;  %s10756_s3 = sld [smem:[#allocation22_spill]] }
  0x1d   :  { %s45_s2 = sshll.u32 %s9875_s24, 4  ;;  %s46_s2 = int_to_ptr.vmem [resolvable:$true] %s45_s2 }
  0x22   :  { %s9776_s28 = scalar_lea.hbm %s10756_s3, 12288 }
  0x23   :  { %p9777_p8 = scmp.ne.s32.totalorder %s10756_s3, %s9776_s28  ;;  %p9780_p9 = scmp.lt.u32.totalorder %s9776_s28, %s10756_s3 }
  0x25   :  { %p9782_p10 = pnand %p9780_p9, %p9777_p8 }
  0x27   :  { %9785 = shalt.err (!%p9782_p10)
}
  0x28   :  { %s9786_s21 = scalar_lea.vmem %s46_s2, 12288  ;;  %p9791_p12 = scmp.lt.s32.totalorder %s46_s2, %s46_s2 }
  0x29   :  { %p9787_p11 = scmp.ne.s32.totalorder %s46_s2, %s9786_s21  ;;  %p9792_p13 = scmp.lt.s32.totalorder %s9786_s21, %s9786_s21 }
  0x2b   :  { %p9793_p0 = por %p9792_p13, %p9791_p12 }
  0x2d   :  { %p9794_p1 = pnand %p9793_p0, %p9787_p11 }
  0x2f   :  { %9797 = shalt.err (!%p9794_p1)
}
  0x30   :  { %s9876_s7 = smov 256   ;;  %s9877_s25 = smov 16  }
  0x31   :  { %51 = dma.hbm_to_vmem [thread:$0]  %s10756_s3, 12288, %s46_s2, [#allocation5], %s9876_s7, %s9876_s7, %s9877_s25  }
  0x32   :  { %s9878_s23 = smov [#allocation9]   ;;  %s9879_s24 = smov [#allocation10]  }
  0x33   :  { %s77_s1 = sshll.u32 %s9878_s23, 4  ;;  %s95_s26 = sshll.u32 %s9879_s24, 4  ;;  %s78_s1 = int_to_ptr.vmem [resolvable:$true] %s77_s1  ;;  %s10030_s26 = int_to_ptr.vmem [resolvable:$true] %s95_s26 }
  0x34   :  { %s9798_s21 = scalar_lea.hbm %s10732_s11, 24576 }
  0x35   :  { %p9799_p2 = scmp.ne.s32.totalorder %s10732_s11, %s9798_s21  ;;  %p9802_p3 = scmp.lt.u32.totalorder %s9798_s21, %s10732_s11 }
  0x37   :  { %p9804_p4 = pnand %p9802_p3, %p9799_p2 }
  0x39   :  { %9807 = shalt.err (!%p9804_p4)
}
  0x3a   :  { %s9808_s2 = scalar_lea.vmem %s78_s1, 24576  ;;  %p9813_p6 = scmp.lt.s32.totalorder %s78_s1, %s78_s1 }
  0x3b   :  { %p9809_p5 = scmp.ne.s32.totalorder %s78_s1, %s9808_s2  ;;  %p9814_p7 = scmp.lt.s32.totalorder %s9808_s2, %s9808_s2 }
  0x3d   :  { %p9815_p8 = por %p9814_p7, %p9813_p6 }
  0x3f   :  { %p9816_p9 = pnand %p9815_p8, %p9809_p5 }
  0x41   :  { %9819 = shalt.err (!%p9816_p9)
}
  0x42   :  { %83 = dma.hbm_to_vmem [thread:$0]  %s10732_s11, 24576, %s78_s1, [#allocation8], %s9876_s7, %s9876_s7, %s9877_s25  }
  0x43   :  { %s9820_s24 = scalar_lea.hbm %s10736_s15, 12288 }
  0x44   :  { %p9821_p10 = scmp.ne.s32.totalorder %s10736_s15, %s9820_s24  ;;  %p9824_p11 = scmp.lt.u32.totalorder %s9820_s24, %s10736_s15 }
  0x46   :  { %p9826_p12 = pnand %p9824_p11, %p9821_p10 }
  0x48   :  { %9829 = shalt.err (!%p9826_p12)
}
  0x49   :  { %s9830_s0 = scalar_lea.vmem %s10030_s26, 12288  ;;  %p9835_p0 = scmp.lt.s32.totalorder %s10030_s26, %s10030_s26 }
  0x4a   :  { %p9831_p13 = scmp.ne.s32.totalorder %s10030_s26, %s9830_s0  ;;  %p9836_p1 = scmp.lt.s32.totalorder %s9830_s0, %s9830_s0 }
  0x4c   :  { %p9837_p2 = por %p9836_p1, %p9835_p0 }
  0x4e   :  { %p9838_p3 = pnand %p9837_p2, %p9831_p13 }
  0x50   :  { %9841 = shalt.err (!%p9838_p3)
}
  0x51   :  { %s9880_s11 = smov 192   ;;  %s9881_s7 = smov 12  }
  0x52   :  { %101 = dma.hbm_to_vmem [thread:$0]  %s10736_s15, 12288, %s10030_s26, [#allocation11], %s9880_s11, %s9880_s11, %s9881_s7  }
  0x53   :  { %9864 = dma.done.wait [#allocation5], 12288  }
  0x54   :  { %9865 = vsyncadd [#allocation5], 4294955008 }
  0x55   :  { %9866 = dma.done.wait [#allocation8], 49152  }
  0x56   :  { %9867 = vsyncadd [#allocation8], 4294918144 }
  0x57   :  { %9868 = dma.done.wait [#allocation11], 12288  }
  0x58   :  { %9869 = vsyncadd [#allocation11], 4294955008  ;;  %v9882_v0 = vmov 1   ;;  %vm125_vm0 = vcmask 9216   ;;  %vm127_vm1 = vcmask 156816   ;;  %v9883_v1 = vmov 0.0  }
  0x59   :  { %8806 = vset.pattern.permute.xlu1 %v9882_v0  ;;  %8805 = vset.pattern.permute.xlu0 %v9882_v0  ;;  %126 = vst.msk [vmem:[#allocation2] sm:$0x3] %vm125_vm0, %v9883_v1  ;;  %s10757_s2 = sld [smem:[#allocation18_spill]]  ;;  %s10758_s3 = sld [smem:[#allocation17_spill]]  ;;  %v9885_v5 = vmov 2   ;;  %v9886_v6 = vmov 3   ;;  %v151_v13 = vlaneseq }
  0x5a   :  { %128 = vst.msk [vmem:[#allocation2] sm:$0x3] %vm127_vm1, %v9883_v1  ;;  %s9884_s5 = smov 2   ;;  %v9887_v7 = vmov 4   ;;  %s10759_s28 = sld [smem:[#allocation19_spill]]  ;;  %v9888_v9 = vmov 0  }
  0x5b   :  { %v9889_v11 = vmov 1966171168   ;;  %vm134_vm2 = vcmask 140304   ;;  %v10081_v16 = vshrl.u32 %v151_v13, 7  ;;  %s9890_s0 = smov 127   ;;  %s9891_s11 = smov 126  }
  0x5c   :  { %v149_v12 = vunpack.c.l.s4 %v9889_v11  ;;  %s9892_s7 = smov 125   ;;  %s9893_s25 = smov 124   ;;  %vm346_vm3 = vcmask 15360   ;;  %vm351_vm4 = vcmask 162960   ;;  %vm372_vm9 = vcmask 146448  }
  0x5d   :  { %v10085_v18 = vsub.s32 0, %v10081_v16  ;;  %348 = vst.msk [vmem:[#allocation3 + $0x8] sm:$0xff] %vm346_vm3, %v9883_v1  ;;  %347 = vst.msk [vmem:[#allocation3] sm:$0xff] %vm346_vm3, %v9883_v1  ;;  %s10760_s30 = sld [smem:[#allocation20_spill]]  ;;  %vm421_vm10 = vcmask 654336   ;;  %s10761_s26 = sld [smem:[#allocation21_spill]] }
  0x5e   :  { %v150_v15 = vunpack.c.0.s8 %v149_v12  ;;  %349 = vst.msk [vmem:[#allocation3 + $0x10] sm:$0xff] %vm346_vm3, %v9883_v1  ;;  %350 = vst.msk [vmem:[#allocation3 + $0x18] sm:$0xff] %vm346_vm3, %v9883_v1  ;;  %vm616_vm0 = vcmask 1041409  }
  0x5f   :  { %v138_v2 = vld [vmem:[%s10757_s2 + $0x8] sm:$0xff]  ;;  %v129_v3 = vld [vmem:[%s10758_s3] sm:$0x3]  ;;  %353 = vst.msk [vmem:[#allocation3 + $0x8] sm:$0xff] %vm351_vm4, %v9883_v1  ;;  %352 = vst.msk [vmem:[#allocation3] sm:$0xff] %vm351_vm4, %v9883_v1 }
  0x60   :  { %195 = vperm.xlu1 %8806, %v138_v2   ;;  %131 = vrot.lane.b32.xlu0 %v129_v3, %s9884_s5  ;;  %v137_v4 = vld [vmem:[%s10757_s2] sm:$0xff]  ;;  %v319_v10 = vld [vmem:[%s10759_s28 + $0x8] sm:$0xff]  ;;  %v153_v17 = vsub.s32 %v150_v15, %v10081_v16  ;;  %354 = vst.msk [vmem:[#allocation3 + $0x10] sm:$0xff] %vm351_vm4, %v9883_v1  ;;  %355 = vst.msk [vmem:[#allocation3 + $0x18] sm:$0xff] %vm351_vm4, %v9883_v1 }
  0x61   :  { %v318_v8 = vld [vmem:[%s10759_s28] sm:$0xff] }
  0x64   :  { %8807 = vset.pattern.permute.xlu1 %v9885_v5  ;;  %191 = vperm.xlu0 %8805, %v137_v4  }
  0x65   :  { %223 = vperm.xlu1 %8807, %v137_v4  }
  0x68   :  { %8808 = vset.pattern.permute.xlu0 %v9886_v6 }
  0x69   :  { %227 = vperm.xlu1 %8807, %v138_v2   ;;  %255 = vperm.xlu0 %8808, %v137_v4  }
  0x6d   :  { %8809 = vset.pattern.permute.xlu1 %v9886_v6  ;;  %8811 = vset.pattern.permute.xlu0 %v9887_v7 }
  0x6e   :  { %259 = vperm.xlu1 %8809, %v138_v2   ;;  %291 = vperm.xlu0 %8811, %v138_v2  }
  0x72   :  { %8810 = vset.pattern.permute.xlu1 %v9887_v7  ;;  %8813 = vset.pattern.permute.xlu0 %v9888_v9 }
  0x73   :  { %287 = vperm.xlu1 %8810, %v137_v4   ;;  %322 = vperm.xlu0 %8813, %v318_v8  }
  0x77   :  { %8812 = vset.pattern.permute.xlu1 %v9888_v9 }
  0x78   :  { %164 = vperm.xlu1 %8812, %v137_v4  }
  0x7c   :  { %169 = vperm.xlu1 %8812, %v138_v2  }
  0x80   :  { %327 = vperm.xlu1 %8812, %v319_v10  }
  0xd2   :  { %v132_v14 = vpop.permute.xlu0 %131 }
  0xd3   :  { %135 = vst.msk [vmem:[#allocation2] sm:$0x3] %vm134_vm2, %v132_v14  ;;  %vm639_vm2 = vcmask 130048  }
  0xda   :  { %v7944_v19 = vld.sshfl [vmem:[#allocation2] sm:$0x11 pattern:$0x75316420] }
  0xdb   :  { %v154_v20 = vrot.slane %v7944_v19, %v153_v17  ;;  %v147_v32 = vcombine.high %v7944_v19, %v7944_v19 }
  0xdd   :  { %v10088_v21 = vrot.slane %v154_v20, %v10085_v18  ;;  %v161_v34 = vrot.slane %v147_v32, %v153_v17 }
  0xdf   :  { %v196_v22 = vpop.permute.xlu1 %195  ;;  %v10103_v37 = vrot.slane %v161_v34, %v10085_v18 }
  0xe0   :  { %v199_v23 = vmul.f32 %v196_v22, %v10088_v21 }
  0xe1   :  { %v201_v41 = vmul.f32 %v196_v22, %v10103_v37 }
  0xe2   :  { %208 = vrot.lane.b32.xlu1 %v199_v23, %s9890_s0 }
  0xe3   :  { %v192_v24 = vpop.permute.xlu0 %191 }
  0xe4   :  { %v198_v25 = vmul.f32 %v192_v24, %v10088_v21  ;;  %v224_v26 = vpop.permute.xlu1 %223  ;;  %v200_v42 = vmul.f32 %v192_v24, %v10103_v37 }
  0xe5   :  { %v230_v27 = vmul.f32 %v224_v26, %v10088_v21  ;;  %v232_v44 = vmul.f32 %v224_v26, %v10103_v37 }
  0xe6   :  { %206 = vrot.lane.b32.xlu0 %v198_v25, %s9890_s0 }
  0xe7   :  { %238 = vrot.lane.b32.xlu1 %v230_v27, %s9891_s11 }
  0xe8   :  { %v228_v28 = vpop.permute.xlu1 %227  ;;  %v256_v29 = vpop.permute.xlu0 %255 }
  0xe9   :  { %v231_v30 = vmul.f32 %v228_v28, %v10088_v21  ;;  %v262_v31 = vmul.f32 %v256_v29, %v10088_v21  ;;  %v233_v43 = vmul.f32 %v228_v28, %v10103_v37  ;;  %v264_v46 = vmul.f32 %v256_v29, %v10103_v37 }
  0xeb   :  { %270 = vrot.lane.b32.xlu1 %v262_v31, %s9892_s7  ;;  %240 = vrot.lane.b32.xlu0 %v231_v30, %s9891_s11 }
  0xed   :  { %v260_v33 = vpop.permute.xlu1 %259  ;;  %v292_v36 = vpop.permute.xlu0 %291 }
  0xee   :  { %v263_v35 = vmul.f32 %v260_v33, %v10088_v21  ;;  %v295_v38 = vmul.f32 %v292_v36, %v10088_v21  ;;  %v265_v45 = vmul.f32 %v260_v33, %v10103_v37  ;;  %v297_v47 = vmul.f32 %v292_v36, %v10103_v37 }
  0xf0   :  { %272 = vrot.lane.b32.xlu0 %v263_v35, %s9892_s7 }
  0xf2   :  { %v288_v39 = vpop.permute.xlu1 %287  ;;  %v323_v52 = vpop.permute.xlu0 %322 }
  0xf3   :  { %v294_v40 = vmul.f32 %v288_v39, %v10088_v21  ;;  %v296_v48 = vmul.f32 %v288_v39, %v10103_v37 }
  0xf4   :  { %304 = vrot.lane.b32.xlu0 %v295_v38, %s9893_s25 }
  0xf5   :  { %302 = vrot.lane.b32.xlu1 %v294_v40, %s9893_s25 }
  0xf7   :  { %v165_v49 = vpop.permute.xlu1 %164 }
  0xf8   :  { %212 = vrot.lane.b32.xlu0 %v201_v41, %s9890_s0  ;;  %v182_v55 = vmul.f32 %v10088_v21, %v165_v49  ;;  %v184_v22 = vmul.f32 %v10103_v37, %v165_v49  ;;  %v8854_v49 = vld [vmem:[%s10760_s30] sm:$0xff]  }
  0xf9   :  { %210 = vrot.lane.b32.xlu1 %v200_v42, %s9890_s0  ;;  %8699 = vmatprep.mubr.msk.bf16.mxu0 %vm421_vm10, %v8854_v49 }
  0xfa   :  { %8713 = vmatprep.mubr.msk.bf16.mxu1 %vm421_vm10, %v8854_v49 }
  0xfb   :  { %v170_v50 = vpop.permute.xlu1 %169 }
  0xfc   :  { %244 = vrot.lane.b32.xlu0 %v233_v43, %s9891_s11  ;;  %v183_v59 = vmul.f32 %v10088_v21, %v170_v50  ;;  %v185_v20 = vmul.f32 %v10103_v37, %v170_v50 }
  0xfd   :  { %242 = vrot.lane.b32.xlu1 %v232_v44, %s9891_s11 }
  0xff   :  { %v328_v51 = vpop.permute.xlu1 %327 }
 0x100   :  { %276 = vrot.lane.b32.xlu0 %v265_v45, %s9892_s7 }
 0x101   :  { %274 = vrot.lane.b32.xlu1 %v264_v46, %s9892_s7 }
 0x104   :  { %308 = vrot.lane.b32.xlu0 %v297_v47, %s9893_s25 }
 0x105   :  { %306 = vrot.lane.b32.xlu1 %v296_v48, %s9893_s25 }
 0x154   :  { %v209_v53 = vpop.permute.xlu1 %208 }
 0x155   :  { %v219_v60 = vadd.f32 %v209_v53, %v183_v59 }
 0x158   :  { %v207_v54 = vpop.permute.xlu0 %206 }
 0x159   :  { %v239_v56 = vpop.permute.xlu1 %238  ;;  %v218_v58 = vadd.f32 %v207_v54, %v182_v55  ;;  %v560_v55 = vld [vmem:[%s10761_s26 + $0x10] sm:$0xff] }
 0x15b   :  { %v250_v61 = vadd.f32 %v239_v56, %v218_v58  ;;  %v559_v56 = vld [vmem:[%s10761_s26 + $0x8] sm:$0xff] }
 0x15d   :  { %v241_v57 = vpop.permute.xlu0 %240  ;;  %v271_v63 = vpop.permute.xlu1 %270 }
 0x15e   :  { %v251_v0 = vadd.f32 %v241_v57, %v219_v60  ;;  %v282_v3 = vadd.f32 %v271_v63, %v250_v61 }
 0x162   :  { %v273_v62 = vpop.permute.xlu0 %272 }
 0x163   :  { %v283_v2 = vadd.f32 %v273_v62, %v251_v0 }
 0x166   :  { %v305_v4 = vpop.permute.xlu0 %304 }
 0x167   :  { %v315_v5 = vadd.f32 %v305_v4, %v283_v2  ;;  %v303_v6 = vpop.permute.xlu1 %302 }
 0x168   :  { %v314_v7 = vadd.f32 %v303_v6, %v282_v3 }
 0x169   :  { %v331_v8 = vadd.f32 %v328_v51, %v315_v5 }
 0x16a   :  { %v330_v10 = vadd.f32 %v323_v52, %v314_v7  ;;  %v213_v11 = vpop.permute.xlu0 %212 }
 0x16b   :  { %v211_v12 = vpop.permute.xlu1 %210  ;;  %vm335_vm5 = vcmp.ge.f32.partialorder %v331_v8, 0.0  ;;  %v339_v13 = vmul.f32 0.2, %v331_v8  ;;  %v221_v23 = vadd.f32 %v213_v11, %v185_v20 }
 0x16c   :  { %vm334_vm6 = vcmp.ge.f32.partialorder %v330_v10, 0.0  ;;  %v338_v14 = vmul.f32 0.2, %v330_v10  ;;  %v220_v24 = vadd.f32 %v211_v12, %v184_v22 }
 0x16d   :  { %v343_v15 = vsel %vm335_vm5, %v331_v8, %v339_v13 }
 0x16e   :  { %362 = vrot.lane.b32.xlu0 %v343_v15, %s9884_s5  ;;  %v245_v17 = vpop.permute.xlu0 %244  ;;  %v342_v19 = vsel %vm334_vm6, %v330_v10, %v338_v14  ;;  %v8855_v14 = vld [vmem:[%s10760_s30 + $0x8] ss:$0 sps:$4 sm:$0xff]  }
 0x16f   :  { %360 = vrot.lane.b32.xlu1 %v342_v19, %s9884_s5  ;;  %v243_v21 = vpop.permute.xlu1 %242  ;;  %v253_v26 = vadd.f32 %v245_v17, %v221_v23 }
 0x170   :  { %v252_v28 = vadd.f32 %v243_v21, %v220_v24 }
 0x172   :  { %v277_v25 = vpop.permute.xlu0 %276 }
 0x173   :  { %v275_v27 = vpop.permute.xlu1 %274  ;;  %v285_v29 = vadd.f32 %v277_v25, %v253_v26 }
 0x174   :  { %v284_v30 = vadd.f32 %v275_v27, %v252_v28 }
 0x176   :  { %v309_v31 = vpop.permute.xlu0 %308 }
 0x177   :  { %v317_v32 = vadd.f32 %v309_v31, %v285_v29  ;;  %v307_v33 = vpop.permute.xlu1 %306  ;;  %v8861_v31 = vld [vmem:[#allocation4 + $0x2c] ss:$16 sps:$4 sm:$0xff]  }
 0x178   :  { %v316_v34 = vadd.f32 %v307_v33, %v284_v30  ;;  %v8858_v30 = vld [vmem:[#allocation4 + $0x24] ss:$16 sps:$4 sm:$0xff]   ;;  %v8859_v33 = vld [vmem:[#allocation4 + $0x28] ss:$16 sps:$4 sm:$0xff]  }
 0x179   :  { %v333_v35 = vadd.f32 %v328_v51, %v317_v32  ;;  %v558_v51 = vld [vmem:[%s10761_s26] sm:$0xff] }
 0x17a   :  { %v332_v36 = vadd.f32 %v323_v52, %v316_v34  ;;  %v8856_v32 = vld [vmem:[#allocation4 + $0x20] ss:$16 sps:$4 sm:$0xff]   ;;  %v8864_v34 = vld [vmem:[#allocation4 + $0x4] ss:$16 sps:$4 sm:$0xff]  }
 0x17b   :  { %vm337_vm7 = vcmp.ge.f32.partialorder %v333_v35, 0.0  ;;  %v341_v38 = vmul.f32 0.2, %v333_v35 }
 0x17c   :  { %vm336_vm8 = vcmp.ge.f32.partialorder %v332_v36, 0.0  ;;  %v340_v39 = vmul.f32 0.2, %v332_v36 }
 0x17d   :  { %v345_v40 = vsel %vm337_vm7, %v333_v35, %v341_v38  ;;  %v8867_v35 = vld [vmem:[#allocation4 + $0xc] ss:$16 sps:$4 sm:$0xff]   ;;  %vm4909_vm7 = vcmask 1041408  }
 0x17e   :  { %366 = vrot.lane.b32.xlu0 %v345_v40, %s9884_s5  ;;  %v344_v37 = vsel %vm336_vm8, %v332_v36, %v340_v39 }
 0x17f   :  { %364 = vrot.lane.b32.xlu1 %v344_v37, %s9884_s5 }
 0x1e0   :  { %v363_v41 = vpop.permute.xlu0 %362 }
 0x1e1   :  { %374 = vst.msk [vmem:[#allocation3 + $0x8] sm:$0xff] %vm372_vm9, %v363_v41  ;;  %v361_v42 = vpop.permute.xlu1 %360 }
 0x1e2   :  { %373 = vst.msk [vmem:[#allocation3] sm:$0xff] %vm372_vm9, %v361_v42 }
 0x1e8   :  { %v381_v43 = vld [vmem:[#allocation3 + $0x8] sm:$0xff] }
 0x1e9   :  { %v380_v44 = vld [vmem:[#allocation3] sm:$0xff] }
 0x1ea   :  { %v408_v45 = vpack.c.bf16 %v381_v43, %v380_v44  ;;  %v8814_v46 = vpack.i.bf16 %v381_v43, %v380_v44 }
 0x1ec   :  { %8689 = vmatprep.subr.bf16.mxu0 %v408_v45  ;;  %8815 = vrot.lane.b32.xlu1 %v8814_v46, %s9890_s0 }
 0x1ed   :  { %8690 = vmatpush3.bf16.msra.mxu0 %v408_v45 }
 0x1f0   :  { %v367_v47 = vpop.permute.xlu0 %366  ;;  %8820 = vrot.lane.b32.xlu1 %v8814_v46, %s9891_s11 }
 0x1f1   :  { %376 = vst.msk [vmem:[#allocation3 + $0x18] sm:$0xff] %vm372_vm9, %v367_v47  ;;  %v365_v48 = vpop.permute.xlu1 %364 }
 0x1f2   :  { %375 = vst.msk [vmem:[#allocation3 + $0x10] sm:$0xff] %vm372_vm9, %v365_v48 }
 0x1f4   :  { %8825 = vrot.lane.b32.xlu1 %v8814_v46, %s9892_s7 }
 0x1f8   :  { %8830 = vrot.lane.b32.xlu1 %v8814_v46, %s9893_s25  ;;  %v478_v50 = vld [vmem:[#allocation3 + $0x18] sm:$0xff] }
 0x1f9   :  { %v477_v52 = vld [vmem:[#allocation3 + $0x10] sm:$0xff] }
 0x1fa   :  { %v8834_v53 = vpack.i.bf16 %v478_v50, %v477_v52  ;;  %v505_v54 = vpack.c.bf16 %v478_v50, %v477_v52 }
 0x1fc   :  { %563 = vperm.xlu1 %8812, %v558_v51   ;;  %8835 = vrot.lane.b32.xlu0 %v8834_v53, %s9890_s0 }
 0x1fd   :  { %8703 = vmatprep.subr.bf16.mxu1 %v505_v54 }
 0x1fe   :  { %8704 = vmatpush3.bf16.msra.mxu1 %v505_v54 }
 0x200   :  { %573 = vperm.xlu1 %8812, %v560_v55   ;;  %8840 = vrot.lane.b32.xlu0 %v8834_v53, %s9891_s11 }
 0x204   :  { %8845 = vrot.lane.b32.xlu0 %v8834_v53, %s9892_s7 }
 0x208   :  { %8850 = vrot.lane.b32.xlu0 %v8834_v53, %s9893_s25 }
 0x20c   :  { %568 = vperm.xlu0 %8813, %v559_v56  }
 0x25e   :  { %v8816_v57 = vpop.permute.xlu1 %8815 }
 0x25f   :  { %v8818_v58 = vunpack.i.h.bf16 %v8816_v57  ;;  %v8817_v59 = vunpack.i.l.bf16 %v8816_v57 }
 0x261   :  { %v409_v60 = vpack.c.bf16 %v8818_v58, %v8817_v59 }
 0x262   :  { %v8821_v61 = vpop.permute.xlu1 %8820 }
 0x263   :  { %v8823_v62 = vunpack.i.h.bf16 %v8821_v61  ;;  %v8822_v63 = vunpack.i.l.bf16 %v8821_v61  ;;  %8691 = vmatprep.subr.bf16.mxu0 %v409_v60 }
 0x264   :  { %8692 = vmatpush3.bf16.msra.mxu0 %v409_v60 }
 0x265   :  { %v410_v0 = vpack.c.bf16 %v8823_v62, %v8822_v63 }
 0x266   :  { %v8826_v2 = vpop.permute.xlu1 %8825 }
 0x267   :  { %v8828_v3 = vunpack.i.h.bf16 %v8826_v2  ;;  %v8827_v4 = vunpack.i.l.bf16 %v8826_v2  ;;  %8693 = vmatprep.subr.bf16.mxu0 %v410_v0 }
 0x268   :  { %8694 = vmatpush3.bf16.msra.mxu0 %v410_v0 }
 0x269   :  { %v411_v5 = vpack.c.bf16 %v8828_v3, %v8827_v4 }
 0x26a   :  { %v8831_v6 = vpop.permute.xlu1 %8830 }
 0x26b   :  { %v8833_v7 = vunpack.i.h.bf16 %v8831_v6  ;;  %v8832_v8 = vunpack.i.l.bf16 %v8831_v6  ;;  %8695 = vmatprep.subr.bf16.mxu0 %v411_v5 }
 0x26c   :  { %8696 = vmatpush3.bf16.msra.mxu0 %v411_v5 }
 0x26d   :  { %v412_v10 = vpack.c.bf16 %v8833_v7, %v8832_v8 }
 0x26e   :  { %v8836_v11 = vpop.permute.xlu0 %8835 }
 0x26f   :  { %v8838_v12 = vunpack.i.h.bf16 %v8836_v11  ;;  %v8837_v13 = vunpack.i.l.bf16 %v8836_v11  ;;  %8697 = vmatprep.subr.bf16.mxu0 %v412_v10 }
 0x270   :  { %8698 = vmatpush3.bf16.msra.mxu0 %v412_v10 }
 0x271   :  { %v506_v15 = vpack.c.bf16 %v8838_v12, %v8837_v13  ;;  %643 = vmatprep.subr.bf16.mxu0 %v8858_v30 }
 0x272   :  { %v8841_v17 = vpop.permute.xlu0 %8840 }
 0x273   :  { %v8843_v19 = vunpack.i.h.bf16 %v8841_v17  ;;  %v8842_v20 = vunpack.i.l.bf16 %v8841_v17  ;;  %8700 = vmatmul.mubr.msk.bf16.vlgmr.msra.gmra.mrb[0].mxu0 %vm421_vm10, %v8855_v14  ;;  %8705 = vmatprep.subr.bf16.mxu1 %v506_v15 }
 0x274   :  { %8706 = vmatpush3.bf16.msra.mxu1 %v506_v15  ;;  %675 = vmatprep.mubr.bf16.mxu0 %v9888_v9 }
 0x275   :  { %v507_v21 = vpack.c.bf16 %v8843_v19, %v8842_v20  ;;  %644 = vmatpush1.bf16.msra.mxu0 %v8856_v32 }
 0x276   :  { %v8846_v22 = vpop.permute.xlu0 %8845  ;;  %751 = vmatprep.subr.bf16.mxu0 %v8864_v34 }
 0x277   :  { %v8848_v23 = vunpack.i.h.bf16 %v8846_v22  ;;  %v8847_v24 = vunpack.i.l.bf16 %v8846_v22  ;;  %8707 = vmatprep.subr.bf16.mxu1 %v507_v21 }
 0x278   :  { %8708 = vmatpush3.bf16.msra.mxu1 %v507_v21 }
 0x279   :  { %v508_v25 = vpack.c.bf16 %v8848_v23, %v8847_v24 }
 0x27a   :  { %v8851_v26 = vpop.permute.xlu0 %8850 }
 0x27b   :  { %v8853_v27 = vunpack.i.h.bf16 %v8851_v26  ;;  %v8852_v28 = vunpack.i.l.bf16 %v8851_v26  ;;  %8709 = vmatprep.subr.bf16.mxu1 %v508_v25  ;;  %v564_v36 = vpop.permute.xlu1 %563  ;;  %v8862_v26 = vld [vmem:[#allocation4] ss:$16 sps:$4 sm:$0xff]  }
 0x27c   :  { %8710 = vmatpush3.bf16.msra.mxu1 %v508_v25 }
 0x27d   :  { %v509_v29 = vpack.c.bf16 %v8853_v27, %v8852_v28  ;;  %v8865_v28 = vld [vmem:[#allocation4 + $0x8] ss:$16 sps:$4 sm:$0xff]  }
 0x27f   :  { %8711 = vmatprep.subr.bf16.mxu1 %v509_v29  ;;  %v574_v37 = vpop.permute.xlu1 %573 }
 0x280   :  { %8712 = vmatpush3.bf16.msra.mxu1 %v509_v29 }
 0x281   :  { %684 = vmatprep.subr.bf16.mxu1 %v8861_v31 }
 0x283   :  { %8714 = vmatmul.mubr.msk.bf16.vlgmr.msra.gmra.mrb[0].mxu1 %vm421_vm10, %v8855_v14 }
 0x284   :  { %716 = vmatprep.mubr.bf16.mxu1 %v9888_v9  ;;  %685 = vmatpush1.bf16.msra.mxu1 %v8859_v33 }
 0x285   :  { %792 = vmatprep.subr.bf16.mxu1 %v8867_v35  ;;  %v8870_v35 = vld [vmem:[#allocation4 + $0x44] ss:$16 sps:$4 sm:$0xff]  }
 0x28b   :  { %v569_v44 = vpop.permute.xlu0 %568 }
 0x346   :  { %v8701_v38 = vpop.f32.mrb[0].mxu0 }
 0x347   :  { %v462_v39 = vpop.f32.mrb[1].mxu0  ;;  %v578_v42 = vadd.f32 %v8701_v38, %v574_v37  ;;  %v8873_v38 = vld [vmem:[#allocation4 + $0x4c] ss:$16 sps:$4 sm:$0xff]  }
 0x348   :  { %v8702_v40 = vpop.f32.mrb[2].mxu0  ;;  %v576_v43 = vadd.f32 %v564_v36, %v462_v39 }
 0x349   :  { %v465_v41 = vpop.f32.mrb[3].mxu0  ;;  %v590_v45 = vmul.f32 0.2, %v578_v42  ;;  %vm584_vm11 = vcmp.ge.f32.partialorder %v578_v42, 0.0 }
 0x34a   :  { %v577_v46 = vadd.f32 %v569_v44, %v465_v41  ;;  %v588_v47 = vmul.f32 0.2, %v576_v43  ;;  %vm582_vm12 = vcmp.ge.f32.partialorder %v576_v43, 0.0 }
 0x34b   :  { %v596_v48 = vsel %vm584_vm11, %v578_v42, %v590_v45 }
 0x34c   :  { %v589_v49 = vmul.f32 0.2, %v577_v46  ;;  %v594_v50 = vsel %vm582_vm12, %v576_v43, %v588_v47  ;;  %vm583_vm13 = vcmp.ge.f32.partialorder %v577_v46, 0.0  ;;  %v2489_v51 = vpack.c.bf16 %v596_v48, %v596_v48 }
 0x34d   :  { %v600_v52 = vpack.c.bf16 %v594_v50, %v594_v50 }
 0x34e   :  { %v595_v53 = vsel %vm583_vm13, %v577_v46, %v589_v49  ;;  %v10174_v59 = vunpack.c.l.b16 %v2489_v51 }
 0x34f   :  { %v1541_v60 = vpack.c.bf16 %v595_v53, %v595_v53  ;;  %v10176_v63 = vunpack.c.l.b16 %v600_v52 }
 0x350   :  { %v2617_v10 = vrot.slane %v10174_v59, 1 }
 0x351   :  { %v10178_v7 = vunpack.c.l.b16 %v1541_v60  ;;  %v615_v13 = vrot.slane %v10176_v63, 1  ;;  %v838_v14 = vrot.slane %v10176_v63, 2  ;;  %v956_v19 = vrot.slane %v10176_v63, 3 }
 0x352   :  { %v1074_v20 = vrot.slane %v10176_v63, 4  ;;  %v1192_v21 = vrot.slane %v10176_v63, 5  ;;  %v1310_v22 = vrot.slane %v10176_v63, 6  ;;  %v1428_v23 = vrot.slane %v10176_v63, 7 }
 0x353   :  { %v1669_v43 = vrot.slane %v10178_v7, 1  ;;  %v1904_v48 = vrot.slane %v10178_v7, 3  ;;  %v2022_v51 = vrot.slane %v10178_v7, 4  ;;  %v2734_v60 = vrot.slane %v10174_v59, 2 }
 0x356   :  { %v8715_v54 = vpop.f32.mrb[0].mxu1 }
 0x357   :  { %v581_v55 = vadd.f32 %v8715_v54, %v574_v37  ;;  %v544_v56 = vpop.f32.mrb[1].mxu1 }
 0x358   :  { %v579_v57 = vadd.f32 %v564_v36, %v544_v56  ;;  %v8716_v58 = vpop.f32.mrb[2].mxu1 }
 0x359   :  { %vm587_vm14 = vcmp.ge.f32.partialorder %v581_v55, 0.0  ;;  %v593_v61 = vmul.f32 0.2, %v581_v55  ;;  %v547_v62 = vpop.f32.mrb[3].mxu1 }
 0x35a   :  { %vm585_vm15 = vcmp.ge.f32.partialorder %v579_v57, 0.0  ;;  %v591_v0 = vmul.f32 0.2, %v579_v57  ;;  %v580_v2 = vadd.f32 %v569_v44, %v547_v62  ;;  %v1786_v44 = vrot.slane %v10178_v7, 2  ;;  %v8871_v62 = vld [vmem:[#allocation4 + $0x48] ss:$16 sps:$4 sm:$0xff]  }
 0x35b   :  { %v599_v3 = vsel %vm587_vm14, %v581_v55, %v593_v61  ;;  %v8868_v61 = vld [vmem:[#allocation4 + $0x40] ss:$16 sps:$4 sm:$0xff]  }
 0x35c   :  { %v2490_v4 = vpack.c.bf16 %v599_v3, %v599_v3  ;;  %v597_v5 = vsel %vm585_vm15, %v579_v57, %v591_v0  ;;  %vm586_vm1 = vcmp.ge.f32.partialorder %v580_v2, 0.0  ;;  %v592_v6 = vmul.f32 0.2, %v580_v2 }
 0x35d   :  { %v601_v8 = vpack.c.bf16 %v597_v5, %v597_v5  ;;  %v2258_v3 = vrot.slane %v10178_v7, 6 }
 0x35e   :  { %v10181_v11 = vunpack.c.l.b16 %v2490_v4  ;;  %v598_v12 = vsel %vm586_vm1, %v580_v2, %v592_v6  ;;  %v2140_v2 = vrot.slane %v10178_v7, 5 }
 0x35f   :  { %v614_v15 = vunpack.c.l.b16 %v601_v8  ;;  %v1542_v17 = vpack.c.bf16 %v598_v12, %v598_v12  ;;  %v8879_v12 = vld [vmem:[#allocation4 + $0x6c] ss:$16 sps:$4 sm:$0xff]  }
 0x360   :  { %v10192_v24 = vsel %vm616_vm0, %v10181_v11, %v2617_v10  ;;  %v2500_v52 = vrot.slane %v10181_v11, 7  ;;  %v2735_v56 = vrot.slane %v10181_v11, 1  ;;  %v2853_v8 = vrot.slane %v10181_v11, 2  ;;  %v8876_v10 = vld [vmem:[#allocation4 + $0x64] ss:$16 sps:$4 sm:$0xff]  }
 0x361   :  { %v10194_v25 = vunpack.c.l.b16 %v1542_v17  ;;  %v617_v27 = vsel %vm616_vm0, %v614_v15, %v615_v13  ;;  %v725_v29 = vrot.slane %v614_v15, 7  ;;  %v839_v30 = vrot.slane %v614_v15, 1 }
 0x362   :  { %v618_v31 = vpack.c.b16 %v617_v27, %v617_v27  ;;  %v957_v32 = vrot.slane %v614_v15, 2  ;;  %v1075_v33 = vrot.slane %v614_v15, 3  ;;  %v1193_v34 = vrot.slane %v614_v15, 4 }
 0x363   :  { %v726_v36 = vsel %vm616_vm0, %v725_v29, %v10176_v63  ;;  %v10200_v39 = vsel %vm616_vm0, %v839_v30, %v838_v14  ;;  %v1311_v40 = vrot.slane %v614_v15, 5  ;;  %v1429_v37 = vrot.slane %v614_v15, 6 }
 0x364   :  { %7955 = vmatmul.mubr.msk.bf16.vlgmr.msra.gmra.mrb[4].mxu0 %vm639_vm2, %v618_v31  ;;  %7956 = vmatmul.mubr.msk.bf16.vlgmr.msra.gmra.mrb[4].mxu1 %vm639_vm2, %v618_v31  ;;  %v10205_v41 = vsel %vm616_vm0, %v957_v32, %v956_v19  ;;  %v1552_v42 = vrot.slane %v10194_v25, 7  ;;  %v10211_v45 = vsel %vm616_vm0, %v1075_v33, %v1074_v20  ;;  %v10214_v46 = vsel %vm616_vm0, %v1193_v34, %v1192_v21 }
 0x365   :  { %752 = vmatpush1.bf16.msra.mxu0 %v8862_v26  ;;  %793 = vmatpush1.bf16.msra.mxu1 %v8865_v28  ;;  %v1787_v47 = vrot.slane %v10194_v25, 1  ;;  %v10221_v49 = vsel %vm616_vm0, %v1311_v40, %v1310_v22  ;;  %v1905_v50 = vrot.slane %v10194_v25, 2  ;;  %v10227_v53 = vsel %vm616_vm0, %v1429_v37, %v1428_v23  ;;  %v8882_v37 = vld [vmem:[#allocation4 + $0x84] ss:$16 sps:$4 sm:$0xff]  }
 0x366   :  { %783 = vmatprep.mubr.bf16.mxu0 %v9888_v9  ;;  %824 = vmatprep.mubr.bf16.mxu1 %v9888_v9  ;;  %v10231_v54 = vsel %vm616_vm0, %v1552_v42, %v10178_v7  ;;  %v2023_v55 = vrot.slane %v10194_v25, 3  ;;  %v10237_v57 = vsel %vm616_vm0, %v10194_v25, %v1669_v43  ;;  %v727_v4 = vpack.c.b16 %v726_v36, %v726_v36  ;;  %v8877_v36 = vld [vmem:[#allocation4 + $0x68] ss:$16 sps:$4 sm:$0xff]   ;;  %v8885_v42 = vld [vmem:[#allocation4 + $0x8c] ss:$16 sps:$4 sm:$0xff]  }
 0x367   :  { %865 = vmatprep.subr.bf16.mxu0 %v8870_v35  ;;  %906 = vmatprep.subr.bf16.mxu1 %v8873_v38  ;;  %v10240_v58 = vsel %vm616_vm0, %v1787_v47, %v1786_v44  ;;  %v10244_v63 = vsel %vm616_vm0, %v1905_v50, %v1904_v48  ;;  %v2141_v5 = vrot.slane %v10194_v25, 4  ;;  %v2259_v6 = vrot.slane %v10194_v25, 5  ;;  %v8874_v35 = vld [vmem:[#allocation4 + $0x60] ss:$16 sps:$4 sm:$0xff]   ;;  %v8891_v44 = vld [vmem:[#allocation4 + $0xac] ss:$16 sps:$4 sm:$0xff]  }
 0x368   :  { %v10247_v0 = vsel %vm616_vm0, %v2023_v55, %v2022_v51  ;;  %v2376_v13 = vrot.slane %v10178_v7, 7  ;;  %v2377_v14 = vrot.slane %v10194_v25, 6  ;;  %v10258_v15 = vsel %vm616_vm0, %v2500_v52, %v10174_v59  ;;  %v8886_v47 = vld [vmem:[#allocation4 + $0xa0] ss:$16 sps:$4 sm:$0xff]   ;;  %v8889_v48 = vld [vmem:[#allocation4 + $0xa8] ss:$16 sps:$4 sm:$0xff]  }
 0x369   :  { %v10261_v17 = vsel %vm616_vm0, %v2735_v56, %v2734_v60  ;;  %v10266_v19 = vsel %vm616_vm0, %v2141_v5, %v2140_v2  ;;  %v10269_v20 = vsel %vm616_vm0, %v2259_v6, %v2258_v3  ;;  %v2852_v7 = vrot.slane %v10174_v59, 3  ;;  %v8897_v51 = vld [vmem:[#allocation4 + $0xcc] ss:$16 sps:$4 sm:$0xff]   ;;  %v8892_v52 = vld [vmem:[#allocation4 + $0xc0] ss:$16 sps:$4 sm:$0xff]  }
 0x36a   :  { %v2971_v21 = vrot.slane %v10181_v11, 3  ;;  %v10274_v22 = vsel %vm616_vm0, %v2377_v14, %v2376_v13  ;;  %v2970_v23 = vrot.slane %v10174_v59, 4  ;;  %v3088_v25 = vrot.slane %v10174_v59, 5  ;;  %v8895_v55 = vld [vmem:[#allocation4 + $0xc8] ss:$16 sps:$4 sm:$0xff]  }
 0x36b   :  { %v3089_v26 = vrot.slane %v10181_v11, 4  ;;  %v10282_v27 = vsel %vm616_vm0, %v2853_v8, %v2852_v7  ;;  %v3206_v28 = vrot.slane %v10174_v59, 6  ;;  %v3207_v29 = vrot.slane %v10181_v11, 5  ;;  %v8903_v60 = vld [vmem:[#allocation4 + $0xec] ss:$16 sps:$4 sm:$0xff]  }
 0x36c   :  { %7961 = vmatmul.mubr.msk.bf16.vlgmr.msra.gmra.mrb[8].mxu0 %vm639_vm2, %v727_v4  ;;  %7962 = vmatmul.mubr.msk.bf16.vlgmr.msra.gmra.mrb[8].mxu1 %vm639_vm2, %v727_v4  ;;  %v10287_v30 = vsel %vm616_vm0, %v2971_v21, %v2970_v23  ;;  %v3324_v32 = vrot.slane %v10174_v59, 7  ;;  %v3325_v33 = vrot.slane %v10181_v11, 6  ;;  %v841_v40 = vpack.c.b16 %v10200_v39, %v10200_v39  ;;  %v8880_v59 = vld [vmem:[#allocation4 + $0x80] ss:$16 sps:$4 sm:$0xff]   ;;  %v8883_v11 = vld [vmem:[#allocation4 + $0x88] ss:$16 sps:$4 sm:$0xff]  }
 0x36d   :  { %866 = vmatpush1.bf16.msra.mxu0 %v8868_v61  ;;  %907 = vmatpush1.bf16.msra.mxu1 %v8871_v62  ;;  %v10290_v31 = vsel %vm616_vm0, %v3089_v26, %v3088_v25  ;;  %v10295_v34 = vsel %vm616_vm0, %v3207_v29, %v3206_v28  ;;  %v959_v43 = vpack.c.b16 %v10205_v41, %v10205_v41  ;;  %v8888_v39 = vld [vmem:[#allocation4 + $0xa4] ss:$16 sps:$4 sm:$0xff]   ;;  %v8898_v61 = vld [vmem:[#allocation4 + $0xe0] ss:$16 sps:$4 sm:$0xff]   ;;  %v8901_v62 = vld [vmem:[#allocation4 + $0xe8] ss:$16 sps:$4 sm:$0xff]  }
 0x36e   :  { %897 = vmatprep.mubr.bf16.mxu0 %v9888_v9  ;;  %938 = vmatprep.mubr.bf16.mxu1 %v9888_v9  ;;  %v10298_v38 = vsel %vm616_vm0, %v3325_v33, %v3324_v32  ;;  %v1077_v50 = vpack.c.b16 %v10211_v45, %v10211_v45  ;;  %v8894_v41 = vld [vmem:[#allocation4 + $0xc4] ss:$16 sps:$4 sm:$0xff]   ;;  %v1195_v56 = vpack.c.b16 %v10214_v46, %v10214_v46  ;;  %v8909_v3 = vld [vmem:[#allocation4 + $0x10c] ss:$16 sps:$4 sm:$0xff]   ;;  %v8904_v4 = vld [vmem:[#allocation4 + $0x100] ss:$16 sps:$4 sm:$0xff]  }
 0x36f   :  { %983 = vmatprep.subr.bf16.mxu0 %v8876_v10  ;;  %1024 = vmatprep.subr.bf16.mxu1 %v8879_v12  ;;  %v8900_v45 = vld [vmem:[#allocation4 + $0xe4] ss:$16 sps:$4 sm:$0xff]   ;;  %v1313_v2 = vpack.c.b16 %v10221_v49, %v10221_v49  ;;  %v8907_v5 = vld [vmem:[#allocation4 + $0x108] ss:$16 sps:$4 sm:$0xff]   ;;  %v1431_v6 = vpack.c.b16 %v10227_v53, %v10227_v53  ;;  %v8915_v8 = vld [vmem:[#allocation4 + $0x12c] ss:$16 sps:$4 sm:$0xff]   ;;  %v1554_v13 = vpack.c.b16 %v10231_v54, %v10231_v54 }
 0x370   :  { %v8906_v46 = vld [vmem:[#allocation4 + $0x104] ss:$16 sps:$4 sm:$0xff]   ;;  %v8910_v10 = vld [vmem:[#allocation4 + $0x120] ss:$16 sps:$4 sm:$0xff]   ;;  %v8913_v12 = vld [vmem:[#allocation4 + $0x128] ss:$16 sps:$4 sm:$0xff]   ;;  %v1671_v23 = vpack.c.b16 %v10237_v57, %v10237_v57  ;;  %v1789_v29 = vpack.c.b16 %v10240_v58, %v10240_v58 }
 0x371   :  { %v8912_v49 = vld [vmem:[#allocation4 + $0x124] ss:$16 sps:$4 sm:$0xff]   ;;  %v8921_v14 = vld [vmem:[#allocation4 + $0x14c] ss:$16 sps:$4 sm:$0xff]   ;;  %v8916_v7 = vld [vmem:[#allocation4 + $0x140] ss:$16 sps:$4 sm:$0xff]  }
 0x372   :  { %v8918_v53 = vld [vmem:[#allocation4 + $0x144] ss:$16 sps:$4 sm:$0xff]   ;;  %v8919_v21 = vld [vmem:[#allocation4 + $0x148] ss:$16 sps:$4 sm:$0xff]   ;;  %v8927_v25 = vld [vmem:[#allocation4 + $0x16c] ss:$16 sps:$4 sm:$0xff]  }
 0x373   :  { %v8924_v54 = vld [vmem:[#allocation4 + $0x164] ss:$16 sps:$4 sm:$0xff]   ;;  %v8922_v26 = vld [vmem:[#allocation4 + $0x160] ss:$16 sps:$4 sm:$0xff]   ;;  %v8925_v28 = vld [vmem:[#allocation4 + $0x168] ss:$16 sps:$4 sm:$0xff]  }
 0x374   :  { %7967 = vmatmul.mubr.msk.bf16.vlgmr.msra.gmra.mrb[12].mxu0 %vm639_vm2, %v841_v40  ;;  %7968 = vmatmul.mubr.msk.bf16.vlgmr.msra.gmra.mrb[12].mxu1 %vm639_vm2, %v841_v40  ;;  %v8930_v57 = vld [vmem:[#allocation4 + $0x184] ss:$16 sps:$4 sm:$0xff]   ;;  %v8933_v32 = vld [vmem:[#allocation4 + $0x18c] ss:$16 sps:$4 sm:$0xff]   ;;  %v8928_v33 = vld [vmem:[#allocation4 + $0x180] ss:$16 sps:$4 sm:$0xff]  }
 0x375   :  { %984 = vmatpush1.bf16.msra.mxu0 %v8874_v35  ;;  %1025 = vmatpush1.bf16.msra.mxu1 %v8877_v36  ;;  %v8931_v35 = vld [vmem:[#allocation4 + $0x188] ss:$16 sps:$4 sm:$0xff]   ;;  %v1907_v36 = vpack.c.b16 %v10244_v63, %v10244_v63  ;;  %v8936_v58 = vld [vmem:[#allocation4 + $0x1a4] ss:$16 sps:$4 sm:$0xff]   ;;  %v8939_v40 = vld [vmem:[#allocation4 + $0x1ac] ss:$16 sps:$4 sm:$0xff]  }
 0x376   :  { %1015 = vmatprep.mubr.bf16.mxu0 %v9888_v9  ;;  %1056 = vmatprep.mubr.bf16.mxu1 %v9888_v9  ;;  %v8942_v63 = vld [vmem:[#allocation4 + $0x1c4] ss:$16 sps:$4 sm:$0xff]  }
 0x377   :  { %1101 = vmatprep.subr.bf16.mxu0 %v8882_v37  ;;  %1142 = vmatprep.subr.bf16.mxu1 %v8885_v42  ;;  %v8934_v37 = vld [vmem:[#allocation4 + $0x1a0] ss:$16 sps:$4 sm:$0xff]   ;;  %v8937_v42 = vld [vmem:[#allocation4 + $0x1a8] ss:$16 sps:$4 sm:$0xff]  }
 0x37c   :  { %7973 = vmatmul.mubr.msk.bf16.vlgmr.msra.gmra.mrb[16].mxu0 %vm639_vm2, %v959_v43  ;;  %7974 = vmatmul.mubr.msk.bf16.vlgmr.msra.gmra.mrb[16].mxu1 %vm639_vm2, %v959_v43  ;;  %v8940_v43 = vld [vmem:[#allocation4 + $0x1c0] ss:$16 sps:$4 sm:$0xff]  }
 0x37d   :  { %1102 = vmatpush1.bf16.msra.mxu0 %v8880_v59  ;;  %1143 = vmatpush1.bf16.msra.mxu1 %v8883_v11  ;;  %v2025_v59 = vpack.c.b16 %v10247_v0, %v10247_v0  ;;  %v8945_v11 = vld [vmem:[#allocation4 + $0x1cc] ss:$16 sps:$4 sm:$0xff]   ;;  %v8948_v0 = vld [vmem:[#allocation4 + $0x1e4] ss:$16 sps:$4 sm:$0xff]  }
 0x37e   :  { %1133 = vmatprep.mubr.bf16.mxu0 %v9888_v9  ;;  %1174 = vmatprep.mubr.bf16.mxu1 %v9888_v9 }
 0x37f   :  { %1219 = vmatprep.subr.bf16.mxu0 %v8888_v39  ;;  %1260 = vmatprep.subr.bf16.mxu1 %v8891_v44  ;;  %v8943_v39 = vld [vmem:[#allocation4 + $0x1c8] ss:$16 sps:$4 sm:$0xff]   ;;  %v2143_v44 = vpack.c.b16 %v10266_v19, %v10266_v19  ;;  %v8954_v19 = vld [vmem:[#allocation4 + $0x204] ss:$16 sps:$4 sm:$0xff]  }
 0x384   :  { %7979 = vmatmul.mubr.msk.bf16.vlgmr.msra.gmra.mrb[20].mxu0 %vm639_vm2, %v1077_v50  ;;  %7980 = vmatmul.mubr.msk.bf16.vlgmr.msra.gmra.mrb[20].mxu1 %vm639_vm2, %v1077_v50  ;;  %v8949_v50 = vld [vmem:[#allocation4 + $0x1e8] ss:$16 sps:$4 sm:$0xff]  }
 0x385   :  { %1220 = vmatpush1.bf16.msra.mxu0 %v8886_v47  ;;  %1261 = vmatpush1.bf16.msra.mxu1 %v8889_v48  ;;  %v8951_v47 = vld [vmem:[#allocation4 + $0x1ec] ss:$16 sps:$4 sm:$0xff]   ;;  %v8946_v48 = vld [vmem:[#allocation4 + $0x1e0] ss:$16 sps:$4 sm:$0xff]  }
 0x386   :  { %1251 = vmatprep.mubr.bf16.mxu0 %v9888_v9  ;;  %1292 = vmatprep.mubr.bf16.mxu1 %v9888_v9 }
 0x387   :  { %1337 = vmatprep.subr.bf16.mxu0 %v8894_v41  ;;  %1378 = vmatprep.subr.bf16.mxu1 %v8897_v51  ;;  %v2261_v41 = vpack.c.b16 %v10269_v20, %v10269_v20  ;;  %v8957_v51 = vld [vmem:[#allocation4 + $0x20c] ss:$16 sps:$4 sm:$0xff]   ;;  %v8960_v20 = vld [vmem:[#allocation4 + $0x224] ss:$16 sps:$4 sm:$0xff]  }
 0x38c   :  { %7985 = vmatmul.mubr.msk.bf16.vlgmr.msra.gmra.mrb[24].mxu0 %vm639_vm2, %v1195_v56  ;;  %7986 = vmatmul.mubr.msk.bf16.vlgmr.msra.gmra.mrb[24].mxu1 %vm639_vm2, %v1195_v56  ;;  %v2379_v56 = vpack.c.b16 %v10274_v22, %v10274_v22  ;;  %v8966_v22 = vld [vmem:[#allocation4 + $0x244] ss:$16 sps:$4 sm:$0xff]  }
 0x38d   :  { %1338 = vmatpush1.bf16.msra.mxu0 %v8892_v52  ;;  %1379 = vmatpush1.bf16.msra.mxu1 %v8895_v55  ;;  %v8952_v52 = vld [vmem:[#allocation4 + $0x200] ss:$16 sps:$4 sm:$0xff]   ;;  %v8955_v55 = vld [vmem:[#allocation4 + $0x208] ss:$16 sps:$4 sm:$0xff]  }
 0x38e   :  { %1369 = vmatprep.mubr.bf16.mxu0 %v9888_v9  ;;  %1410 = vmatprep.mubr.bf16.mxu1 %v9888_v9 }
 0x38f   :  { %1455 = vmatprep.subr.bf16.mxu0 %v8900_v45  ;;  %1496 = vmatprep.subr.bf16.mxu1 %v8903_v60  ;;  %v8963_v45 = vld [vmem:[#allocation4 + $0x22c] ss:$16 sps:$4 sm:$0xff]   ;;  %v8958_v60 = vld [vmem:[#allocation4 + $0x220] ss:$16 sps:$4 sm:$0xff]  }
 0x394   :  { %7991 = vmatmul.mubr.msk.bf16.vlgmr.msra.gmra.mrb[28].mxu0 %vm639_vm2, %v1313_v2  ;;  %7992 = vmatmul.mubr.msk.bf16.vlgmr.msra.gmra.mrb[28].mxu1 %vm639_vm2, %v1313_v2  ;;  %v8969_v2 = vld [vmem:[#allocation4 + $0x24c] ss:$16 sps:$4 sm:$0xff]  }
 0x395   :  { %1456 = vmatpush1.bf16.msra.mxu0 %v8898_v61  ;;  %1497 = vmatpush1.bf16.msra.mxu1 %v8901_v62  ;;  %v8961_v61 = vld [vmem:[#allocation4 + $0x228] ss:$16 sps:$4 sm:$0xff]   ;;  %v2502_v62 = vpack.c.b16 %v10258_v15, %v10258_v15  ;;  %v8972_v15 = vld [vmem:[#allocation4 + $0x264] ss:$16 sps:$4 sm:$0xff]  }
 0x396   :  { %1487 = vmatprep.mubr.bf16.mxu0 %v9888_v9  ;;  %1528 = vmatprep.mubr.bf16.mxu1 %v9888_v9 }
 0x397   :  { %1578 = vmatprep.subr.bf16.mxu0 %v8906_v46  ;;  %1619 = vmatprep.subr.bf16.mxu1 %v8909_v3  ;;  %v8964_v46 = vld [vmem:[#allocation4 + $0x240] ss:$16 sps:$4 sm:$0xff]   ;;  %v8967_v3 = vld [vmem:[#allocation4 + $0x248] ss:$16 sps:$4 sm:$0xff]  }
 0x39c   :  { %7997 = vmatmul.mubr.msk.bf16.vlgmr.msra.gmra.mrb[32].mxu0 %vm639_vm2, %v1431_v6  ;;  %7998 = vmatmul.mubr.msk.bf16.vlgmr.msra.gmra.mrb[32].mxu1 %vm639_vm2, %v1431_v6  ;;  %v8970_v6 = vld [vmem:[#allocation4 + $0x260] ss:$16 sps:$4 sm:$0xff]  }
 0x39d   :  { %1579 = vmatpush1.bf16.msra.mxu0 %v8904_v4  ;;  %1620 = vmatpush1.bf16.msra.mxu1 %v8907_v5  ;;  %v2619_v4 = vpack.c.b16 %v10192_v24, %v10192_v24  ;;  %v8975_v5 = vld [vmem:[#allocation4 + $0x26c] ss:$16 sps:$4 sm:$0xff]   ;;  %v8978_v24 = vld [vmem:[#allocation4 + $0x284] ss:$16 sps:$4 sm:$0xff]  }
 0x39e   :  { %1610 = vmatprep.mubr.bf16.mxu0 %v9888_v9  ;;  %1651 = vmatprep.mubr.bf16.mxu1 %v9888_v9 }
 0x39f   :  { %1695 = vmatprep.subr.bf16.mxu0 %v8912_v49  ;;  %1736 = vmatprep.subr.bf16.mxu1 %v8915_v8  ;;  %v8973_v49 = vld [vmem:[#allocation4 + $0x268] ss:$16 sps:$4 sm:$0xff]   ;;  %v2737_v8 = vpack.c.b16 %v10261_v17, %v10261_v17  ;;  %v8984_v17 = vld [vmem:[#allocation4 + $0x2a4] ss:$16 sps:$4 sm:$0xff]  }
 0x3a4   :  { %8003 = vmatmul.mubr.msk.bf16.vlgmr.msra.gmra.mrb[36].mxu0 %vm639_vm2, %v1554_v13  ;;  %8004 = vmatmul.mubr.msk.bf16.vlgmr.msra.gmra.mrb[36].mxu1 %vm639_vm2, %v1554_v13  ;;  %v8979_v13 = vld [vmem:[#allocation4 + $0x288] ss:$16 sps:$4 sm:$0xff]  }
 0x3a5   :  { %1696 = vmatpush1.bf16.msra.mxu0 %v8910_v10  ;;  %1737 = vmatpush1.bf16.msra.mxu1 %v8913_v12  ;;  %v8981_v10 = vld [vmem:[#allocation4 + $0x28c] ss:$16 sps:$4 sm:$0xff]   ;;  %v8976_v12 = vld [vmem:[#allocation4 + $0x280] ss:$16 sps:$4 sm:$0xff]  }
 0x3a6   :  { %1727 = vmatprep.mubr.bf16.mxu0 %v9888_v9  ;;  %1768 = vmatprep.mubr.bf16.mxu1 %v9888_v9 }
 0x3a7   :  { %1813 = vmatprep.subr.bf16.mxu0 %v8918_v53  ;;  %1854 = vmatprep.subr.bf16.mxu1 %v8921_v14  ;;  %v2855_v53 = vpack.c.b16 %v10282_v27, %v10282_v27  ;;  %v8987_v14 = vld [vmem:[#allocation4 + $0x2ac] ss:$16 sps:$4 sm:$0xff]   ;;  %v8990_v27 = vld [vmem:[#allocation4 + $0x2c4] ss:$16 sps:$4 sm:$0xff]  }
 0x3ac   :  { %8009 = vmatmul.mubr.msk.bf16.vlgmr.msra.gmra.mrb[40].mxu0 %vm639_vm2, %v1671_v23  ;;  %8010 = vmatmul.mubr.msk.bf16.vlgmr.msra.gmra.mrb[40].mxu1 %vm639_vm2, %v1671_v23  ;;  %v2973_v23 = vpack.c.b16 %v10287_v30, %v10287_v30  ;;  %v8996_v30 = vld [vmem:[#allocation4 + $0x2e4] ss:$16 sps:$4 sm:$0xff]  }
 0x3ad   :  { %1814 = vmatpush1.bf16.msra.mxu0 %v8916_v7  ;;  %1855 = vmatpush1.bf16.msra.mxu1 %v8919_v21  ;;  %v8982_v7 = vld [vmem:[#allocation4 + $0x2a0] ss:$16 sps:$4 sm:$0xff]   ;;  %v8985_v21 = vld [vmem:[#allocation4 + $0x2a8] ss:$16 sps:$4 sm:$0xff]  }
 0x3ae   :  { %1845 = vmatprep.mubr.bf16.mxu0 %v9888_v9  ;;  %1886 = vmatprep.mubr.bf16.mxu1 %v9888_v9 }
 0x3af   :  { %1931 = vmatprep.subr.bf16.mxu0 %v8924_v54  ;;  %1972 = vmatprep.subr.bf16.mxu1 %v8927_v25  ;;  %v8993_v54 = vld [vmem:[#allocation4 + $0x2cc] ss:$16 sps:$4 sm:$0xff]   ;;  %v8988_v25 = vld [vmem:[#allocation4 + $0x2c0] ss:$16 sps:$4 sm:$0xff]  }
 0x3b4   :  { %8015 = vmatmul.mubr.msk.bf16.vlgmr.msra.gmra.mrb[44].mxu0 %vm639_vm2, %v1789_v29  ;;  %8016 = vmatmul.mubr.msk.bf16.vlgmr.msra.gmra.mrb[44].mxu1 %vm639_vm2, %v1789_v29  ;;  %v8999_v29 = vld [vmem:[#allocation4 + $0x2ec] ss:$16 sps:$4 sm:$0xff]  }
 0x3b5   :  { %1932 = vmatpush1.bf16.msra.mxu0 %v8922_v26  ;;  %1973 = vmatpush1.bf16.msra.mxu1 %v8925_v28  ;;  %v8991_v26 = vld [vmem:[#allocation4 + $0x2c8] ss:$16 sps:$4 sm:$0xff]   ;;  %v3091_v28 = vpack.c.b16 %v10290_v31, %v10290_v31  ;;  %v3327_v31 = vpack.c.b16 %v10298_v38, %v10298_v38 }
 0x3b6   :  { %1963 = vmatprep.mubr.bf16.mxu0 %v9888_v9  ;;  %2004 = vmatprep.mubr.bf16.mxu1 %v9888_v9  ;;  %v9006_v38 = vld [vmem:[#allocation7 + $0x30] ss:$24 sps:$4 sm:$0xff]  }
 0x3b7   :  { %2049 = vmatprep.subr.bf16.mxu0 %v8930_v57  ;;  %2090 = vmatprep.subr.bf16.mxu1 %v8933_v32  ;;  %v8994_v57 = vld [vmem:[#allocation4 + $0x2e0] ss:$16 sps:$4 sm:$0xff]   ;;  %v8997_v32 = vld [vmem:[#allocation4 + $0x2e8] ss:$16 sps:$4 sm:$0xff]  }
 0x3bc   :  { %8021 = vmatmul.mubr.msk.bf16.vlgmr.msra.gmra.mrb[48].mxu0 %vm639_vm2, %v1907_v36  ;;  %8022 = vmatmul.mubr.msk.bf16.vlgmr.msra.gmra.mrb[48].mxu1 %vm639_vm2, %v1907_v36 }
 0x3bd   :  { %2050 = vmatpush1.bf16.msra.mxu0 %v8928_v33  ;;  %2091 = vmatpush1.bf16.msra.mxu1 %v8931_v35  ;;  %v3209_v33 = vpack.c.b16 %v10295_v34, %v10295_v34 }
 0x3be   :  { %2081 = vmatprep.mubr.bf16.mxu0 %v9888_v9  ;;  %2122 = vmatprep.mubr.bf16.mxu1 %v9888_v9 }
 0x3bf   :  { %2167 = vmatprep.subr.bf16.mxu0 %v8936_v58  ;;  %2208 = vmatprep.subr.bf16.mxu1 %v8939_v40 }
 0x3c4   :  { %8027 = vmatmul.mubr.msk.bf16.vlgmr.msra.gmra.mrb[52].mxu0 %vm639_vm2, %v2025_v59  ;;  %8028 = vmatmul.mubr.msk.bf16.vlgmr.msra.gmra.mrb[52].mxu1 %vm639_vm2, %v2025_v59 }
 0x3c5   :  { %2168 = vmatpush1.bf16.msra.mxu0 %v8934_v37  ;;  %2209 = vmatpush1.bf16.msra.mxu1 %v8937_v42 }
 0x3c6   :  { %2199 = vmatprep.mubr.bf16.mxu0 %v9888_v9  ;;  %2240 = vmatprep.mubr.bf16.mxu1 %v9888_v9 }
 0x3c7   :  { %2285 = vmatprep.subr.bf16.mxu0 %v8942_v63  ;;  %2326 = vmatprep.subr.bf16.mxu1 %v8945_v11  ;;  %v9000_v63 = vld [vmem:[#allocation7] ss:$24 sps:$4 sm:$0xff]   ;;  %v9002_v11 = vld [vmem:[#allocation7 + $0x4] ss:$24 sps:$4 sm:$0xff]  }
 0x3cc   :  { %8033 = vmatmul.mubr.msk.bf16.vlgmr.msra.gmra.mrb[56].mxu0 %vm639_vm2, %v2143_v44  ;;  %8034 = vmatmul.mubr.msk.bf16.vlgmr.msra.gmra.mrb[56].mxu1 %vm639_vm2, %v2143_v44  ;;  %v9011_v44 = vld [vmem:[#allocation7 + $0x3c] ss:$24 sps:$4 sm:$0xff]  }
 0x3cd   :  { %2286 = vmatpush1.bf16.msra.mxu0 %v8940_v43  ;;  %2327 = vmatpush1.bf16.msra.mxu1 %v8943_v39  ;;  %v9003_v43 = vld [vmem:[#allocation7 + $0x8] ss:$24 sps:$4 sm:$0xff]   ;;  %v9005_v39 = vld [vmem:[#allocation7 + $0xc] ss:$24 sps:$4 sm:$0xff]  }
 0x3ce   :  { %2317 = vmatprep.mubr.bf16.mxu0 %v9888_v9  ;;  %2358 = vmatprep.mubr.bf16.mxu1 %v9888_v9 }
 0x3cf   :  { %2403 = vmatprep.subr.bf16.mxu0 %v8948_v0  ;;  %2444 = vmatprep.subr.bf16.mxu1 %v8951_v47  ;;  %v9009_v0 = vld [vmem:[#allocation7 + $0x38] ss:$24 sps:$4 sm:$0xff]  }
 0x3d4   :  { %8039 = vmatmul.mubr.msk.bf16.vlgmr.msra.gmra.mrb[60].mxu0 %vm639_vm2, %v2261_v41  ;;  %8040 = vmatmul.mubr.msk.bf16.vlgmr.msra.gmra.mrb[60].mxu1 %vm639_vm2, %v2261_v41 }
 0x3d5   :  { %2404 = vmatpush1.bf16.msra.mxu0 %v8946_v48  ;;  %2445 = vmatpush1.bf16.msra.mxu1 %v8949_v50 }
 0x3d6   :  { %2435 = vmatprep.mubr.bf16.mxu0 %v9888_v9  ;;  %2476 = vmatprep.mubr.bf16.mxu1 %v9888_v9 }
 0x3d7   :  { %2526 = vmatprep.subr.bf16.mxu0 %v8954_v19  ;;  %2567 = vmatprep.subr.bf16.mxu1 %v8957_v51 }
 0x3dc   :  { %8045 = vmatmul.mubr.msk.bf16.vlgmr.msra.gmra.mrb[64].mxu0 %vm639_vm2, %v2379_v56  ;;  %8046 = vmatmul.mubr.msk.bf16.vlgmr.msra.gmra.mrb[64].mxu1 %vm639_vm2, %v2379_v56 }
 0x3dd   :  { %2527 = vmatpush1.bf16.msra.mxu0 %v8952_v52  ;;  %2568 = vmatpush1.bf16.msra.mxu1 %v8955_v55 }
 0x3de   :  { %2558 = vmatprep.mubr.bf16.mxu0 %v9888_v9  ;;  %2599 = vmatprep.mubr.bf16.mxu1 %v9888_v9 }
 0x3df   :  { %2643 = vmatprep.subr.bf16.mxu0 %v8960_v20  ;;  %2684 = vmatprep.subr.bf16.mxu1 %v8963_v45 }
 0x3e4   :  { %8051 = vmatmul.mubr.msk.bf16.vlgmr.msra.gmra.mrb[68].mxu0 %vm639_vm2, %v2502_v62  ;;  %8052 = vmatmul.mubr.msk.bf16.vlgmr.msra.gmra.mrb[68].mxu1 %vm639_vm2, %v2502_v62  ;;  %v9014_v62 = vld [vmem:[#allocation7 + $0x64] ss:$24 sps:$4 sm:$0xff]  }
 0x3e5   :  { %2644 = vmatpush1.bf16.msra.mxu0 %v8958_v60  ;;  %2685 = vmatpush1.bf16.msra.mxu1 %v8961_v61  ;;  %v9012_v61 = vld [vmem:[#allocation7 + $0x60] ss:$24 sps:$4 sm:$0xff]  }
 0x3e6   :  { %2675 = vmatprep.mubr.bf16.mxu0 %v9888_v9  ;;  %2716 = vmatprep.mubr.bf16.mxu1 %v9888_v9 }
 0x3e7   :  { %2761 = vmatprep.subr.bf16.mxu0 %v8966_v22  ;;  %2802 = vmatprep.subr.bf16.mxu1 %v8969_v2  ;;  %v9015_v22 = vld [vmem:[#allocation7 + $0x68] ss:$24 sps:$4 sm:$0xff]   ;;  %v9017_v2 = vld [vmem:[#allocation7 + $0x6c] ss:$24 sps:$4 sm:$0xff]  }
 0x3ec   :  { %8057 = vmatmul.mubr.msk.bf16.vlgmr.msra.gmra.mrb[72].mxu0 %vm639_vm2, %v2619_v4  ;;  %8058 = vmatmul.mubr.msk.bf16.vlgmr.msra.gmra.mrb[72].mxu1 %vm639_vm2, %v2619_v4  ;;  %v9018_v4 = vld [vmem:[#allocation7 + $0x90] ss:$24 sps:$4 sm:$0xff]  }
 0x3ed   :  { %2762 = vmatpush1.bf16.msra.mxu0 %v8964_v46  ;;  %2803 = vmatpush1.bf16.msra.mxu1 %v8967_v3  ;;  %v9020_v46 = vld [vmem:[#allocation7 + $0x94] ss:$24 sps:$4 sm:$0xff]  }
 0x3ee   :  { %2793 = vmatprep.mubr.bf16.mxu0 %v9888_v9  ;;  %2834 = vmatprep.mubr.bf16.mxu1 %v9888_v9  ;;  %v9023_v3 = vld [vmem:[#allocation7 + $0x9c] ss:$24 sps:$4 sm:$0xff]  }
 0x3ef   :  { %2879 = vmatprep.subr.bf16.mxu0 %v8972_v15  ;;  %2920 = vmatprep.subr.bf16.mxu1 %v8975_v5  ;;  %v9021_v15 = vld [vmem:[#allocation7 + $0x98] ss:$24 sps:$4 sm:$0xff]  }
 0x3f4   :  { %8063 = vmatmul.mubr.msk.bf16.vlgmr.msra.gmra.mrb[76].mxu0 %vm639_vm2, %v2737_v8  ;;  %8064 = vmatmul.mubr.msk.bf16.vlgmr.msra.gmra.mrb[76].mxu1 %vm639_vm2, %v2737_v8 }
 0x3f5   :  { %2880 = vmatpush1.bf16.msra.mxu0 %v8970_v6  ;;  %2921 = vmatpush1.bf16.msra.mxu1 %v8973_v49 }
 0x3f6   :  { %2911 = vmatprep.mubr.bf16.mxu0 %v9888_v9  ;;  %2952 = vmatprep.mubr.bf16.mxu1 %v9888_v9 }
 0x3f7   :  { %2997 = vmatprep.subr.bf16.mxu0 %v8978_v24  ;;  %3038 = vmatprep.subr.bf16.mxu1 %v8981_v10 }
 0x3fc   :  { %8069 = vmatmul.mubr.msk.bf16.vlgmr.msra.gmra.mrb[80].mxu0 %vm639_vm2, %v2855_v53  ;;  %8070 = vmatmul.mubr.msk.bf16.vlgmr.msra.gmra.mrb[80].mxu1 %vm639_vm2, %v2855_v53 }
 0x3fd   :  { %2998 = vmatpush1.bf16.msra.mxu0 %v8976_v12  ;;  %3039 = vmatpush1.bf16.msra.mxu1 %v8979_v13 }
 0x3fe   :  { %3029 = vmatprep.mubr.bf16.mxu0 %v9888_v9  ;;  %3070 = vmatprep.mubr.bf16.mxu1 %v9888_v9 }
 0x3ff   :  { %3115 = vmatprep.subr.bf16.mxu0 %v8984_v17  ;;  %3156 = vmatprep.subr.bf16.mxu1 %v8987_v14 }
 0x404   :  { %8075 = vmatmul.mubr.msk.bf16.vlgmr.msra.gmra.mrb[84].mxu0 %vm639_vm2, %v2973_v23  ;;  %8076 = vmatmul.mubr.msk.bf16.vlgmr.msra.gmra.mrb[84].mxu1 %vm639_vm2, %v2973_v23  ;;  %v9026_v23 = vld [vmem:[#allocation7 + $0xc4] ss:$24 sps:$4 sm:$0xff]  }
 0x405   :  { %3116 = vmatpush1.bf16.msra.mxu0 %v8982_v7  ;;  %3157 = vmatpush1.bf16.msra.mxu1 %v8985_v21  ;;  %v9024_v21 = vld [vmem:[#allocation7 + $0xc0] ss:$24 sps:$4 sm:$0xff]  }
 0x406   :  { %3147 = vmatprep.mubr.bf16.mxu0 %v9888_v9  ;;  %3188 = vmatprep.mubr.bf16.mxu1 %v9888_v9 }
 0x407   :  { %3233 = vmatprep.subr.bf16.mxu0 %v8990_v27  ;;  %3274 = vmatprep.subr.bf16.mxu1 %v8993_v54  ;;  %v9027_v27 = vld [vmem:[#allocation7 + $0xc8] ss:$24 sps:$4 sm:$0xff]   ;;  %v9029_v54 = vld [vmem:[#allocation7 + $0xcc] ss:$24 sps:$4 sm:$0xff]  }
 0x40c   :  { %8081 = vmatmul.mubr.msk.bf16.vlgmr.msra.gmra.mrb[88].mxu0 %vm639_vm2, %v3091_v28  ;;  %8082 = vmatmul.mubr.msk.bf16.vlgmr.msra.gmra.mrb[88].mxu1 %vm639_vm2, %v3091_v28  ;;  %v9030_v28 = vld [vmem:[#allocation7 + $0xf0] ss:$24 sps:$4 sm:$0xff]  }
 0x40d   :  { %3234 = vmatpush1.bf16.msra.mxu0 %v8988_v25  ;;  %3275 = vmatpush1.bf16.msra.mxu1 %v8991_v26  ;;  %v9032_v25 = vld [vmem:[#allocation7 + $0xf4] ss:$24 sps:$4 sm:$0xff]  }
 0x40e   :  { %3265 = vmatprep.mubr.bf16.mxu0 %v9888_v9  ;;  %3306 = vmatprep.mubr.bf16.mxu1 %v9888_v9  ;;  %v9035_v26 = vld [vmem:[#allocation7 + $0xfc] ss:$24 sps:$4 sm:$0xff]  }
 0x40f   :  { %3351 = vmatprep.subr.bf16.mxu0 %v8996_v30  ;;  %3392 = vmatprep.subr.bf16.mxu1 %v8999_v29  ;;  %v9033_v30 = vld [vmem:[#allocation7 + $0xf8] ss:$24 sps:$4 sm:$0xff]  }
 0x414   :  { %8087 = vmatmul.mubr.msk.bf16.vlgmr.msra.gmra.mrb[92].mxu0 %vm639_vm2, %v3209_v33  ;;  %8088 = vmatmul.mubr.msk.bf16.vlgmr.msra.gmra.mrb[92].mxu1 %vm639_vm2, %v3209_v33 }
 0x415   :  { %3352 = vmatpush1.bf16.msra.mxu0 %v8994_v57  ;;  %3393 = vmatpush1.bf16.msra.mxu1 %v8997_v32 }
 0x416   :  { %3383 = vmatprep.mubr.bf16.mxu0 %v9888_v9  ;;  %3424 = vmatprep.mubr.bf16.mxu1 %v9888_v9  ;;  %v9008_v9 = vld [vmem:[#allocation7 + $0x34] ss:$24 sps:$4 sm:$0xff]  }
 0x417   :  { %4663 = vmatprep.subr.bf16.mxu0 %v9002_v11  ;;  %4745 = vmatprep.subr.bf16.mxu1 %v9005_v39  ;;  %v9039_v11 = vld [vmem:[#allocation7 + $0x128] ss:$24 sps:$4 sm:$0xff]   ;;  %v9044_v39 = vld [vmem:[#allocation7 + $0x154] ss:$24 sps:$4 sm:$0xff]  }
 0x41c   :  { %8093 = vmatmul.mubr.msk.bf16.vlgmr.msra.gmra.mrb[96].mxu0 %vm639_vm2, %v3327_v31  ;;  %8094 = vmatmul.mubr.msk.bf16.vlgmr.msra.gmra.mrb[96].mxu1 %vm639_vm2, %v3327_v31  ;;  %vm9894_vm2 = vmmov 0  }
 0x41d   :  { %4664 = vmatpush1.bf16.msra.mxu0 %v9000_v63  ;;  %4746 = vmatpush1.bf16.msra.mxu1 %v9003_v43  ;;  %v9038_v63 = vld [vmem:[#allocation7 + $0x124] ss:$24 sps:$4 sm:$0xff]  }
 0x41e   :  { %4665 = vmatprep.subr.bf16.mxu0 %v9008_v9  ;;  %4747 = vmatprep.subr.bf16.mxu1 %v9011_v44  ;;  %v9041_v43 = vld [vmem:[#allocation7 + $0x12c] ss:$24 sps:$4 sm:$0xff]   ;;  %v9047_v9 = vld [vmem:[#allocation7 + $0x15c] ss:$24 sps:$4 sm:$0xff]   ;;  %v9042_v44 = vld [vmem:[#allocation7 + $0x150] ss:$24 sps:$4 sm:$0xff]  }
 0x421   :  { %4666 = vmatpush1.bf16.msra.mxu0 %v9006_v38  ;;  %4748 = vmatpush1.bf16.msra.mxu1 %v9009_v0  ;;  %v9045_v38 = vld [vmem:[#allocation7 + $0x158] ss:$24 sps:$4 sm:$0xff]  }
 0x422   :  { %4667 = vmatprep.subr.bf16.mxu0 %v9014_v62  ;;  %4749 = vmatprep.subr.bf16.mxu1 %v9017_v2  ;;  %v9051_v62 = vld [vmem:[#allocation7 + $0x188] ss:$24 sps:$4 sm:$0xff]   ;;  %v9056_v2 = vld [vmem:[#allocation7 + $0x1b4] ss:$24 sps:$4 sm:$0xff]  }
 0x425   :  { %4668 = vmatpush1.bf16.msra.mxu0 %v9012_v61  ;;  %4750 = vmatpush1.bf16.msra.mxu1 %v9015_v22  ;;  %v9050_v61 = vld [vmem:[#allocation7 + $0x184] ss:$24 sps:$4 sm:$0xff]  }
 0x426   :  { %4669 = vmatprep.subr.bf16.mxu0 %v9020_v46  ;;  %4751 = vmatprep.subr.bf16.mxu1 %v9023_v3  ;;  %v9053_v22 = vld [vmem:[#allocation7 + $0x18c] ss:$24 sps:$4 sm:$0xff]   ;;  %v9059_v46 = vld [vmem:[#allocation7 + $0x1bc] ss:$24 sps:$4 sm:$0xff]   ;;  %v9054_v3 = vld [vmem:[#allocation7 + $0x1b0] ss:$24 sps:$4 sm:$0xff]  }
 0x429   :  { %4670 = vmatpush1.bf16.msra.mxu0 %v9018_v4  ;;  %4752 = vmatpush1.bf16.msra.mxu1 %v9021_v15  ;;  %v9057_v4 = vld [vmem:[#allocation7 + $0x1b8] ss:$24 sps:$4 sm:$0xff]  }
 0x42a   :  { %4671 = vmatprep.subr.bf16.mxu0 %v9026_v23  ;;  %4753 = vmatprep.subr.bf16.mxu1 %v9029_v54  ;;  %v9063_v23 = vld [vmem:[#allocation7 + $0x1e8] ss:$24 sps:$4 sm:$0xff]   ;;  %v9068_v54 = vld [vmem:[#allocation7 + $0x214] ss:$24 sps:$4 sm:$0xff]  }
 0x42d   :  { %4672 = vmatpush1.bf16.msra.mxu0 %v9024_v21  ;;  %4754 = vmatpush1.bf16.msra.mxu1 %v9027_v27  ;;  %v9062_v21 = vld [vmem:[#allocation7 + $0x1e4] ss:$24 sps:$4 sm:$0xff]  }
 0x42e   :  { %4673 = vmatprep.subr.bf16.mxu0 %v9032_v25  ;;  %4755 = vmatprep.subr.bf16.mxu1 %v9035_v26  ;;  %v9065_v27 = vld [vmem:[#allocation7 + $0x1ec] ss:$24 sps:$4 sm:$0xff]   ;;  %v9071_v25 = vld [vmem:[#allocation7 + $0x21c] ss:$24 sps:$4 sm:$0xff]   ;;  %v9066_v26 = vld [vmem:[#allocation7 + $0x210] ss:$24 sps:$4 sm:$0xff]  }
 0x431   :  { %4674 = vmatpush1.bf16.msra.mxu0 %v9030_v28  ;;  %4756 = vmatpush1.bf16.msra.mxu1 %v9033_v30  ;;  %v9069_v28 = vld [vmem:[#allocation7 + $0x218] ss:$24 sps:$4 sm:$0xff]  }
 0x432   :  { %4675 = vmatprep.subr.bf16.mxu0 %v9038_v63  ;;  %4757 = vmatprep.subr.bf16.mxu1 %v9041_v43  ;;  %v9075_v63 = vld [vmem:[#allocation7 + $0x248] ss:$24 sps:$4 sm:$0xff]   ;;  %v9080_v43 = vld [vmem:[#allocation7 + $0x274] ss:$24 sps:$4 sm:$0xff]  }
 0x435   :  { %4758 = vmatpush1.bf16.msra.mxu1 %v9039_v11  ;;  %v9077_v11 = vld [vmem:[#allocation7 + $0x24c] ss:$24 sps:$4 sm:$0xff]  }
 0x436   :  { %4759 = vmatprep.subr.bf16.mxu1 %v9047_v9  ;;  %v9078_v9 = vld [vmem:[#allocation7 + $0x270] ss:$24 sps:$4 sm:$0xff]  }
 0x437   :  { %v677_v35 = vpop.f32.mrb[4].mxu0  ;;  %v718_v36 = vpop.f32.mrb[4].mxu1 }
 0x438   :  { %v679_v34 = vpop.f32.mrb[5].mxu0  ;;  %v720_v58 = vpop.f32.mrb[5].mxu1 }
 0x439   :  { %v681_v40 = vpop.f32.mrb[6].mxu0  ;;  %v722_v37 = vpop.f32.mrb[6].mxu1  ;;  %4760 = vmatpush1.bf16.msra.mxu1 %v9045_v38 }
 0x43a   :  { %v682_v42 = vpop.f32.mrb[7].mxu0  ;;  %v723_v59 = vpop.f32.mrb[7].mxu1  ;;  %4761 = vmatprep.subr.bf16.mxu1 %v9053_v22 }
 0x43b   :  { %v9036_v59 = vld [vmem:[#allocation7 + $0x120] ss:$24 sps:$4 sm:$0xff]  }
 0x43c   :  { %4676 = vmatpush1.bf16.msra.mxu0 %v9036_v59  ;;  %v9074_v59 = vld [vmem:[#allocation7 + $0x244] ss:$24 sps:$4 sm:$0xff]  }
 0x43d   :  { %4677 = vmatprep.subr.bf16.mxu0 %v9044_v39  ;;  %4762 = vmatpush1.bf16.msra.mxu1 %v9051_v62  ;;  %v9083_v39 = vld [vmem:[#allocation7 + $0x27c] ss:$24 sps:$4 sm:$0xff]  }
 0x43e   :  { %4763 = vmatprep.subr.bf16.mxu1 %v9059_v46  ;;  %v9084_v46 = vld [vmem:[#allocation7 + $0x2a0] ss:$24 sps:$4 sm:$0xff]  }
 0x43f   :  { %v785_v47 = vpop.f32.mrb[8].mxu0  ;;  %v826_v48 = vpop.f32.mrb[8].mxu1 }
 0x440   :  { %v786_v50 = vadd.f32 %v785_v47, %v677_v35  ;;  %v827_v41 = vadd.f32 %v826_v48, %v718_v36  ;;  %v787_v19 = vpop.f32.mrb[9].mxu0  ;;  %v828_v51 = vpop.f32.mrb[9].mxu1  ;;  %4678 = vmatpush1.bf16.msra.mxu0 %v9042_v44  ;;  %v9081_v44 = vld [vmem:[#allocation7 + $0x278] ss:$24 sps:$4 sm:$0xff]  }
 0x441   :  { %v788_v52 = vadd.f32 %v787_v19, %v679_v34  ;;  %v829_v55 = vadd.f32 %v828_v51, %v720_v58  ;;  %v789_v56 = vpop.f32.mrb[10].mxu0  ;;  %v830_v20 = vpop.f32.mrb[10].mxu1  ;;  %4679 = vmatprep.subr.bf16.mxu0 %v9050_v61  ;;  %4764 = vmatpush1.bf16.msra.mxu1 %v9057_v4 }
 0x442   :  { %v790_v45 = vpop.f32.mrb[11].mxu0  ;;  %v831_v60 = vpop.f32.mrb[11].mxu1  ;;  %4765 = vmatprep.subr.bf16.mxu1 %v9065_v27 }
 0x443   :  { %v9048_v60 = vld [vmem:[#allocation7 + $0x180] ss:$24 sps:$4 sm:$0xff]  }
 0x444   :  { %4680 = vmatpush1.bf16.msra.mxu0 %v9048_v60 }
 0x445   :  { %4681 = vmatprep.subr.bf16.mxu0 %v9056_v2  ;;  %4766 = vmatpush1.bf16.msra.mxu1 %v9063_v23 }
 0x446   :  { %4767 = vmatprep.subr.bf16.mxu1 %v9071_v25 }
 0x447   :  { %v899_v5 = vpop.f32.mrb[12].mxu0  ;;  %v940_v6 = vpop.f32.mrb[12].mxu1 }
 0x448   :  { %v947_v49 = vadd.f32 %v899_v5, %v786_v50  ;;  %v949_v8 = vadd.f32 %v940_v6, %v827_v41  ;;  %v901_v24 = vpop.f32.mrb[13].mxu0  ;;  %v942_v10 = vpop.f32.mrb[13].mxu1  ;;  %4682 = vmatpush1.bf16.msra.mxu0 %v9054_v3  ;;  %v9086_v3 = vld [vmem:[#allocation7 + $0x2a4] ss:$24 sps:$4 sm:$0xff]  }
 0x449   :  { %v948_v12 = vadd.f32 %v901_v24, %v788_v52  ;;  %v950_v13 = vadd.f32 %v942_v10, %v829_v55  ;;  %v903_v53 = vpop.f32.mrb[14].mxu0  ;;  %v944_v17 = vpop.f32.mrb[14].mxu1  ;;  %4683 = vmatprep.subr.bf16.mxu0 %v9062_v21  ;;  %4768 = vmatpush1.bf16.msra.mxu1 %v9069_v28 }
 0x44a   :  { %v904_v14 = vpop.f32.mrb[15].mxu0  ;;  %v945_v7 = vpop.f32.mrb[15].mxu1  ;;  %4769 = vmatprep.subr.bf16.mxu1 %v9077_v11 }
 0x44b   :  { %v9060_v7 = vld [vmem:[#allocation7 + $0x1e0] ss:$24 sps:$4 sm:$0xff]  }
 0x44c   :  { %4684 = vmatpush1.bf16.msra.mxu0 %v9060_v7  ;;  %v9101_v7 = vld [vmem:[#allocation7 + $0x30c] ss:$24 sps:$4 sm:$0xff]  }
 0x44d   :  { %4685 = vmatprep.subr.bf16.mxu0 %v9068_v54  ;;  %4770 = vmatpush1.bf16.msra.mxu1 %v9075_v63 }
 0x44e   :  { %4771 = vmatprep.subr.bf16.mxu1 %v9083_v39 }
 0x44f   :  { %v1017_v29 = vpop.f32.mrb[16].mxu0  ;;  %v1058_v57 = vpop.f32.mrb[16].mxu1 }
 0x450   :  { %v1065_v32 = vadd.f32 %v1017_v29, %v947_v49  ;;  %v1067_v33 = vadd.f32 %v1058_v57, %v949_v8  ;;  %v1019_v31 = vpop.f32.mrb[17].mxu0  ;;  %v1060_v35 = vpop.f32.mrb[17].mxu1  ;;  %4686 = vmatpush1.bf16.msra.mxu0 %v9066_v26 }
 0x451   :  { %v1066_v36 = vadd.f32 %v1019_v31, %v948_v12  ;;  %v1068_v34 = vadd.f32 %v1060_v35, %v950_v13  ;;  %v1021_v58 = vpop.f32.mrb[18].mxu0  ;;  %v1062_v40 = vpop.f32.mrb[18].mxu1  ;;  %4687 = vmatprep.subr.bf16.mxu0 %v9074_v59  ;;  %4772 = vmatpush1.bf16.msra.mxu1 %v9081_v44 }
 0x452   :  { %v1022_v37 = vpop.f32.mrb[19].mxu0  ;;  %v1063_v42 = vpop.f32.mrb[19].mxu1 }
 0x453   :  { %v9072_v42 = vld [vmem:[#allocation7 + $0x240] ss:$24 sps:$4 sm:$0xff]  }
 0x454   :  { %4688 = vmatpush1.bf16.msra.mxu0 %v9072_v42 }
 0x455   :  { %4689 = vmatprep.subr.bf16.mxu0 %v9080_v43 }
 0x457   :  { %v1135_v0 = vpop.f32.mrb[20].mxu0  ;;  %v1176_v47 = vpop.f32.mrb[20].mxu1 }
 0x458   :  { %v1183_v48 = vadd.f32 %v1135_v0, %v1065_v32  ;;  %v1185_v50 = vadd.f32 %v1176_v47, %v1067_v33  ;;  %v1137_v41 = vpop.f32.mrb[21].mxu0  ;;  %v1178_v19 = vpop.f32.mrb[21].mxu1  ;;  %4690 = vmatpush1.bf16.msra.mxu0 %v9078_v9 }
 0x459   :  { %v1184_v51 = vadd.f32 %v1137_v41, %v1066_v36  ;;  %v1186_v52 = vadd.f32 %v1178_v19, %v1068_v34  ;;  %v1139_v55 = vpop.f32.mrb[22].mxu0  ;;  %v1180_v56 = vpop.f32.mrb[22].mxu1  ;;  %4691 = vmatprep.subr.bf16.mxu0 %v9086_v3 }
 0x45a   :  { %v1140_v20 = vpop.f32.mrb[23].mxu0  ;;  %v1181_v45 = vpop.f32.mrb[23].mxu1 }
 0x45c   :  { %4692 = vmatpush1.bf16.msra.mxu0 %v9084_v46 }
 0x45f   :  { %v1253_v15 = vpop.f32.mrb[24].mxu0  ;;  %v1294_v5 = vpop.f32.mrb[24].mxu1 }
 0x460   :  { %v1301_v6 = vadd.f32 %v1253_v15, %v1183_v48  ;;  %v1303_v49 = vadd.f32 %v1294_v5, %v1185_v50  ;;  %v1255_v8 = vpop.f32.mrb[25].mxu0  ;;  %v1296_v24 = vpop.f32.mrb[25].mxu1 }
 0x461   :  { %v1302_v10 = vadd.f32 %v1255_v8, %v1184_v51  ;;  %v1304_v12 = vadd.f32 %v1296_v24, %v1186_v52  ;;  %v1257_v13 = vpop.f32.mrb[26].mxu0  ;;  %v1298_v53 = vpop.f32.mrb[26].mxu1  ;;  %v9089_v8 = vld [vmem:[#allocation7 + $0x2ac] ss:$24 sps:$4 sm:$0xff]  }
 0x462   :  { %v1258_v17 = vpop.f32.mrb[27].mxu0  ;;  %v1299_v14 = vpop.f32.mrb[27].mxu1  ;;  %4773 = vmatprep.subr.bf16.mxu1 %v9089_v8  ;;  %v9090_v13 = vld [vmem:[#allocation7 + $0x2d0] ss:$24 sps:$4 sm:$0xff]   ;;  %v9095_v53 = vld [vmem:[#allocation7 + $0x2dc] ss:$24 sps:$4 sm:$0xff]  }
 0x463   :  { %v9093_v17 = vld [vmem:[#allocation7 + $0x2d8] ss:$24 sps:$4 sm:$0xff]   ;;  %v9098_v14 = vld [vmem:[#allocation7 + $0x304] ss:$24 sps:$4 sm:$0xff]  }
 0x467   :  { %v1371_v30 = vpop.f32.mrb[28].mxu0  ;;  %v1412_v29 = vpop.f32.mrb[28].mxu1 }
 0x468   :  { %v1419_v57 = vadd.f32 %v1371_v30, %v1301_v6  ;;  %v1421_v32 = vadd.f32 %v1412_v29, %v1303_v49  ;;  %v1373_v33 = vpop.f32.mrb[29].mxu0  ;;  %v1414_v31 = vpop.f32.mrb[29].mxu1  ;;  %v9087_v49 = vld [vmem:[#allocation7 + $0x2a8] ss:$24 sps:$4 sm:$0xff]  }
 0x469   :  { %v1420_v35 = vadd.f32 %v1373_v33, %v1302_v10  ;;  %v1422_v36 = vadd.f32 %v1414_v31, %v1304_v12  ;;  %v1375_v34 = vpop.f32.mrb[30].mxu0  ;;  %v1416_v58 = vpop.f32.mrb[30].mxu1  ;;  %v9092_v12 = vld [vmem:[#allocation7 + $0x2d4] ss:$24 sps:$4 sm:$0xff]   ;;  %4774 = vmatpush1.bf16.msra.mxu1 %v9087_v49 }
 0x46a   :  { %v1376_v40 = vpop.f32.mrb[31].mxu0  ;;  %v1417_v37 = vpop.f32.mrb[31].mxu1  ;;  %4693 = vmatprep.subr.bf16.mxu0 %v9092_v12  ;;  %4775 = vmatprep.subr.bf16.mxu1 %v9095_v53 }
 0x46b   :  { %4694 = vmatpush1.bf16.msra.mxu0 %v9090_v13 }
 0x46c   :  { %4704 = vmatprep.subr.bf16.mxu0 %v9098_v14 }
 0x46d   :  { %4776 = vmatpush1.bf16.msra.mxu1 %v9093_v17 }
 0x46e   :  { %4786 = vmatprep.subr.bf16.mxu1 %v9101_v7 }
 0x46f   :  { %v1489_v38 = vpop.f32.mrb[32].mxu0  ;;  %v1530_v0 = vpop.f32.mrb[32].mxu1 }
 0x470   :  { %v1537_v47 = vadd.f32 %v1489_v38, %v1419_v57  ;;  %v1539_v48 = vadd.f32 %v1530_v0, %v1421_v32  ;;  %v1491_v50 = vpop.f32.mrb[33].mxu0  ;;  %v1532_v41 = vpop.f32.mrb[33].mxu1 }
 0x471   :  { %v1538_v19 = vadd.f32 %v1491_v50, %v1420_v35  ;;  %v1540_v51 = vadd.f32 %v1532_v41, %v1422_v36  ;;  %v1493_v52 = vpop.f32.mrb[34].mxu0  ;;  %v1534_v55 = vpop.f32.mrb[34].mxu1 }
 0x472   :  { %v1494_v56 = vpop.f32.mrb[35].mxu0  ;;  %v1535_v20 = vpop.f32.mrb[35].mxu1 }
 0x477   :  { %v1612_v45 = vpop.f32.mrb[36].mxu0  ;;  %v1653_v60 = vpop.f32.mrb[36].mxu1 }
 0x478   :  { %v1660_v61 = vadd.f32 %v1612_v45, %v1537_v47  ;;  %v1662_v62 = vadd.f32 %v1653_v60, %v1539_v48  ;;  %v1614_v22 = vpop.f32.mrb[37].mxu0  ;;  %v1655_v2 = vpop.f32.mrb[37].mxu1 }
 0x479   :  { %v1661_v4 = vadd.f32 %v1614_v22, %v1538_v19  ;;  %v1663_v15 = vadd.f32 %v1655_v2, %v1540_v51  ;;  %v1616_v5 = vpop.f32.mrb[38].mxu0  ;;  %v1657_v6 = vpop.f32.mrb[38].mxu1 }
 0x47a   :  { %v1617_v24 = vpop.f32.mrb[39].mxu0  ;;  %v1658_v10 = vpop.f32.mrb[39].mxu1 }
 0x47f   :  { %v1729_v21 = vpop.f32.mrb[40].mxu0  ;;  %v1770_v23 = vpop.f32.mrb[40].mxu1 }
 0x480   :  { %v1777_v27 = vadd.f32 %v1729_v21, %v1660_v61  ;;  %v1779_v54 = vadd.f32 %v1770_v23, %v1662_v62  ;;  %v1731_v25 = vpop.f32.mrb[41].mxu0  ;;  %v1772_v26 = vpop.f32.mrb[41].mxu1 }
 0x481   :  { %v1778_v28 = vadd.f32 %v1731_v25, %v1661_v4  ;;  %v1780_v30 = vadd.f32 %v1772_v26, %v1663_v15  ;;  %v1733_v29 = vpop.f32.mrb[42].mxu0  ;;  %v1774_v57 = vpop.f32.mrb[42].mxu1 }
 0x482   :  { %v1734_v32 = vpop.f32.mrb[43].mxu0  ;;  %v1775_v33 = vpop.f32.mrb[43].mxu1 }
 0x487   :  { %v1847_v31 = vpop.f32.mrb[44].mxu0  ;;  %v1888_v35 = vpop.f32.mrb[44].mxu1 }
 0x488   :  { %v1895_v36 = vadd.f32 %v1847_v31, %v1777_v27  ;;  %v1897_v34 = vadd.f32 %v1888_v35, %v1779_v54  ;;  %v1849_v58 = vpop.f32.mrb[45].mxu0  ;;  %v1890_v40 = vpop.f32.mrb[45].mxu1 }
 0x489   :  { %v1896_v37 = vadd.f32 %v1849_v58, %v1778_v28  ;;  %v1898_v42 = vadd.f32 %v1890_v40, %v1780_v30  ;;  %v1851_v59 = vpop.f32.mrb[46].mxu0  ;;  %v1892_v63 = vpop.f32.mrb[46].mxu1 }
 0x48a   :  { %v1852_v11 = vpop.f32.mrb[47].mxu0  ;;  %v1893_v43 = vpop.f32.mrb[47].mxu1 }
 0x48f   :  { %v1965_v39 = vpop.f32.mrb[48].mxu0  ;;  %v2006_v9 = vpop.f32.mrb[48].mxu1 }
 0x490   :  { %v2013_v44 = vadd.f32 %v1965_v39, %v1895_v36  ;;  %v2015_v38 = vadd.f32 %v2006_v9, %v1897_v34  ;;  %v1967_v0 = vpop.f32.mrb[49].mxu0  ;;  %v2008_v47 = vpop.f32.mrb[49].mxu1 }
 0x491   :  { %v2014_v48 = vadd.f32 %v1967_v0, %v1896_v37  ;;  %v2016_v50 = vadd.f32 %v2008_v47, %v1898_v42  ;;  %v1969_v41 = vpop.f32.mrb[50].mxu0  ;;  %v2010_v19 = vpop.f32.mrb[50].mxu1 }
 0x492   :  { %v1970_v51 = vpop.f32.mrb[51].mxu0  ;;  %v2011_v52 = vpop.f32.mrb[51].mxu1 }
 0x497   :  { %v2083_v55 = vpop.f32.mrb[52].mxu0  ;;  %v2124_v56 = vpop.f32.mrb[52].mxu1 }
 0x498   :  { %v2131_v20 = vadd.f32 %v2083_v55, %v2013_v44  ;;  %v2133_v45 = vadd.f32 %v2124_v56, %v2015_v38  ;;  %v2085_v60 = vpop.f32.mrb[53].mxu0  ;;  %v2126_v61 = vpop.f32.mrb[53].mxu1 }
 0x499   :  { %v2132_v62 = vadd.f32 %v2085_v60, %v2014_v48  ;;  %v2134_v22 = vadd.f32 %v2126_v61, %v2016_v50  ;;  %v2087_v2 = vpop.f32.mrb[54].mxu0  ;;  %v2128_v46 = vpop.f32.mrb[54].mxu1 }
 0x49a   :  { %v2088_v3 = vpop.f32.mrb[55].mxu0  ;;  %v2129_v4 = vpop.f32.mrb[55].mxu1 }
 0x49f   :  { %v2201_v15 = vpop.f32.mrb[56].mxu0  ;;  %v2242_v5 = vpop.f32.mrb[56].mxu1 }
 0x4a0   :  { %v2249_v6 = vadd.f32 %v2201_v15, %v2131_v20  ;;  %v2251_v49 = vadd.f32 %v2242_v5, %v2133_v45  ;;  %v2203_v8 = vpop.f32.mrb[57].mxu0  ;;  %v2244_v24 = vpop.f32.mrb[57].mxu1 }
 0x4a1   :  { %v2250_v10 = vadd.f32 %v2203_v8, %v2132_v62  ;;  %v2252_v12 = vadd.f32 %v2244_v24, %v2134_v22  ;;  %v2205_v13 = vpop.f32.mrb[58].mxu0  ;;  %v2246_v53 = vpop.f32.mrb[58].mxu1 }
 0x4a2   :  { %v2206_v17 = vpop.f32.mrb[59].mxu0  ;;  %v2247_v14 = vpop.f32.mrb[59].mxu1 }
 0x4a7   :  { %v2319_v7 = vpop.f32.mrb[60].mxu0  ;;  %v2360_v21 = vpop.f32.mrb[60].mxu1 }
 0x4a8   :  { %v2367_v23 = vadd.f32 %v2319_v7, %v2249_v6  ;;  %v2369_v27 = vadd.f32 %v2360_v21, %v2251_v49  ;;  %v2321_v54 = vpop.f32.mrb[61].mxu0  ;;  %v2362_v25 = vpop.f32.mrb[61].mxu1 }
 0x4a9   :  { %v2368_v26 = vadd.f32 %v2321_v54, %v2250_v10  ;;  %v2370_v28 = vadd.f32 %v2362_v25, %v2252_v12  ;;  %v2323_v30 = vpop.f32.mrb[62].mxu0  ;;  %v2364_v29 = vpop.f32.mrb[62].mxu1 }
 0x4aa   :  { %v2324_v57 = vpop.f32.mrb[63].mxu0  ;;  %v2365_v32 = vpop.f32.mrb[63].mxu1 }
 0x4af   :  { %v2437_v33 = vpop.f32.mrb[64].mxu0  ;;  %v2478_v31 = vpop.f32.mrb[64].mxu1 }
 0x4b0   :  { %v2485_v35 = vadd.f32 %v2437_v33, %v2367_v23  ;;  %v2487_v36 = vadd.f32 %v2478_v31, %v2369_v27  ;;  %v2439_v34 = vpop.f32.mrb[65].mxu0  ;;  %v2480_v58 = vpop.f32.mrb[65].mxu1 }
 0x4b1   :  { %v2486_v40 = vadd.f32 %v2439_v34, %v2368_v26  ;;  %v2488_v37 = vadd.f32 %v2480_v58, %v2370_v28  ;;  %v2441_v42 = vpop.f32.mrb[66].mxu0  ;;  %v2482_v59 = vpop.f32.mrb[66].mxu1 }
 0x4b2   :  { %v2442_v63 = vpop.f32.mrb[67].mxu0  ;;  %v2483_v11 = vpop.f32.mrb[67].mxu1 }
 0x4b7   :  { %v2560_v43 = vpop.f32.mrb[68].mxu0  ;;  %v2601_v39 = vpop.f32.mrb[68].mxu1 }
 0x4b8   :  { %v2608_v9 = vadd.f32 %v2560_v43, %v2485_v35  ;;  %v2610_v44 = vadd.f32 %v2601_v39, %v2487_v36  ;;  %v2562_v38 = vpop.f32.mrb[69].mxu0  ;;  %v2603_v0 = vpop.f32.mrb[69].mxu1 }
 0x4b9   :  { %v2609_v47 = vadd.f32 %v2562_v38, %v2486_v40  ;;  %v2611_v48 = vadd.f32 %v2603_v0, %v2488_v37  ;;  %v2564_v50 = vpop.f32.mrb[70].mxu0  ;;  %v2605_v41 = vpop.f32.mrb[70].mxu1 }
 0x4ba   :  { %v2565_v19 = vpop.f32.mrb[71].mxu0  ;;  %v2606_v51 = vpop.f32.mrb[71].mxu1 }
 0x4bf   :  { %v2677_v52 = vpop.f32.mrb[72].mxu0  ;;  %v2718_v55 = vpop.f32.mrb[72].mxu1 }
 0x4c0   :  { %v2725_v56 = vadd.f32 %v2677_v52, %v2608_v9  ;;  %v2727_v20 = vadd.f32 %v2718_v55, %v2610_v44  ;;  %v2679_v45 = vpop.f32.mrb[73].mxu0  ;;  %v2720_v60 = vpop.f32.mrb[73].mxu1 }
 0x4c1   :  { %v2726_v61 = vadd.f32 %v2679_v45, %v2609_v47  ;;  %v2728_v62 = vadd.f32 %v2720_v60, %v2611_v48  ;;  %v2681_v22 = vpop.f32.mrb[74].mxu0  ;;  %v2722_v2 = vpop.f32.mrb[74].mxu1 }
 0x4c2   :  { %v2682_v46 = vpop.f32.mrb[75].mxu0  ;;  %v2723_v3 = vpop.f32.mrb[75].mxu1 }
 0x4c3   :  { %v10431_v3 = vsub.s32 2, %v10081_v16 }
 0x4c7   :  { %v2795_v4 = vpop.f32.mrb[76].mxu0  ;;  %v2836_v15 = vpop.f32.mrb[76].mxu1 }
 0x4c8   :  { %v2843_v5 = vadd.f32 %v2795_v4, %v2725_v56  ;;  %v2845_v6 = vadd.f32 %v2836_v15, %v2727_v20  ;;  %v2797_v49 = vpop.f32.mrb[77].mxu0  ;;  %v2838_v8 = vpop.f32.mrb[77].mxu1  ;;  %v3437_v4 = vld [vmem:[%s10727_s6] sm:$0xf]  ;;  %v10437_v15 = vsub.s32 1, %v10081_v16 }
 0x4c9   :  { %v2844_v24 = vadd.f32 %v2797_v49, %v2726_v61  ;;  %v2846_v10 = vadd.f32 %v2838_v8, %v2728_v62  ;;  %v2799_v12 = vpop.f32.mrb[78].mxu0  ;;  %v2840_v13 = vpop.f32.mrb[78].mxu1  ;;  %v3450_v49 = vrot.slane %v3437_v4, %v10431_v3 }
 0x4ca   :  { %v2800_v53 = vpop.f32.mrb[79].mxu0  ;;  %v2841_v17 = vpop.f32.mrb[79].mxu1 }
 0x4cf   :  { %v2913_v14 = vpop.f32.mrb[80].mxu0  ;;  %v2954_v7 = vpop.f32.mrb[80].mxu1 }
 0x4d0   :  { %v2961_v21 = vadd.f32 %v2913_v14, %v2843_v5  ;;  %v2963_v23 = vadd.f32 %v2954_v7, %v2845_v6  ;;  %v2915_v27 = vpop.f32.mrb[81].mxu0  ;;  %v2956_v54 = vpop.f32.mrb[81].mxu1  ;;  %v10440_v5 = vsub.s32 3, %v10081_v16  ;;  %v3442_v6 = vrot.slane %v3437_v4, %v10085_v18 }
 0x4d1   :  { %v2962_v25 = vadd.f32 %v2915_v27, %v2844_v24  ;;  %v2964_v26 = vadd.f32 %v2956_v54, %v2846_v10  ;;  %v2917_v28 = vpop.f32.mrb[82].mxu0  ;;  %v2958_v30 = vpop.f32.mrb[82].mxu1  ;;  %v3446_v10 = vrot.slane %v3437_v4, %v10437_v15 }
 0x4d2   :  { %v2918_v29 = vpop.f32.mrb[83].mxu0  ;;  %v2959_v57 = vpop.f32.mrb[83].mxu1  ;;  %v3454_v12 = vrot.slane %v3437_v4, %v10440_v5  ;;  %v9138_v4 = vld [vmem:[#allocation7 + $0x450] ss:$24 sps:$4 sm:$0xff]  }
 0x4d7   :  { %v3031_v32 = vpop.f32.mrb[84].mxu0  ;;  %v3072_v33 = vpop.f32.mrb[84].mxu1 }
 0x4d8   :  { %v3079_v31 = vadd.f32 %v3031_v32, %v2961_v21  ;;  %v3081_v35 = vadd.f32 %v3072_v33, %v2963_v23  ;;  %v3033_v36 = vpop.f32.mrb[85].mxu0  ;;  %v3074_v34 = vpop.f32.mrb[85].mxu1 }
 0x4d9   :  { %v3080_v58 = vadd.f32 %v3033_v36, %v2962_v25  ;;  %v3082_v40 = vadd.f32 %v3074_v34, %v2964_v26  ;;  %v3035_v37 = vpop.f32.mrb[86].mxu0  ;;  %v3076_v42 = vpop.f32.mrb[86].mxu1  ;;  %v9096_v34 = vld [vmem:[#allocation7 + $0x300] ss:$24 sps:$4 sm:$0xff]  }
 0x4da   :  { %v3036_v59 = vpop.f32.mrb[87].mxu0  ;;  %v3077_v63 = vpop.f32.mrb[87].mxu1  ;;  %v9104_v42 = vld [vmem:[#allocation7 + $0x334] ss:$24 sps:$4 sm:$0xff]  }
 0x4db   :  { %v9107_v59 = vld [vmem:[#allocation7 + $0x33c] ss:$24 sps:$4 sm:$0xff]  }
 0x4df   :  { %v3149_v11 = vpop.f32.mrb[88].mxu0  ;;  %v3190_v43 = vpop.f32.mrb[88].mxu1 }
 0x4e0   :  { %v3197_v39 = vadd.f32 %v3149_v11, %v3079_v31  ;;  %v3199_v9 = vadd.f32 %v3190_v43, %v3081_v35  ;;  %v3151_v44 = vpop.f32.mrb[89].mxu0  ;;  %v3192_v38 = vpop.f32.mrb[89].mxu1  ;;  %v9102_v11 = vld [vmem:[#allocation7 + $0x330] ss:$24 sps:$4 sm:$0xff]  }
 0x4e1   :  { %v3198_v0 = vadd.f32 %v3151_v44, %v3080_v58  ;;  %v3200_v47 = vadd.f32 %v3192_v38, %v3082_v40  ;;  %v3153_v48 = vpop.f32.mrb[90].mxu0  ;;  %v3194_v50 = vpop.f32.mrb[90].mxu1  ;;  %v9099_v58 = vld [vmem:[#allocation7 + $0x308] ss:$24 sps:$4 sm:$0xff]   ;;  %v9105_v43 = vld [vmem:[#allocation7 + $0x338] ss:$24 sps:$4 sm:$0xff]  }
 0x4e2   :  { %v3154_v41 = vpop.f32.mrb[91].mxu0  ;;  %v3195_v19 = vpop.f32.mrb[91].mxu1  ;;  %v9108_v44 = vld [vmem:[#allocation7 + $0x360] ss:$24 sps:$4 sm:$0xff]   ;;  %v9114_v48 = vld [vmem:[#allocation7 + $0x390] ss:$24 sps:$4 sm:$0xff]  }
 0x4e3   :  { %v9111_v38 = vld [vmem:[#allocation7 + $0x368] ss:$24 sps:$4 sm:$0xff]   ;;  %v9117_v50 = vld [vmem:[#allocation7 + $0x398] ss:$24 sps:$4 sm:$0xff]   ;;  %v9122_v41 = vld [vmem:[#allocation7 + $0x3c4] ss:$24 sps:$4 sm:$0xff]  }
 0x4e4   :  { %v9125_v19 = vld [vmem:[#allocation7 + $0x3cc] ss:$24 sps:$4 sm:$0xff]  }
 0x4e7   :  { %v3267_v51 = vpop.f32.mrb[92].mxu0  ;;  %v3308_v52 = vpop.f32.mrb[92].mxu1 }
 0x4e8   :  { %v3315_v55 = vadd.f32 %v3267_v51, %v3197_v39  ;;  %v3317_v56 = vadd.f32 %v3308_v52, %v3199_v9  ;;  %v3269_v20 = vpop.f32.mrb[93].mxu0  ;;  %v3310_v45 = vpop.f32.mrb[93].mxu1  ;;  %v9110_v39 = vld [vmem:[#allocation7 + $0x364] ss:$24 sps:$4 sm:$0xff]   ;;  %v9120_v51 = vld [vmem:[#allocation7 + $0x3c0] ss:$24 sps:$4 sm:$0xff]  }
 0x4e9   :  { %v3316_v60 = vadd.f32 %v3269_v20, %v3198_v0  ;;  %v3318_v61 = vadd.f32 %v3310_v45, %v3200_v47  ;;  %v3271_v62 = vpop.f32.mrb[94].mxu0  ;;  %v3312_v22 = vpop.f32.mrb[94].mxu1  ;;  %v9113_v9 = vld [vmem:[#allocation7 + $0x36c] ss:$24 sps:$4 sm:$0xff]   ;;  %v9119_v47 = vld [vmem:[#allocation7 + $0x39c] ss:$24 sps:$4 sm:$0xff]  }
 0x4ea   :  { %v3272_v2 = vpop.f32.mrb[95].mxu0  ;;  %v3313_v46 = vpop.f32.mrb[95].mxu1  ;;  %v9116_v0 = vld [vmem:[#allocation7 + $0x394] ss:$24 sps:$4 sm:$0xff]   ;;  %v9123_v52 = vld [vmem:[#allocation7 + $0x3c8] ss:$24 sps:$4 sm:$0xff]  }
 0x4eb   :  { %v9126_v20 = vld [vmem:[#allocation7 + $0x3f0] ss:$24 sps:$4 sm:$0xff]   ;;  %v9132_v62 = vld [vmem:[#allocation7 + $0x420] ss:$24 sps:$4 sm:$0xff]   ;;  %v9140_v2 = vld [vmem:[#allocation7 + $0x454] ss:$24 sps:$4 sm:$0xff]  }
 0x4ec   :  { %v9129_v45 = vld [vmem:[#allocation7 + $0x3f8] ss:$24 sps:$4 sm:$0xff]   ;;  %v9135_v22 = vld [vmem:[#allocation7 + $0x428] ss:$24 sps:$4 sm:$0xff]   ;;  %v9143_v46 = vld [vmem:[#allocation7 + $0x45c] ss:$24 sps:$4 sm:$0xff]  }
 0x4ef   :  { %v3385_v8 = vpop.f32.mrb[96].mxu0  ;;  %v3426_v24 = vpop.f32.mrb[96].mxu1 }
 0x4f0   :  { %v3433_v13 = vadd.f32 %v3385_v8, %v3315_v55  ;;  %v3435_v53 = vadd.f32 %v3426_v24, %v3317_v56  ;;  %v3387_v17 = vpop.f32.mrb[97].mxu0  ;;  %v3428_v14 = vpop.f32.mrb[97].mxu1  ;;  %v9128_v55 = vld [vmem:[#allocation7 + $0x3f4] ss:$24 sps:$4 sm:$0xff]   ;;  %v9144_v24 = vld [vmem:[#allocation7 + $0x480] ss:$24 sps:$4 sm:$0xff]  }
 0x4f1   :  { %v3434_v7 = vadd.f32 %v3387_v17, %v3316_v60  ;;  %v3436_v21 = vadd.f32 %v3428_v14, %v3318_v61  ;;  %v3389_v23 = vpop.f32.mrb[98].mxu0  ;;  %v3430_v27 = vpop.f32.mrb[98].mxu1  ;;  %v9131_v56 = vld [vmem:[#allocation7 + $0x3fc] ss:$24 sps:$4 sm:$0xff]   ;;  %v9137_v61 = vld [vmem:[#allocation7 + $0x42c] ss:$24 sps:$4 sm:$0xff]  }
 0x4f2   :  { %v3459_v54 = vadd.f32 %v3442_v6, %v3433_v13  ;;  %v10446_v25 = vadd.f32 %v3450_v49, %v3435_v53  ;;  %v3390_v26 = vpop.f32.mrb[99].mxu0  ;;  %v3431_v28 = vpop.f32.mrb[99].mxu1  ;;  %v9134_v60 = vld [vmem:[#allocation7 + $0x424] ss:$24 sps:$4 sm:$0xff]   ;;  %v9141_v6 = vld [vmem:[#allocation7 + $0x458] ss:$24 sps:$4 sm:$0xff]  }
 0x4f3   :  { %v3460_v30 = vadd.f32 %v3446_v10, %v3434_v7  ;;  %v3462_v29 = vadd.f32 %v3454_v12, %v3436_v21  ;;  %v9146_v49 = vld [vmem:[#allocation7 + $0x484] ss:$24 sps:$4 sm:$0xff]   ;;  %v9147_v10 = vld [vmem:[#allocation7 + $0x488] ss:$24 sps:$4 sm:$0xff]   ;;  %v9152_v12 = vld [vmem:[#allocation7 + $0x4b4] ss:$24 sps:$4 sm:$0xff]  }
 0x4f4   :  { %vm3463_vm3 = vcmp.ge.f32.partialorder %v3459_v54, 0.0  ;;  %v3467_v57 = vmul.f32 0.2, %v3459_v54  ;;  %v9149_v8 = vld [vmem:[#allocation7 + $0x48c] ss:$24 sps:$4 sm:$0xff]   ;;  %vm3465_vm6 = vcmp.ge.f32.partialorder %v10446_v25, 0.0 }
 0x4f5   :  { %v3468_v32 = vmul.f32 0.2, %v3460_v30  ;;  %v3470_v33 = vmul.f32 0.2, %v3462_v29  ;;  %vm3464_vm4 = vcmp.ge.f32.partialorder %v3460_v30, 0.0  ;;  %vm3466_vm5 = vcmp.ge.f32.partialorder %v3462_v29, 0.0 }
 0x4f6   :  { %v3471_v31 = vsel %vm3463_vm3, %v3459_v54, %v3467_v57  ;;  %v9155_v13 = vld [vmem:[#allocation7 + $0x4bc] ss:$24 sps:$4 sm:$0xff]   ;;  %v9150_v53 = vld [vmem:[#allocation7 + $0x4b0] ss:$24 sps:$4 sm:$0xff]   ;;  %v9161_v7 = vld [vmem:[#allocation7 + $0x4ec] ss:$24 sps:$4 sm:$0xff]  }
 0x4f7   :  { %v3472_v35 = vsel %vm3464_vm4, %v3460_v30, %v3468_v32  ;;  %v3474_v40 = vsel %vm3466_vm5, %v3462_v29, %v3470_v33  ;;  %v10450_v37 = vpack.c.bf16 %v3471_v31, %v3471_v31  ;;  %v9153_v17 = vld [vmem:[#allocation7 + $0x4b8] ss:$24 sps:$4 sm:$0xff]   ;;  %v9158_v14 = vld [vmem:[#allocation7 + $0x4e4] ss:$24 sps:$4 sm:$0xff]   ;;  %v9159_v23 = vld [vmem:[#allocation7 + $0x4e8] ss:$24 sps:$4 sm:$0xff]  }
 0x4f8   :  { %v10448_v36 = vpack.c.bf16 %v3472_v35, %v3472_v35  ;;  %v10456_v63 = vpack.c.bf16 %v3474_v40, %v3474_v40  ;;  %v9156_v21 = vld [vmem:[#allocation7 + $0x4e0] ss:$24 sps:$4 sm:$0xff]   ;;  %v9164_v27 = vld [vmem:[#allocation7 + $0x514] ss:$24 sps:$4 sm:$0xff]   ;;  %v9162_v26 = vld [vmem:[#allocation7 + $0x510] ss:$24 sps:$4 sm:$0xff]  }
 0x4f9   :  { %v9167_v54 = vld [vmem:[#allocation7 + $0x51c] ss:$24 sps:$4 sm:$0xff]   ;;  %v9165_v28 = vld [vmem:[#allocation7 + $0x518] ss:$24 sps:$4 sm:$0xff]   ;;  %v9173_v29 = vld [vmem:[#allocation7 + $0x54c] ss:$24 sps:$4 sm:$0xff]  }
 0x4fa   :  { %4695 = vmatprep.mubr.bf16.mxu0 %v10448_v36  ;;  %4777 = vmatprep.mubr.bf16.mxu1 %v10448_v36  ;;  %v9170_v30 = vld [vmem:[#allocation7 + $0x544] ss:$24 sps:$4 sm:$0xff]   ;;  %v9168_v57 = vld [vmem:[#allocation7 + $0x540] ss:$24 sps:$4 sm:$0xff]   ;;  %v9176_v33 = vld [vmem:[#allocation7 + $0x574] ss:$24 sps:$4 sm:$0xff]  }
 0x4fb   :  { %4696 = vmatmul.mubr.bf16.vlgmr.msra.gmra.mrb[100].mxu0 %v10450_v37  ;;  %4778 = vmatmul.mubr.bf16.vlgmr.msra.gmra.mrb[100].mxu1 %v10450_v37  ;;  %v9171_v32 = vld [vmem:[#allocation7 + $0x548] ss:$24 sps:$4 sm:$0xff]   ;;  %v9179_v31 = vld [vmem:[#allocation7 + $0x57c] ss:$24 sps:$4 sm:$0xff]   ;;  %v9185_v40 = vld [vmem:[#allocation7 + $0x5ac] ss:$24 sps:$4 sm:$0xff]  }
 0x4fc   :  { %4705 = vmatpush1.bf16.msra.mxu0 %v9096_v34  ;;  %4787 = vmatpush1.bf16.msra.mxu1 %v9099_v58  ;;  %v9174_v35 = vld [vmem:[#allocation7 + $0x570] ss:$24 sps:$4 sm:$0xff]   ;;  %v9182_v58 = vld [vmem:[#allocation7 + $0x5a4] ss:$24 sps:$4 sm:$0xff]  }
 0x4fd   :  { %4736 = vmatprep.mubr.bf16.mxu0 %v10456_v63  ;;  %4818 = vmatprep.mubr.bf16.mxu1 %v10456_v63  ;;  %v9177_v34 = vld [vmem:[#allocation7 + $0x578] ss:$24 sps:$4 sm:$0xff]  }
 0x4fe   :  { %4706 = vmatprep.subr.bf16.mxu0 %v9104_v42  ;;  %4788 = vmatprep.subr.bf16.mxu1 %v9107_v59  ;;  %v9180_v42 = vld [vmem:[#allocation7 + $0x5a0] ss:$24 sps:$4 sm:$0xff]  }
 0x4ff   :  { %v9183_v59 = vld [vmem:[#allocation7 + $0x5a8] ss:$24 sps:$4 sm:$0xff]  }
 0x500   :  { %4707 = vmatpush1.bf16.msra.mxu0 %v9102_v11  ;;  %4789 = vmatpush1.bf16.msra.mxu1 %v9105_v43  ;;  %v9188_v11 = vld [vmem:[#allocation7 + $0x5d4] ss:$24 sps:$4 sm:$0xff]  }
 0x501   :  { %4708 = vmatprep.subr.bf16.mxu0 %v9110_v39  ;;  %4790 = vmatprep.subr.bf16.mxu1 %v9113_v9  ;;  %v9191_v43 = vld [vmem:[#allocation7 + $0x5dc] ss:$24 sps:$4 sm:$0xff]   ;;  %v3469_v39 = vmul.f32 0.2, %v10446_v25  ;;  %v9186_v9 = vld [vmem:[#allocation7 + $0x5d0] ss:$24 sps:$4 sm:$0xff]  }
 0x504   :  { %4709 = vmatpush1.bf16.msra.mxu0 %v9108_v44  ;;  %4791 = vmatpush1.bf16.msra.mxu1 %v9111_v38  ;;  %v9189_v44 = vld [vmem:[#allocation7 + $0x5d8] ss:$24 sps:$4 sm:$0xff]   ;;  %v9194_v38 = vld [vmem:[#allocation7 + $0x14] ss:$24 sps:$4 sm:$0xff]  }
 0x505   :  { %4710 = vmatprep.subr.bf16.mxu0 %v9116_v0  ;;  %4792 = vmatprep.subr.bf16.mxu1 %v9119_v47  ;;  %v3473_v0 = vsel %vm3465_vm6, %v10446_v25, %v3469_v39  ;;  %v9192_v47 = vld [vmem:[#allocation7 + $0x10] ss:$24 sps:$4 sm:$0xff]   ;;  %v9267_v39 = vld [vmem:[#allocation7 + $0x4c0] ss:$24 sps:$4 sm:$0xff]  }
 0x506   :  { %v9198_v25 = vld [vmem:[#allocation7 + $0x70] ss:$24 sps:$4 sm:$0xff]  }
 0x508   :  { %4711 = vmatpush1.bf16.msra.mxu0 %v9114_v48  ;;  %4793 = vmatpush1.bf16.msra.mxu1 %v9117_v50  ;;  %v10463_v48 = vpack.c.bf16 %v3473_v0, %v3473_v0  ;;  %v9197_v50 = vld [vmem:[#allocation7 + $0x44] ss:$24 sps:$4 sm:$0xff]   ;;  %v9270_v0 = vld [vmem:[#allocation7 + $0x4f0] ss:$24 sps:$4 sm:$0xff]  }
 0x509   :  { %4712 = vmatprep.subr.bf16.mxu0 %v9122_v41  ;;  %4794 = vmatprep.subr.bf16.mxu1 %v9125_v19  ;;  %v9288_v41 = vld [vmem:[#allocation9] ss:$16 sps:$4 sm:$0xff]   ;;  %v9290_v19 = vld [vmem:[#allocation9 + $0x4] ss:$16 sps:$4 sm:$0xff]  }
 0x50c   :  { %4713 = vmatpush1.bf16.msra.mxu0 %v9120_v51  ;;  %4795 = vmatpush1.bf16.msra.mxu1 %v9123_v52  ;;  %v9195_v51 = vld [vmem:[#allocation7 + $0x40] ss:$24 sps:$4 sm:$0xff]   ;;  %v9200_v52 = vld [vmem:[#allocation7 + $0x74] ss:$24 sps:$4 sm:$0xff]  }
 0x50d   :  { %4714 = vmatprep.subr.bf16.mxu0 %v9128_v55  ;;  %4796 = vmatprep.subr.bf16.mxu1 %v9131_v56  ;;  %v9203_v55 = vld [vmem:[#allocation7 + $0xa4] ss:$24 sps:$4 sm:$0xff]   ;;  %v9201_v56 = vld [vmem:[#allocation7 + $0xa0] ss:$24 sps:$4 sm:$0xff]  }
 0x510   :  { %4715 = vmatpush1.bf16.msra.mxu0 %v9126_v20  ;;  %4797 = vmatpush1.bf16.msra.mxu1 %v9129_v45  ;;  %v9206_v20 = vld [vmem:[#allocation7 + $0xd4] ss:$24 sps:$4 sm:$0xff]   ;;  %v9204_v45 = vld [vmem:[#allocation7 + $0xd0] ss:$24 sps:$4 sm:$0xff]  }
 0x511   :  { %4716 = vmatprep.subr.bf16.mxu0 %v9134_v60  ;;  %4798 = vmatprep.subr.bf16.mxu1 %v9137_v61  ;;  %v9209_v60 = vld [vmem:[#allocation7 + $0x104] ss:$24 sps:$4 sm:$0xff]   ;;  %v9207_v61 = vld [vmem:[#allocation7 + $0x100] ss:$24 sps:$4 sm:$0xff]  }
 0x514   :  { %4717 = vmatpush1.bf16.msra.mxu0 %v9132_v62  ;;  %4799 = vmatpush1.bf16.msra.mxu1 %v9135_v22  ;;  %v9210_v62 = vld [vmem:[#allocation7 + $0x130] ss:$24 sps:$4 sm:$0xff]   ;;  %v9215_v22 = vld [vmem:[#allocation7 + $0x164] ss:$24 sps:$4 sm:$0xff]  }
 0x515   :  { %4718 = vmatprep.subr.bf16.mxu0 %v9140_v2  ;;  %4800 = vmatprep.subr.bf16.mxu1 %v9143_v46  ;;  %v9213_v2 = vld [vmem:[#allocation7 + $0x160] ss:$24 sps:$4 sm:$0xff]   ;;  %v9218_v46 = vld [vmem:[#allocation7 + $0x194] ss:$24 sps:$4 sm:$0xff]  }
 0x518   :  { %4719 = vmatpush1.bf16.msra.mxu0 %v9138_v4  ;;  %4801 = vmatpush1.bf16.msra.mxu1 %v9141_v6  ;;  %v9216_v4 = vld [vmem:[#allocation7 + $0x190] ss:$24 sps:$4 sm:$0xff]   ;;  %v9221_v6 = vld [vmem:[#allocation7 + $0x1c4] ss:$24 sps:$4 sm:$0xff]  }
 0x519   :  { %4720 = vmatprep.subr.bf16.mxu0 %v9146_v49  ;;  %4802 = vmatprep.subr.bf16.mxu1 %v9149_v8  ;;  %v9219_v49 = vld [vmem:[#allocation7 + $0x1c0] ss:$24 sps:$4 sm:$0xff]   ;;  %v9224_v8 = vld [vmem:[#allocation7 + $0x1f4] ss:$24 sps:$4 sm:$0xff]  }
 0x51c   :  { %4721 = vmatpush1.bf16.msra.mxu0 %v9144_v24  ;;  %4803 = vmatpush1.bf16.msra.mxu1 %v9147_v10  ;;  %v9222_v24 = vld [vmem:[#allocation7 + $0x1f0] ss:$24 sps:$4 sm:$0xff]   ;;  %v9227_v10 = vld [vmem:[#allocation7 + $0x224] ss:$24 sps:$4 sm:$0xff]  }
 0x51d   :  { %4722 = vmatprep.subr.bf16.mxu0 %v9152_v12  ;;  %4804 = vmatprep.subr.bf16.mxu1 %v9155_v13  ;;  %v9225_v12 = vld [vmem:[#allocation7 + $0x220] ss:$24 sps:$4 sm:$0xff]   ;;  %v9230_v13 = vld [vmem:[#allocation7 + $0x254] ss:$24 sps:$4 sm:$0xff]  }
 0x520   :  { %4723 = vmatpush1.bf16.msra.mxu0 %v9150_v53  ;;  %4805 = vmatpush1.bf16.msra.mxu1 %v9153_v17  ;;  %v9228_v53 = vld [vmem:[#allocation7 + $0x250] ss:$24 sps:$4 sm:$0xff]   ;;  %v9233_v17 = vld [vmem:[#allocation7 + $0x284] ss:$24 sps:$4 sm:$0xff]  }
 0x521   :  { %4724 = vmatprep.subr.bf16.mxu0 %v9158_v14  ;;  %4806 = vmatprep.subr.bf16.mxu1 %v9161_v7  ;;  %v9231_v14 = vld [vmem:[#allocation7 + $0x280] ss:$24 sps:$4 sm:$0xff]   ;;  %v9236_v7 = vld [vmem:[#allocation7 + $0x2b4] ss:$24 sps:$4 sm:$0xff]  }
 0x524   :  { %4725 = vmatpush1.bf16.msra.mxu0 %v9156_v21  ;;  %4807 = vmatpush1.bf16.msra.mxu1 %v9159_v23  ;;  %v9234_v21 = vld [vmem:[#allocation7 + $0x2b0] ss:$24 sps:$4 sm:$0xff]   ;;  %v9239_v23 = vld [vmem:[#allocation7 + $0x2e4] ss:$24 sps:$4 sm:$0xff]  }
 0x525   :  { %4726 = vmatprep.subr.bf16.mxu0 %v9164_v27  ;;  %4808 = vmatprep.subr.bf16.mxu1 %v9167_v54  ;;  %v9237_v27 = vld [vmem:[#allocation7 + $0x2e0] ss:$24 sps:$4 sm:$0xff]   ;;  %v9242_v54 = vld [vmem:[#allocation7 + $0x314] ss:$24 sps:$4 sm:$0xff]  }
 0x528   :  { %4727 = vmatpush1.bf16.msra.mxu0 %v9162_v26  ;;  %4809 = vmatpush1.bf16.msra.mxu1 %v9165_v28  ;;  %v9240_v26 = vld [vmem:[#allocation7 + $0x310] ss:$24 sps:$4 sm:$0xff]   ;;  %v9245_v28 = vld [vmem:[#allocation7 + $0x344] ss:$24 sps:$4 sm:$0xff]  }
 0x529   :  { %4728 = vmatprep.subr.bf16.mxu0 %v9170_v30  ;;  %4810 = vmatprep.subr.bf16.mxu1 %v9173_v29  ;;  %v9243_v30 = vld [vmem:[#allocation7 + $0x340] ss:$24 sps:$4 sm:$0xff]   ;;  %v9248_v29 = vld [vmem:[#allocation7 + $0x374] ss:$24 sps:$4 sm:$0xff]  }
 0x52c   :  { %4729 = vmatpush1.bf16.msra.mxu0 %v9168_v57  ;;  %4811 = vmatpush1.bf16.msra.mxu1 %v9171_v32  ;;  %v9246_v57 = vld [vmem:[#allocation7 + $0x370] ss:$24 sps:$4 sm:$0xff]   ;;  %v9251_v32 = vld [vmem:[#allocation7 + $0x3a4] ss:$24 sps:$4 sm:$0xff]  }
 0x52d   :  { %4730 = vmatprep.subr.bf16.mxu0 %v9176_v33  ;;  %4812 = vmatprep.subr.bf16.mxu1 %v9179_v31  ;;  %v9249_v33 = vld [vmem:[#allocation7 + $0x3a0] ss:$24 sps:$4 sm:$0xff]   ;;  %v9254_v31 = vld [vmem:[#allocation7 + $0x3d4] ss:$24 sps:$4 sm:$0xff]  }
 0x530   :  { %4731 = vmatpush1.bf16.msra.mxu0 %v9174_v35  ;;  %4813 = vmatpush1.bf16.msra.mxu1 %v9177_v34  ;;  %v9252_v35 = vld [vmem:[#allocation7 + $0x3d0] ss:$24 sps:$4 sm:$0xff]   ;;  %v9257_v34 = vld [vmem:[#allocation7 + $0x404] ss:$24 sps:$4 sm:$0xff]  }
 0x531   :  { %4732 = vmatprep.subr.bf16.mxu0 %v9182_v58  ;;  %4814 = vmatprep.subr.bf16.mxu1 %v9185_v40  ;;  %v9260_v58 = vld [vmem:[#allocation7 + $0x434] ss:$24 sps:$4 sm:$0xff]   ;;  %v9263_v40 = vld [vmem:[#allocation7 + $0x464] ss:$24 sps:$4 sm:$0xff]  }
 0x534   :  { %4733 = vmatpush1.bf16.msra.mxu0 %v9180_v42  ;;  %4815 = vmatpush1.bf16.msra.mxu1 %v9183_v59  ;;  %v9261_v42 = vld [vmem:[#allocation7 + $0x460] ss:$24 sps:$4 sm:$0xff]   ;;  %v9266_v59 = vld [vmem:[#allocation7 + $0x494] ss:$24 sps:$4 sm:$0xff]  }
 0x535   :  { %4734 = vmatprep.subr.bf16.mxu0 %v9188_v11  ;;  %4816 = vmatprep.subr.bf16.mxu1 %v9191_v43  ;;  %v9264_v11 = vld [vmem:[#allocation7 + $0x490] ss:$24 sps:$4 sm:$0xff]   ;;  %v9269_v43 = vld [vmem:[#allocation7 + $0x4c4] ss:$24 sps:$4 sm:$0xff]  }
 0x538   :  { %4735 = vmatpush1.bf16.msra.mxu0 %v9186_v9  ;;  %4817 = vmatpush1.bf16.msra.mxu1 %v9189_v44  ;;  %v9296_v9 = vld [vmem:[#allocation9 + $0x24] ss:$16 sps:$4 sm:$0xff]  }
 0x539   :  { %4827 = vmatprep.subr.bf16.mxu0 %v9194_v38  ;;  %6311 = vmatprep.subr.bf16.mxu1 %v9290_v19  ;;  %v9272_v44 = vld [vmem:[#allocation7 + $0x4f4] ss:$24 sps:$4 sm:$0xff]   ;;  %v9294_v38 = vld [vmem:[#allocation9 + $0x20] ss:$16 sps:$4 sm:$0xff]  }
 0x53a   :  { %v9273_v19 = vld [vmem:[#allocation7 + $0x520] ss:$24 sps:$4 sm:$0xff]  }
 0x53b   :  { %4737 = vmatmul.mubr.bf16.vlgmr.msra.gmra.mrb[100].mxu0 %v10463_v48  ;;  %4819 = vmatmul.mubr.bf16.vlgmr.msra.gmra.mrb[100].mxu1 %v10463_v48 }
 0x53c   :  { %4828 = vmatpush1.bf16.msra.mxu0 %v9192_v47  ;;  %4859 = vmatprep.mubr.bf16.mxu0 %v10448_v36  ;;  %v9212_v36 = vld [vmem:[#allocation7 + $0x134] ss:$24 sps:$4 sm:$0xff]  }
 0x53d   :  { %4829 = vmatprep.subr.bf16.mxu0 %v9197_v50  ;;  %6312 = vmatpush1.bf16.msra.mxu1 %v9288_v41  ;;  %v9302_v47 = vld [vmem:[#allocation9 + $0x44] ss:$16 sps:$4 sm:$0xff]   ;;  %v9300_v41 = vld [vmem:[#allocation9 + $0x40] ss:$16 sps:$4 sm:$0xff]  }
 0x53e   :  { %6313 = vmatprep.subr.bf16.mxu1 %v9296_v9  ;;  %v9275_v50 = vld [vmem:[#allocation7 + $0x524] ss:$24 sps:$4 sm:$0xff]  }
 0x53f   :  { %v9386_v9 = vld [vmem:[#allocation9 + $0x204] ss:$16 sps:$4 sm:$0xff]  }
 0x540   :  { %4830 = vmatpush1.bf16.msra.mxu0 %v9195_v51  ;;  %v9308_v51 = vld [vmem:[#allocation9 + $0x64] ss:$16 sps:$4 sm:$0xff]  }
 0x541   :  { %4831 = vmatprep.subr.bf16.mxu0 %v9200_v52  ;;  %6314 = vmatpush1.bf16.msra.mxu1 %v9294_v38  ;;  %v9278_v52 = vld [vmem:[#allocation7 + $0x554] ss:$24 sps:$4 sm:$0xff]   ;;  %v9339_v38 = vld [vmem:[#allocation9 + $0x108] ss:$16 sps:$4 sm:$0xff]  }
 0x542   :  { %6315 = vmatprep.subr.bf16.mxu1 %v9302_v47  ;;  %v9345_v47 = vld [vmem:[#allocation9 + $0x128] ss:$16 sps:$4 sm:$0xff]  }
 0x544   :  { %4832 = vmatpush1.bf16.msra.mxu0 %v9198_v25  ;;  %v9306_v25 = vld [vmem:[#allocation9 + $0x60] ss:$16 sps:$4 sm:$0xff]  }
 0x545   :  { %4833 = vmatprep.subr.bf16.mxu0 %v9203_v55  ;;  %6316 = vmatpush1.bf16.msra.mxu1 %v9300_v41  ;;  %v9276_v55 = vld [vmem:[#allocation7 + $0x550] ss:$24 sps:$4 sm:$0xff]  }
 0x546   :  { %6317 = vmatprep.subr.bf16.mxu1 %v9308_v51  ;;  %v9351_v41 = vld [vmem:[#allocation9 + $0x148] ss:$16 sps:$4 sm:$0xff]  }
 0x547   :  { %v9357_v51 = vld [vmem:[#allocation9 + $0x168] ss:$16 sps:$4 sm:$0xff]  }
 0x548   :  { %4834 = vmatpush1.bf16.msra.mxu0 %v9201_v56  ;;  %v9314_v56 = vld [vmem:[#allocation9 + $0x84] ss:$16 sps:$4 sm:$0xff]  }
 0x549   :  { %4835 = vmatprep.subr.bf16.mxu0 %v9206_v20  ;;  %6318 = vmatpush1.bf16.msra.mxu1 %v9306_v25  ;;  %v9281_v20 = vld [vmem:[#allocation7 + $0x584] ss:$24 sps:$4 sm:$0xff]   ;;  %v9363_v25 = vld [vmem:[#allocation9 + $0x188] ss:$16 sps:$4 sm:$0xff]  }
 0x54a   :  { %6319 = vmatprep.subr.bf16.mxu1 %v9314_v56  ;;  %v9369_v56 = vld [vmem:[#allocation9 + $0x1a8] ss:$16 sps:$4 sm:$0xff]  }
 0x54c   :  { %4836 = vmatpush1.bf16.msra.mxu0 %v9204_v45  ;;  %v9312_v45 = vld [vmem:[#allocation9 + $0x80] ss:$16 sps:$4 sm:$0xff]  }
 0x54d   :  { %4837 = vmatprep.subr.bf16.mxu0 %v9209_v60  ;;  %6320 = vmatpush1.bf16.msra.mxu1 %v9312_v45  ;;  %v9279_v60 = vld [vmem:[#allocation7 + $0x580] ss:$24 sps:$4 sm:$0xff]  }
 0x54e   :  { %v9375_v45 = vld [vmem:[#allocation9 + $0x1c8] ss:$16 sps:$4 sm:$0xff]  }
 0x550   :  { %4838 = vmatpush1.bf16.msra.mxu0 %v9207_v61  ;;  %v9320_v61 = vld [vmem:[#allocation9 + $0xa4] ss:$16 sps:$4 sm:$0xff]  }
 0x551   :  { %4839 = vmatprep.subr.bf16.mxu0 %v9212_v36  ;;  %v9284_v36 = vld [vmem:[#allocation7 + $0x5b4] ss:$24 sps:$4 sm:$0xff]   ;;  %6321 = vmatprep.subr.bf16.mxu1 %v9320_v61  ;;  %v9381_v61 = vld [vmem:[#allocation9 + $0x1e8] ss:$16 sps:$4 sm:$0xff]  }
 0x554   :  { %4840 = vmatpush1.bf16.msra.mxu0 %v9210_v62  ;;  %v9318_v62 = vld [vmem:[#allocation9 + $0xa0] ss:$16 sps:$4 sm:$0xff]  }
 0x555   :  { %4841 = vmatprep.subr.bf16.mxu0 %v9215_v22  ;;  %6322 = vmatpush1.bf16.msra.mxu1 %v9318_v62  ;;  %v9282_v22 = vld [vmem:[#allocation7 + $0x5b0] ss:$24 sps:$4 sm:$0xff]   ;;  %v10474_v62 = vld [vmem:[%s10729_s8] sm:$0x3f] }
 0x558   :  { %4842 = vmatpush1.bf16.msra.mxu0 %v9213_v2  ;;  %v9326_v2 = vld [vmem:[#allocation9 + $0xc4] ss:$16 sps:$4 sm:$0xff]  }
 0x559   :  { %4843 = vmatprep.subr.bf16.mxu0 %v9218_v46  ;;  %v9287_v46 = vld [vmem:[#allocation7 + $0x5e4] ss:$24 sps:$4 sm:$0xff]   ;;  %6323 = vmatprep.subr.bf16.mxu1 %v9326_v2  ;;  %v3680_v2 = vrot.slane %v10474_v62, %v10437_v15 }
 0x55c   :  { %4844 = vmatpush1.bf16.msra.mxu0 %v9216_v4  ;;  %v9324_v4 = vld [vmem:[#allocation9 + $0xc0] ss:$16 sps:$4 sm:$0xff]  }
 0x55d   :  { %4845 = vmatprep.subr.bf16.mxu0 %v9221_v6  ;;  %6324 = vmatpush1.bf16.msra.mxu1 %v9324_v4  ;;  %v9285_v6 = vld [vmem:[#allocation7 + $0x5e0] ss:$24 sps:$4 sm:$0xff]  }
 0x560   :  { %4846 = vmatpush1.bf16.msra.mxu0 %v9219_v49  ;;  %v9332_v49 = vld [vmem:[#allocation9 + $0xe4] ss:$16 sps:$4 sm:$0xff]  }
 0x561   :  { %4847 = vmatprep.subr.bf16.mxu0 %v9224_v8  ;;  %v9293_v8 = vld [vmem:[#allocation9 + $0xc] ss:$16 sps:$4 sm:$0xff]   ;;  %6325 = vmatprep.subr.bf16.mxu1 %v9332_v49 }
 0x564   :  { %4848 = vmatpush1.bf16.msra.mxu0 %v9222_v24  ;;  %v9330_v24 = vld [vmem:[#allocation9 + $0xe0] ss:$16 sps:$4 sm:$0xff]  }
 0x565   :  { %4849 = vmatprep.subr.bf16.mxu0 %v9227_v10  ;;  %6326 = vmatpush1.bf16.msra.mxu1 %v9330_v24  ;;  %v9291_v10 = vld [vmem:[#allocation9 + $0x8] ss:$16 sps:$4 sm:$0xff]  }
 0x568   :  { %4850 = vmatpush1.bf16.msra.mxu0 %v9225_v12  ;;  %v9338_v12 = vld [vmem:[#allocation9 + $0x104] ss:$16 sps:$4 sm:$0xff]  }
 0x569   :  { %4851 = vmatprep.subr.bf16.mxu0 %v9230_v13  ;;  %v9299_v13 = vld [vmem:[#allocation9 + $0x2c] ss:$16 sps:$4 sm:$0xff]   ;;  %6327 = vmatprep.subr.bf16.mxu1 %v9338_v12 }
 0x56c   :  { %4852 = vmatpush1.bf16.msra.mxu0 %v9228_v53  ;;  %v9336_v53 = vld [vmem:[#allocation9 + $0x100] ss:$16 sps:$4 sm:$0xff]  }
 0x56d   :  { %4853 = vmatprep.subr.bf16.mxu0 %v9233_v17  ;;  %6328 = vmatpush1.bf16.msra.mxu1 %v9336_v53  ;;  %v9297_v17 = vld [vmem:[#allocation9 + $0x28] ss:$16 sps:$4 sm:$0xff]  }
 0x570   :  { %4854 = vmatpush1.bf16.msra.mxu0 %v9231_v14  ;;  %v9344_v14 = vld [vmem:[#allocation9 + $0x124] ss:$16 sps:$4 sm:$0xff]  }
 0x571   :  { %4855 = vmatprep.subr.bf16.mxu0 %v9236_v7  ;;  %v9305_v7 = vld [vmem:[#allocation9 + $0x4c] ss:$16 sps:$4 sm:$0xff]   ;;  %6329 = vmatprep.subr.bf16.mxu1 %v9344_v14 }
 0x574   :  { %4856 = vmatpush1.bf16.msra.mxu0 %v9234_v21  ;;  %v9342_v21 = vld [vmem:[#allocation9 + $0x120] ss:$16 sps:$4 sm:$0xff]  }
 0x575   :  { %4857 = vmatprep.subr.bf16.mxu0 %v9239_v23  ;;  %6330 = vmatpush1.bf16.msra.mxu1 %v9342_v21  ;;  %v9303_v23 = vld [vmem:[#allocation9 + $0x48] ss:$16 sps:$4 sm:$0xff]  }
 0x578   :  { %4858 = vmatpush1.bf16.msra.mxu0 %v9237_v27  ;;  %v9350_v27 = vld [vmem:[#allocation9 + $0x144] ss:$16 sps:$4 sm:$0xff]  }
 0x579   :  { %4868 = vmatprep.subr.bf16.mxu0 %v9242_v54  ;;  %v9311_v54 = vld [vmem:[#allocation9 + $0x6c] ss:$16 sps:$4 sm:$0xff]   ;;  %6331 = vmatprep.subr.bf16.mxu1 %v9350_v27 }
 0x57b   :  { %4860 = vmatmul.mubr.bf16.vlgmr.msra.gmra.mrb[104].mxu0 %v10450_v37  ;;  %v9255_v37 = vld [vmem:[#allocation7 + $0x400] ss:$24 sps:$4 sm:$0xff]  }
 0x57c   :  { %4869 = vmatpush1.bf16.msra.mxu0 %v9240_v26  ;;  %4900 = vmatprep.mubr.bf16.mxu0 %v10456_v63  ;;  %v9258_v63 = vld [vmem:[#allocation7 + $0x430] ss:$24 sps:$4 sm:$0xff]  }
 0x57d   :  { %4870 = vmatprep.subr.bf16.mxu0 %v9245_v28  ;;  %v9348_v26 = vld [vmem:[#allocation9 + $0x140] ss:$16 sps:$4 sm:$0xff]   ;;  %v9309_v28 = vld [vmem:[#allocation9 + $0x68] ss:$16 sps:$4 sm:$0xff]  }
 0x57e   :  { %6332 = vmatpush1.bf16.msra.mxu1 %v9348_v26 }
 0x580   :  { %4871 = vmatpush1.bf16.msra.mxu0 %v9243_v30  ;;  %v9317_v30 = vld [vmem:[#allocation9 + $0x8c] ss:$16 sps:$4 sm:$0xff]  }
 0x581   :  { %4872 = vmatprep.subr.bf16.mxu0 %v9248_v29  ;;  %v9354_v29 = vld [vmem:[#allocation9 + $0x160] ss:$16 sps:$4 sm:$0xff]  }
 0x584   :  { %4873 = vmatpush1.bf16.msra.mxu0 %v9246_v57  ;;  %v9360_v57 = vld [vmem:[#allocation9 + $0x180] ss:$16 sps:$4 sm:$0xff]  }
 0x585   :  { %4874 = vmatprep.subr.bf16.mxu0 %v9251_v32  ;;  %v9362_v32 = vld [vmem:[#allocation9 + $0x184] ss:$16 sps:$4 sm:$0xff]  }
 0x588   :  { %4875 = vmatpush1.bf16.msra.mxu0 %v9249_v33  ;;  %v9315_v33 = vld [vmem:[#allocation9 + $0x88] ss:$16 sps:$4 sm:$0xff]  }
 0x589   :  { %4876 = vmatprep.subr.bf16.mxu0 %v9254_v31  ;;  %v9368_v31 = vld [vmem:[#allocation9 + $0x1a4] ss:$16 sps:$4 sm:$0xff]  }
 0x58c   :  { %4877 = vmatpush1.bf16.msra.mxu0 %v9252_v35  ;;  %v9323_v35 = vld [vmem:[#allocation9 + $0xac] ss:$16 sps:$4 sm:$0xff]  }
 0x58d   :  { %4878 = vmatprep.subr.bf16.mxu0 %v9257_v34  ;;  %v9366_v34 = vld [vmem:[#allocation9 + $0x1a0] ss:$16 sps:$4 sm:$0xff]  }
 0x590   :  { %4879 = vmatpush1.bf16.msra.mxu0 %v9255_v37  ;;  %v9321_v37 = vld [vmem:[#allocation9 + $0xa8] ss:$16 sps:$4 sm:$0xff]  }
 0x591   :  { %4880 = vmatprep.subr.bf16.mxu0 %v9260_v58  ;;  %v9374_v58 = vld [vmem:[#allocation9 + $0x1c4] ss:$16 sps:$4 sm:$0xff]  }
 0x594   :  { %4881 = vmatpush1.bf16.msra.mxu0 %v9258_v63  ;;  %v9329_v63 = vld [vmem:[#allocation9 + $0xcc] ss:$16 sps:$4 sm:$0xff]  }
 0x595   :  { %4882 = vmatprep.subr.bf16.mxu0 %v9263_v40  ;;  %v9372_v40 = vld [vmem:[#allocation9 + $0x1c0] ss:$16 sps:$4 sm:$0xff]  }
 0x598   :  { %4883 = vmatpush1.bf16.msra.mxu0 %v9261_v42  ;;  %v9327_v42 = vld [vmem:[#allocation9 + $0xc8] ss:$16 sps:$4 sm:$0xff]  }
 0x599   :  { %4884 = vmatprep.subr.bf16.mxu0 %v9266_v59  ;;  %v9380_v59 = vld [vmem:[#allocation9 + $0x1e4] ss:$16 sps:$4 sm:$0xff]  }
 0x59c   :  { %4885 = vmatpush1.bf16.msra.mxu0 %v9264_v11  ;;  %v9335_v11 = vld [vmem:[#allocation9 + $0xec] ss:$16 sps:$4 sm:$0xff]  }
 0x59d   :  { %4886 = vmatprep.subr.bf16.mxu0 %v9269_v43  ;;  %v9378_v43 = vld [vmem:[#allocation9 + $0x1e0] ss:$16 sps:$4 sm:$0xff]  }
 0x5a0   :  { %4887 = vmatpush1.bf16.msra.mxu0 %v9267_v39  ;;  %v9333_v39 = vld [vmem:[#allocation9 + $0xe8] ss:$16 sps:$4 sm:$0xff]  }
 0x5a1   :  { %4888 = vmatprep.subr.bf16.mxu0 %v9272_v44  ;;  %v9341_v44 = vld [vmem:[#allocation9 + $0x10c] ss:$16 sps:$4 sm:$0xff]  }
 0x5a4   :  { %4889 = vmatpush1.bf16.msra.mxu0 %v9270_v0  ;;  %v9347_v0 = vld [vmem:[#allocation9 + $0x12c] ss:$16 sps:$4 sm:$0xff]  }
 0x5a5   :  { %4890 = vmatprep.subr.bf16.mxu0 %v9275_v50  ;;  %v9353_v50 = vld [vmem:[#allocation9 + $0x14c] ss:$16 sps:$4 sm:$0xff]  }
 0x5a8   :  { %4891 = vmatpush1.bf16.msra.mxu0 %v9273_v19  ;;  %v9359_v19 = vld [vmem:[#allocation9 + $0x16c] ss:$16 sps:$4 sm:$0xff]  }
 0x5a9   :  { %4892 = vmatprep.subr.bf16.mxu0 %v9278_v52  ;;  %v9365_v52 = vld [vmem:[#allocation9 + $0x18c] ss:$16 sps:$4 sm:$0xff]  }
 0x5ac   :  { %4893 = vmatpush1.bf16.msra.mxu0 %v9276_v55  ;;  %v9371_v55 = vld [vmem:[#allocation9 + $0x1ac] ss:$16 sps:$4 sm:$0xff]  }
 0x5ad   :  { %4894 = vmatprep.subr.bf16.mxu0 %v9281_v20  ;;  %v9377_v20 = vld [vmem:[#allocation9 + $0x1cc] ss:$16 sps:$4 sm:$0xff]  }
 0x5b0   :  { %4895 = vmatpush1.bf16.msra.mxu0 %v9279_v60  ;;  %v9383_v60 = vld [vmem:[#allocation9 + $0x1ec] ss:$16 sps:$4 sm:$0xff]  }
 0x5b1   :  { %4896 = vmatprep.subr.bf16.mxu0 %v9284_v36  ;;  %v9389_v36 = vld [vmem:[#allocation9 + $0x20c] ss:$16 sps:$4 sm:$0xff]  }
 0x5b4   :  { %4897 = vmatpush1.bf16.msra.mxu0 %v9282_v22  ;;  %v3676_v22 = vrot.slane %v10474_v62, %v10085_v18 }
 0x5b5   :  { %4898 = vmatprep.subr.bf16.mxu0 %v9287_v46  ;;  %v3688_v46 = vrot.slane %v10474_v62, %v10440_v5 }
 0x5b8   :  { %4899 = vmatpush1.bf16.msra.mxu0 %v9285_v6 }
 0x5b9   :  { %6434 = vmatprep.subr.bf16.mxu0 %v9293_v8 }
 0x5bb   :  { %4901 = vmatmul.mubr.bf16.vlgmr.msra.gmra.mrb[104].mxu0 %v10463_v48  ;;  %v9356_v48 = vld [vmem:[#allocation9 + $0x164] ss:$16 sps:$4 sm:$0xff]  }
 0x5bc   :  { %6435 = vmatpush1.bf16.msra.mxu0 %v9291_v10  ;;  %6333 = vmatprep.subr.bf16.mxu1 %v9356_v48 }
 0x5bd   :  { %6436 = vmatprep.subr.bf16.mxu0 %v9299_v13  ;;  %6334 = vmatpush1.bf16.msra.mxu1 %v9354_v29 }
 0x5be   :  { %6335 = vmatprep.subr.bf16.mxu1 %v9362_v32 }
 0x5c0   :  { %6437 = vmatpush1.bf16.msra.mxu0 %v9297_v17 }
 0x5c1   :  { %6438 = vmatprep.subr.bf16.mxu0 %v9305_v7  ;;  %6336 = vmatpush1.bf16.msra.mxu1 %v9360_v57 }
 0x5c2   :  { %6337 = vmatprep.subr.bf16.mxu1 %v9368_v31 }
 0x5c4   :  { %6439 = vmatpush1.bf16.msra.mxu0 %v9303_v23 }
 0x5c5   :  { %6440 = vmatprep.subr.bf16.mxu0 %v9311_v54  ;;  %6338 = vmatpush1.bf16.msra.mxu1 %v9366_v34 }
 0x5c6   :  { %6339 = vmatprep.subr.bf16.mxu1 %v9374_v58 }
 0x5c8   :  { %6441 = vmatpush1.bf16.msra.mxu0 %v9309_v28 }
 0x5c9   :  { %6442 = vmatprep.subr.bf16.mxu0 %v9317_v30  ;;  %6340 = vmatpush1.bf16.msra.mxu1 %v9372_v40 }
 0x5ca   :  { %6341 = vmatprep.subr.bf16.mxu1 %v9380_v59 }
 0x5cc   :  { %6443 = vmatpush1.bf16.msra.mxu0 %v9315_v33 }
 0x5cd   :  { %6444 = vmatprep.subr.bf16.mxu0 %v9323_v35  ;;  %6342 = vmatpush1.bf16.msra.mxu1 %v9378_v43 }
 0x5ce   :  { %6352 = vmatprep.subr.bf16.mxu1 %v9386_v9 }
 0x5d0   :  { %6445 = vmatpush1.bf16.msra.mxu0 %v9321_v37  ;;  %v3684_v37 = vrot.slane %v10474_v62, %v10431_v3 }
 0x5d1   :  { %6446 = vmatprep.subr.bf16.mxu0 %v9329_v63 }
 0x5d4   :  { %6447 = vmatpush1.bf16.msra.mxu0 %v9327_v42 }
 0x5d5   :  { %6448 = vmatprep.subr.bf16.mxu0 %v9335_v11 }
 0x5d8   :  { %6449 = vmatpush1.bf16.msra.mxu0 %v9333_v39 }
 0x5d9   :  { %6450 = vmatprep.subr.bf16.mxu0 %v9341_v44 }
 0x5dc   :  { %6451 = vmatpush1.bf16.msra.mxu0 %v9339_v38 }
 0x5dd   :  { %6452 = vmatprep.subr.bf16.mxu0 %v9347_v0 }
 0x5e0   :  { %6453 = vmatpush1.bf16.msra.mxu0 %v9345_v47 }
 0x5e1   :  { %6454 = vmatprep.subr.bf16.mxu0 %v9353_v50 }
 0x5e4   :  { %6455 = vmatpush1.bf16.msra.mxu0 %v9351_v41 }
 0x5e5   :  { %6456 = vmatprep.subr.bf16.mxu0 %v9359_v19 }
 0x5e8   :  { %6457 = vmatpush1.bf16.msra.mxu0 %v9357_v51 }
 0x5e9   :  { %6458 = vmatprep.subr.bf16.mxu0 %v9365_v52 }
 0x5ec   :  { %6459 = vmatpush1.bf16.msra.mxu0 %v9363_v25 }
 0x5ed   :  { %6460 = vmatprep.subr.bf16.mxu0 %v9371_v55 }
 0x5f0   :  { %6461 = vmatpush1.bf16.msra.mxu0 %v9369_v56 }
 0x5f1   :  { %6462 = vmatprep.subr.bf16.mxu0 %v9377_v20 }
 0x5f4   :  { %6463 = vmatpush1.bf16.msra.mxu0 %v9375_v45 }
 0x5f5   :  { %6464 = vmatprep.subr.bf16.mxu0 %v9383_v60 }
 0x5f8   :  { %6465 = vmatpush1.bf16.msra.mxu0 %v9381_v61 }
 0x5f9   :  { %6475 = vmatprep.subr.bf16.mxu0 %v9389_v36 }
 0x60e   :  { %v4738_v4 = vpop.f32.mrb[100].mxu0  ;;  %v4820_v6 = vpop.f32.mrb[100].mxu1 }
 0x60f   :  { %v8737_v49 = vadd.f32 %v4738_v4, %v3676_v22  ;;  %v4740_v8 = vpop.f32.mrb[101].mxu0  ;;  %v4822_v24 = vpop.f32.mrb[101].mxu1  ;;  %v8739_v43 = vadd.f32 %v4820_v6, %v3684_v37 }
 0x610   :  { %v8738_v10 = vadd.f32 %v4740_v8, %v3680_v2  ;;  %v8740_v12 = vadd.f32 %v4822_v24, %v3688_v46  ;;  %v4742_v13 = vpop.f32.mrb[102].mxu0  ;;  %v4824_v53 = vpop.f32.mrb[102].mxu1 }
 0x611   :  { %v4910_v17 = vsel %vm4909_vm7, %v8737_v49, 0.0  ;;  %v4743_v14 = vpop.f32.mrb[103].mxu0  ;;  %v4825_v7 = vpop.f32.mrb[103].mxu1  ;;  %v4924_v50 = vsel %vm4909_vm7, %v8739_v43, 0.0 }
 0x612   :  { %v4911_v21 = vrot.slane %v4910_v17, 4  ;;  %v4917_v23 = vsel %vm4909_vm7, %v8738_v10, 0.0  ;;  %v4931_v27 = vsel %vm4909_vm7, %v8740_v12, 0.0  ;;  %v4925_v25 = vrot.slane %v4924_v50, 4 }
 0x613   :  { %v4918_v54 = vrot.slane %v4917_v23, 4  ;;  %v4932_v26 = vrot.slane %v4931_v27, 4 }
 0x614   :  { %v4912_v28 = vadd.f32 %v4911_v21, %v4910_v17  ;;  %v4926_v2 = vadd.f32 %v4925_v25, %v4924_v50 }
 0x615   :  { %v4919_v48 = vadd.f32 %v4918_v54, %v4917_v23  ;;  %v4933_v30 = vadd.f32 %v4932_v26, %v4931_v27 }
 0x616   :  { %v4913_v29 = vrot.slane %v4912_v28, 2 }
 0x617   :  { %v4920_v57 = vrot.slane %v4919_v48, 2  ;;  %v4934_v32 = vrot.slane %v4933_v30, 2 }
 0x618   :  { %v4914_v33 = vadd.f32 %v4913_v29, %v4912_v28  ;;  %v10494_v29 = vld [vmem:[%s10730_s9] sm:$0x3f] }
 0x619   :  { %v4921_v31 = vadd.f32 %v4920_v57, %v4919_v48  ;;  %v4935_v35 = vadd.f32 %v4934_v32, %v4933_v30  ;;  %v10499_v57 = vld [vmem:[%s10731_s10] sm:$0x3f]  ;;  %v5046_v37 = vrot.slane %v10494_v29, %v10437_v15 }
 0x61a   :  { %v4915_v34 = vrot.slane %v4914_v33, 1 }
 0x61b   :  { %v4922_v58 = vrot.slane %v4921_v31, 1  ;;  %v4936_v63 = vrot.slane %v4935_v35, 1 }
 0x61c   :  { %v4916_v40 = vadd.f32 %v4915_v34, %v4914_v33  ;;  %v5042_v33 = vrot.slane %v10494_v29, %v10085_v18  ;;  %v5080_v34 = vrot.slane %v10499_v57, %v10085_v18 }
 0x61d   :  { %v4923_v42 = vadd.f32 %v4922_v58, %v4921_v31  ;;  %v4937_v59 = vadd.f32 %v4936_v63, %v4935_v35 }
 0x61e   :  { %v4953_v11 = vmul.f32 0.5, %v4916_v40  ;;  %v5054_v40 = vrot.slane %v10494_v29, %v10440_v5 }
 0x61f   :  { %v4954_v39 = vmul.f32 0.5, %v4923_v42  ;;  %v4956_v9 = vmul.f32 0.5, %v4937_v59 }
 0x620   :  { %v4959_v44 = vsub.f32 %v8737_v49, %v4953_v11 }
 0x621   :  { %v4960_v38 = vsub.f32 %v8738_v10, %v4954_v39  ;;  %v4962_v0 = vsub.f32 %v8740_v12, %v4956_v9  ;;  %v4927_v10 = vrot.slane %v4926_v2, 2  ;;  %v5084_v39 = vrot.slane %v10499_v57, %v10437_v15 }
 0x622   :  { %v4965_v47 = vmul.f32 %v4959_v44, %v4959_v44 }
 0x623   :  { %v4966_v41 = vmul.f32 %v4960_v38, %v4960_v38  ;;  %v4968_v19 = vmul.f32 %v4962_v0, %v4962_v0  ;;  %v4928_v21 = vadd.f32 %v4927_v10, %v4926_v2  ;;  %v9392_v2 = vld [vmem:[#allocation9 + $0x224] ss:$16 sps:$4 sm:$0xff]   ;;  %v9401_v10 = vld [vmem:[#allocation9 + $0x24c] ss:$16 sps:$4 sm:$0xff]  }
 0x624   :  { %v4971_v51 = vsel %vm4909_vm7, %v4965_v47, 0.0 }
 0x625   :  { %v4972_v52 = vrot.slane %v4971_v51, 4  ;;  %v4978_v55 = vsel %vm4909_vm7, %v4966_v41, 0.0  ;;  %v4992_v56 = vsel %vm4909_vm7, %v4968_v19, 0.0  ;;  %v4929_v48 = vrot.slane %v4928_v21, 1 }
 0x626   :  { %v4979_v20 = vrot.slane %v4978_v55, 4  ;;  %v4993_v45 = vrot.slane %v4992_v56, 4 }
 0x627   :  { %v4973_v60 = vadd.f32 %v4972_v52, %v4971_v51  ;;  %v4930_v30 = vadd.f32 %v4929_v48, %v4928_v21  ;;  %v9405_v21 = vld [vmem:[#allocation9 + $0x268] ss:$16 sps:$4 sm:$0xff]  }
 0x628   :  { %v4980_v61 = vadd.f32 %v4979_v20, %v4978_v55  ;;  %v4994_v36 = vadd.f32 %v4993_v45, %v4992_v56  ;;  %v9384_v45 = vld [vmem:[#allocation9 + $0x200] ss:$16 sps:$4 sm:$0xff]  }
 0x629   :  { %v4974_v22 = vrot.slane %v4973_v60, 2  ;;  %v4955_v32 = vmul.f32 0.5, %v4930_v30  ;;  %v9416_v30 = vld [vmem:[#allocation9 + $0x2a4] ss:$16 sps:$4 sm:$0xff]  }
 0x62a   :  { %v4981_v46 = vrot.slane %v4980_v61, 2  ;;  %v4995_v4 = vrot.slane %v4994_v36, 2 }
 0x62b   :  { %v4975_v6 = vadd.f32 %v4974_v22, %v4973_v60  ;;  %v10507_v63 = vsub.f32 %v8739_v43, %v4955_v32  ;;  %v9387_v60 = vld [vmem:[#allocation9 + $0x208] ss:$16 sps:$4 sm:$0xff]   ;;  %v9419_v32 = vld [vmem:[#allocation9 + $0x2ac] ss:$16 sps:$4 sm:$0xff]  }
 0x62c   :  { %v4982_v49 = vadd.f32 %v4981_v46, %v4980_v61  ;;  %v4996_v8 = vadd.f32 %v4995_v4, %v4994_v36  ;;  %v9395_v46 = vld [vmem:[#allocation9 + $0x22c] ss:$16 sps:$4 sm:$0xff]  }
 0x62d   :  { %v4976_v24 = vrot.slane %v4975_v6, 1  ;;  %v4967_v41 = vmul.f32 %v10507_v63, %v10507_v63 }
 0x62e   :  { %v4983_v12 = vrot.slane %v4982_v49, 1  ;;  %v4997_v13 = vrot.slane %v4996_v8, 1 }
 0x62f   :  { %v4977_v53 = vadd.f32 %v4976_v24, %v4975_v6  ;;  %v9390_v6 = vld [vmem:[#allocation9 + $0x220] ss:$16 sps:$4 sm:$0xff]   ;;  %v9398_v24 = vld [vmem:[#allocation9 + $0x244] ss:$16 sps:$4 sm:$0xff]  }
 0x630   :  { %v4984_v17 = vadd.f32 %v4983_v12, %v4982_v49  ;;  %v4998_v14 = vadd.f32 %v4997_v13, %v4996_v8  ;;  %v9393_v49 = vld [vmem:[#allocation9 + $0x228] ss:$16 sps:$4 sm:$0xff]   ;;  %v9396_v12 = vld [vmem:[#allocation9 + $0x240] ss:$16 sps:$4 sm:$0xff]  }
 0x631   :  { %v5013_v7 = vmul.f32 0.5, %v4977_v53  ;;  %v9399_v13 = vld [vmem:[#allocation9 + $0x248] ss:$16 sps:$4 sm:$0xff]  }
 0x632   :  { %v5014_v23 = vmul.f32 0.5, %v4984_v17  ;;  %v5016_v27 = vmul.f32 0.5, %v4998_v14  ;;  %v9404_v17 = vld [vmem:[#allocation9 + $0x264] ss:$16 sps:$4 sm:$0xff]   ;;  %v9407_v14 = vld [vmem:[#allocation9 + $0x26c] ss:$16 sps:$4 sm:$0xff]  }
 0x633   :  { %v5019_v54 = vadd.f32 0.9, %v5013_v7  ;;  %v9402_v7 = vld [vmem:[#allocation9 + $0x260] ss:$16 sps:$4 sm:$0xff]  }
 0x634   :  { %v5020_v26 = vadd.f32 0.9, %v5014_v23  ;;  %v5022_v28 = vadd.f32 0.9, %v5016_v27  ;;  %v9410_v27 = vld [vmem:[#allocation9 + $0x284] ss:$16 sps:$4 sm:$0xff]  }
 0x635   :  { %9728 = vrsqrt.f32 %v5019_v54  ;;  %v9413_v54 = vld [vmem:[#allocation9 + $0x28c] ss:$16 sps:$4 sm:$0xff]  }
 0x636   :  { %9730 = vrsqrt.f32 %v5020_v26  ;;  %v9408_v26 = vld [vmem:[#allocation9 + $0x280] ss:$16 sps:$4 sm:$0xff]  }
 0x637   :  { %9732 = vrsqrt.f32 %v5022_v28  ;;  %v9411_v28 = vld [vmem:[#allocation9 + $0x288] ss:$16 sps:$4 sm:$0xff]  }
 0x63f   :  { %v9729_v31 = vpop.eup %9728 }
 0x640   :  { %v5031_v35 = vmul.f32 %v9729_v31, %v4959_v44  ;;  %v9731_v58 = vpop.eup %9730  ;;  %v5092_v44 = vrot.slane %v10499_v57, %v10440_v5  ;;  %v9417_v31 = vld [vmem:[#allocation9 + $0x2a8] ss:$16 sps:$4 sm:$0xff]  }
 0x641   :  { %v9733_v42 = vpop.eup %9732  ;;  %v5032_v11 = vmul.f32 %v9731_v58, %v4960_v38  ;;  %v4985_v38 = vsel %vm4909_vm7, %v4967_v41, 0.0  ;;  %v9420_v58 = vld [vmem:[#allocation9 + $0x2c0] ss:$16 sps:$4 sm:$0xff]  }
 0x642   :  { %v5069_v59 = vmul.f32 %v5042_v33, %v5031_v35  ;;  %v5034_v9 = vmul.f32 %v9733_v42, %v4962_v0  ;;  %v4986_v36 = vrot.slane %v4985_v38, 4  ;;  %v9414_v33 = vld [vmem:[#allocation9 + $0x2a0] ss:$16 sps:$4 sm:$0xff]  }
 0x643   :  { %v5070_v50 = vmul.f32 %v5046_v37, %v5032_v11  ;;  %v9425_v37 = vld [vmem:[#allocation9 + $0x2cc] ss:$16 sps:$4 sm:$0xff]   ;;  %v9432_v41 = vld [vmem:[#allocation9 + $0x300] ss:$16 sps:$4 sm:$0xff]  }
 0x644   :  { %v5107_v47 = vadd.f32 %v5080_v34, %v5069_v59  ;;  %v5072_v43 = vmul.f32 %v5054_v40, %v5034_v9  ;;  %v4987_v8 = vadd.f32 %v4986_v36, %v4985_v38  ;;  %v9422_v34 = vld [vmem:[#allocation9 + $0x2c4] ss:$16 sps:$4 sm:$0xff]   ;;  %v9423_v40 = vld [vmem:[#allocation9 + $0x2c8] ss:$16 sps:$4 sm:$0xff]   ;;  %v9431_v11 = vld [vmem:[#allocation9 + $0x2ec] ss:$16 sps:$4 sm:$0xff]  }
 0x645   :  { %v5108_v19 = vadd.f32 %v5084_v39, %v5070_v50  ;;  %v9428_v59 = vld [vmem:[#allocation9 + $0x2e4] ss:$16 sps:$4 sm:$0xff]   ;;  %v9426_v39 = vld [vmem:[#allocation9 + $0x2e0] ss:$16 sps:$4 sm:$0xff]   ;;  %v9429_v9 = vld [vmem:[#allocation9 + $0x2e8] ss:$16 sps:$4 sm:$0xff]  }
 0x646   :  { %vm5113_vm8 = vcmp.ge.f32.partialorder %v5107_v47, 0.0  ;;  %v5119_v51 = vmul.f32 0.2, %v5107_v47  ;;  %v5110_v52 = vadd.f32 %v5092_v44, %v5072_v43  ;;  %v4988_v53 = vrot.slane %v4987_v8, 2  ;;  %v9437_v50 = vld [vmem:[#allocation9 + $0x30c] ss:$16 sps:$4 sm:$0xff]  }
 0x647   :  { %vm5114_vm9 = vcmp.ge.f32.partialorder %v5108_v19, 0.0  ;;  %v5120_v25 = vmul.f32 0.2, %v5108_v19  ;;  %v9435_v43 = vld [vmem:[#allocation9 + $0x308] ss:$16 sps:$4 sm:$0xff]  }
 0x648   :  { %v5125_v55 = vsel %vm5113_vm8, %v5107_v47, %v5119_v51  ;;  %vm5116_vm10 = vcmp.ge.f32.partialorder %v5110_v52, 0.0  ;;  %v5122_v0 = vmul.f32 0.2, %v5110_v52  ;;  %v4989_v23 = vadd.f32 %v4988_v53, %v4987_v8  ;;  %v9434_v47 = vld [vmem:[#allocation9 + $0x304] ss:$16 sps:$4 sm:$0xff]  }
 0x649   :  { %v5126_v56 = vsel %vm5114_vm9, %v5108_v19, %v5120_v25  ;;  %v5131_v22 = vpack.c.bf16 %v5125_v55, %v5125_v55  ;;  %v9440_v19 = vld [vmem:[#allocation9 + $0x324] ss:$16 sps:$4 sm:$0xff]   ;;  %v9443_v51 = vld [vmem:[#allocation9 + $0x32c] ss:$16 sps:$4 sm:$0xff]   ;;  %v9441_v25 = vld [vmem:[#allocation9 + $0x328] ss:$16 sps:$4 sm:$0xff]  }
 0x64a   :  { %v5132_v20 = vpack.c.bf16 %v5126_v56, %v5126_v56  ;;  %v5128_v61 = vsel %vm5116_vm10, %v5110_v52, %v5122_v0  ;;  %v4990_v48 = vrot.slane %v4989_v23, 1  ;;  %v9438_v52 = vld [vmem:[#allocation9 + $0x320] ss:$16 sps:$4 sm:$0xff]   ;;  %v9446_v38 = vld [vmem:[#allocation9 + $0x344] ss:$16 sps:$4 sm:$0xff]  }
 0x64b   :  { %v5134_v4 = vpack.c.bf16 %v5128_v61, %v5128_v61  ;;  %v9449_v55 = vld [vmem:[#allocation9 + $0x34c] ss:$16 sps:$4 sm:$0xff]   ;;  %v9444_v0 = vld [vmem:[#allocation9 + $0x340] ss:$16 sps:$4 sm:$0xff]   ;;  %v9447_v56 = vld [vmem:[#allocation9 + $0x348] ss:$16 sps:$4 sm:$0xff]  }
 0x64c   :  { %6343 = vmatprep.mubr.bf16.mxu1 %v5132_v20  ;;  %6466 = vmatprep.mubr.bf16.mxu0 %v5132_v20  ;;  %v4991_v35 = vadd.f32 %v4990_v48, %v4989_v23  ;;  %v9452_v20 = vld [vmem:[#allocation9 + $0x364] ss:$16 sps:$4 sm:$0xff]   ;;  %v9450_v61 = vld [vmem:[#allocation9 + $0x360] ss:$16 sps:$4 sm:$0xff]   ;;  %v9453_v36 = vld [vmem:[#allocation9 + $0x368] ss:$16 sps:$4 sm:$0xff]  }
 0x64d   :  { %6344 = vmatmul.mubr.bf16.vlgmr.msra.gmra.mrb[104].mxu1 %v5131_v22  ;;  %6467 = vmatmul.mubr.bf16.vlgmr.msra.gmra.mrb[108].mxu0 %v5131_v22  ;;  %v9458_v22 = vld [vmem:[#allocation9 + $0x384] ss:$16 sps:$4 sm:$0xff]   ;;  %v9465_v53 = vld [vmem:[#allocation9 + $0x3a8] ss:$16 sps:$4 sm:$0xff]   ;;  %v10524_v48 = vsub.s32 4, %v10081_v16 }
 0x64e   :  { %6353 = vmatpush1.bf16.msra.mxu1 %v9384_v45  ;;  %6476 = vmatpush1.bf16.msra.mxu0 %v9387_v60  ;;  %v5015_v42 = vmul.f32 0.5, %v4991_v35  ;;  %v9455_v45 = vld [vmem:[#allocation9 + $0x36c] ss:$16 sps:$4 sm:$0xff]   ;;  %v9464_v8 = vld [vmem:[#allocation9 + $0x3a4] ss:$16 sps:$4 sm:$0xff]  }
 0x64f   :  { %6384 = vmatprep.mubr.bf16.mxu1 %v5134_v4  ;;  %6507 = vmatprep.mubr.bf16.mxu0 %v5134_v4  ;;  %v5050_v4 = vrot.slane %v10494_v29, %v10431_v3  ;;  %v9476_v23 = vld [vmem:[#allocation9 + $0x3e4] ss:$16 sps:$4 sm:$0xff]   ;;  %v9480_v35 = vld [vmem:[#allocation9 + $0x400] ss:$16 sps:$4 sm:$0xff]  }
 0x650   :  { %6354 = vmatprep.subr.bf16.mxu1 %v9392_v2  ;;  %6477 = vmatprep.subr.bf16.mxu0 %v9395_v46  ;;  %v5021_v44 = vadd.f32 0.9, %v5015_v42  ;;  %v9461_v2 = vld [vmem:[#allocation9 + $0x38c] ss:$16 sps:$4 sm:$0xff]   ;;  %v9488_v42 = vld [vmem:[#allocation9 + $0x424] ss:$16 sps:$4 sm:$0xff]  }
 0x652   :  { %6355 = vmatpush1.bf16.msra.mxu1 %v9390_v6  ;;  %6478 = vmatpush1.bf16.msra.mxu0 %v9393_v49  ;;  %9734 = vrsqrt.f32 %v5021_v44  ;;  %v9456_v6 = vld [vmem:[#allocation9 + $0x380] ss:$16 sps:$4 sm:$0xff]   ;;  %v9459_v49 = vld [vmem:[#allocation9 + $0x388] ss:$16 sps:$4 sm:$0xff]  }
 0x653   :  { %6356 = vmatprep.subr.bf16.mxu1 %v9398_v24  ;;  %6479 = vmatprep.subr.bf16.mxu0 %v9401_v10  ;;  %v9467_v24 = vld [vmem:[#allocation9 + $0x3ac] ss:$16 sps:$4 sm:$0xff]   ;;  %v9489_v44 = vld [vmem:[#allocation9 + $0x428] ss:$16 sps:$4 sm:$0xff]  }
 0x656   :  { %6357 = vmatpush1.bf16.msra.mxu1 %v9396_v12  ;;  %6480 = vmatpush1.bf16.msra.mxu0 %v9399_v13  ;;  %v5088_v12 = vrot.slane %v10499_v57, %v10431_v3  ;;  %v9462_v13 = vld [vmem:[#allocation9 + $0x3a0] ss:$16 sps:$4 sm:$0xff]  }
 0x657   :  { %6358 = vmatprep.subr.bf16.mxu1 %v9404_v17  ;;  %6481 = vmatprep.subr.bf16.mxu0 %v9407_v14  ;;  %v9473_v17 = vld [vmem:[#allocation9 + $0x3cc] ss:$16 sps:$4 sm:$0xff]  }
 0x65a   :  { %6359 = vmatpush1.bf16.msra.mxu1 %v9402_v7  ;;  %6482 = vmatpush1.bf16.msra.mxu0 %v9405_v21  ;;  %v9468_v7 = vld [vmem:[#allocation9 + $0x3c0] ss:$16 sps:$4 sm:$0xff]   ;;  %v9471_v21 = vld [vmem:[#allocation9 + $0x3c8] ss:$16 sps:$4 sm:$0xff]  }
 0x65b   :  { %6360 = vmatprep.subr.bf16.mxu1 %v9410_v27  ;;  %6483 = vmatprep.subr.bf16.mxu0 %v9413_v54  ;;  %v9479_v27 = vld [vmem:[#allocation9 + $0x3ec] ss:$16 sps:$4 sm:$0xff]  }
 0x65c   :  { %v9735_v60 = vpop.eup %9734 }
 0x65d   :  { %v5033_v46 = vmul.f32 %v9735_v60, %v10507_v63  ;;  %v9470_v63 = vld [vmem:[#allocation9 + $0x3c4] ss:$16 sps:$4 sm:$0xff]  }
 0x65e   :  { %6361 = vmatpush1.bf16.msra.mxu1 %v9408_v26  ;;  %6484 = vmatpush1.bf16.msra.mxu0 %v9411_v28  ;;  %v9474_v26 = vld [vmem:[#allocation9 + $0x3e0] ss:$16 sps:$4 sm:$0xff]   ;;  %v9477_v28 = vld [vmem:[#allocation9 + $0x3e8] ss:$16 sps:$4 sm:$0xff]  }
 0x65f   :  { %6362 = vmatprep.subr.bf16.mxu1 %v9416_v30  ;;  %6485 = vmatprep.subr.bf16.mxu0 %v9419_v32  ;;  %v5071_v10 = vmul.f32 %v5050_v4, %v5033_v46  ;;  %v9482_v30 = vld [vmem:[#allocation9 + $0x404] ss:$16 sps:$4 sm:$0xff]   ;;  %v9485_v32 = vld [vmem:[#allocation9 + $0x40c] ss:$16 sps:$4 sm:$0xff]  }
 0x660   :  { %v9506_v46 = vld [vmem:[#allocation9 + $0x484] ss:$16 sps:$4 sm:$0xff]   ;;  %v9509_v4 = vld [vmem:[#allocation9 + $0x48c] ss:$16 sps:$4 sm:$0xff]  }
 0x661   :  { %v5109_v14 = vadd.f32 %v5088_v12, %v5071_v10  ;;  %v9507_v10 = vld [vmem:[#allocation9 + $0x488] ss:$16 sps:$4 sm:$0xff]  }
 0x662   :  { %6363 = vmatpush1.bf16.msra.mxu1 %v9414_v33  ;;  %6486 = vmatpush1.bf16.msra.mxu0 %v9417_v31  ;;  %v10527_v33 = vsub.s32 5, %v10081_v16 }
 0x663   :  { %6364 = vmatprep.subr.bf16.mxu1 %v9422_v34  ;;  %6487 = vmatprep.subr.bf16.mxu0 %v9425_v37  ;;  %v5121_v54 = vmul.f32 0.2, %v5109_v14  ;;  %vm5115_vm11 = vcmp.ge.f32.partialorder %v5109_v14, 0.0  ;;  %v9483_v34 = vld [vmem:[#allocation9 + $0x408] ss:$16 sps:$4 sm:$0xff]   ;;  %v3692_v37 = vrot.slane %v10474_v62, %v10524_v48 }
 0x665   :  { %v5127_v31 = vsel %vm5115_vm11, %v5109_v14, %v5121_v54  ;;  %v9521_v54 = vld [vmem:[#allocation9 + $0x4cc] ss:$16 sps:$4 sm:$0xff]  }
 0x666   :  { %6365 = vmatpush1.bf16.msra.mxu1 %v9420_v58  ;;  %6488 = vmatpush1.bf16.msra.mxu0 %v9423_v40  ;;  %v5133_v58 = vpack.c.bf16 %v5127_v31, %v5127_v31  ;;  %v3696_v40 = vrot.slane %v10474_v62, %v10527_v33  ;;  %v9519_v31 = vld [vmem:[#allocation9 + $0x4c8] ss:$16 sps:$4 sm:$0xff]  }
 0x667   :  { %6366 = vmatprep.subr.bf16.mxu1 %v9428_v59  ;;  %6489 = vmatprep.subr.bf16.mxu0 %v9431_v11  ;;  %v9491_v59 = vld [vmem:[#allocation9 + $0x42c] ss:$16 sps:$4 sm:$0xff]  }
 0x66a   :  { %6367 = vmatpush1.bf16.msra.mxu1 %v9426_v39  ;;  %6490 = vmatpush1.bf16.msra.mxu0 %v9429_v9  ;;  %v9486_v9 = vld [vmem:[#allocation9 + $0x420] ss:$16 sps:$4 sm:$0xff]  }
 0x66b   :  { %6368 = vmatprep.subr.bf16.mxu1 %v9434_v47  ;;  %6491 = vmatprep.subr.bf16.mxu0 %v9437_v50 }
 0x66e   :  { %6369 = vmatpush1.bf16.msra.mxu1 %v9432_v41  ;;  %6492 = vmatpush1.bf16.msra.mxu0 %v9435_v43  ;;  %v9494_v41 = vld [vmem:[#allocation9 + $0x444] ss:$16 sps:$4 sm:$0xff]   ;;  %v9497_v43 = vld [vmem:[#allocation9 + $0x44c] ss:$16 sps:$4 sm:$0xff]  }
 0x66f   :  { %6370 = vmatprep.subr.bf16.mxu1 %v9440_v19  ;;  %6493 = vmatprep.subr.bf16.mxu0 %v9443_v51 }
 0x672   :  { %6371 = vmatpush1.bf16.msra.mxu1 %v9438_v52  ;;  %6494 = vmatpush1.bf16.msra.mxu0 %v9441_v25 }
 0x673   :  { %6372 = vmatprep.subr.bf16.mxu1 %v9446_v38  ;;  %6495 = vmatprep.subr.bf16.mxu0 %v9449_v55  ;;  %v9492_v38 = vld [vmem:[#allocation9 + $0x440] ss:$16 sps:$4 sm:$0xff]   ;;  %v9495_v55 = vld [vmem:[#allocation9 + $0x448] ss:$16 sps:$4 sm:$0xff]  }
 0x676   :  { %6373 = vmatpush1.bf16.msra.mxu1 %v9444_v0  ;;  %6496 = vmatpush1.bf16.msra.mxu0 %v9447_v56  ;;  %v9500_v56 = vld [vmem:[#allocation9 + $0x464] ss:$16 sps:$4 sm:$0xff]  }
 0x677   :  { %6374 = vmatprep.subr.bf16.mxu1 %v9452_v20  ;;  %6497 = vmatprep.subr.bf16.mxu0 %v9455_v45  ;;  %v9503_v20 = vld [vmem:[#allocation9 + $0x46c] ss:$16 sps:$4 sm:$0xff]  }
 0x67a   :  { %6375 = vmatpush1.bf16.msra.mxu1 %v9450_v61  ;;  %6498 = vmatpush1.bf16.msra.mxu0 %v9453_v36  ;;  %v9498_v36 = vld [vmem:[#allocation9 + $0x460] ss:$16 sps:$4 sm:$0xff]  }
 0x67b   :  { %6376 = vmatprep.subr.bf16.mxu1 %v9458_v22  ;;  %6499 = vmatprep.subr.bf16.mxu0 %v9461_v2  ;;  %v9501_v22 = vld [vmem:[#allocation9 + $0x468] ss:$16 sps:$4 sm:$0xff]  }
 0x67e   :  { %6377 = vmatpush1.bf16.msra.mxu1 %v9456_v6  ;;  %6500 = vmatpush1.bf16.msra.mxu0 %v9459_v49 }
 0x67f   :  { %6378 = vmatprep.subr.bf16.mxu1 %v9464_v8  ;;  %6501 = vmatprep.subr.bf16.mxu0 %v9467_v24  ;;  %v9504_v24 = vld [vmem:[#allocation9 + $0x480] ss:$16 sps:$4 sm:$0xff]  }
 0x682   :  { %6379 = vmatpush1.bf16.msra.mxu1 %v9462_v13  ;;  %6502 = vmatpush1.bf16.msra.mxu0 %v9465_v53  ;;  %v9512_v13 = vld [vmem:[#allocation9 + $0x4a4] ss:$16 sps:$4 sm:$0xff]   ;;  %v9515_v53 = vld [vmem:[#allocation9 + $0x4ac] ss:$16 sps:$4 sm:$0xff]  }
 0x683   :  { %6380 = vmatprep.subr.bf16.mxu1 %v9470_v63  ;;  %6503 = vmatprep.subr.bf16.mxu0 %v9473_v17 }
 0x686   :  { %6381 = vmatpush1.bf16.msra.mxu1 %v9468_v7  ;;  %6504 = vmatpush1.bf16.msra.mxu0 %v9471_v21  ;;  %v9510_v7 = vld [vmem:[#allocation9 + $0x4a0] ss:$16 sps:$4 sm:$0xff]   ;;  %v9513_v21 = vld [vmem:[#allocation9 + $0x4a8] ss:$16 sps:$4 sm:$0xff]  }
 0x687   :  { %6382 = vmatprep.subr.bf16.mxu1 %v9476_v23  ;;  %6505 = vmatprep.subr.bf16.mxu0 %v9479_v27  ;;  %v9518_v27 = vld [vmem:[#allocation9 + $0x4c4] ss:$16 sps:$4 sm:$0xff]  }
 0x68a   :  { %6383 = vmatpush1.bf16.msra.mxu1 %v9474_v26  ;;  %6506 = vmatpush1.bf16.msra.mxu0 %v9477_v28 }
 0x68b   :  { %6393 = vmatprep.subr.bf16.mxu1 %v9482_v30  ;;  %6516 = vmatprep.subr.bf16.mxu0 %v9485_v32  ;;  %v9516_v32 = vld [vmem:[#allocation9 + $0x4c0] ss:$16 sps:$4 sm:$0xff]  }
 0x68d   :  { %6385 = vmatmul.mubr.bf16.vlgmr.msra.gmra.mrb[104].mxu1 %v5133_v58  ;;  %6508 = vmatmul.mubr.bf16.vlgmr.msra.gmra.mrb[108].mxu0 %v5133_v58 }
 0x68e   :  { %v4902_v16 = vpop.f32.mrb[104].mxu0  ;;  %6394 = vmatpush1.bf16.msra.mxu1 %v9480_v35  ;;  %6517 = vmatpush1.bf16.msra.mxu0 %v9483_v34  ;;  %v9524_v34 = vld [vmem:[#allocation9 + $0x4e4] ss:$16 sps:$4 sm:$0xff]  }
 0x68f   :  { %v8741_v11 = vadd.f32 %v4902_v16, %v3692_v37  ;;  %v4904_v39 = vpop.f32.mrb[105].mxu0  ;;  %6395 = vmatprep.subr.bf16.mxu1 %v9488_v42  ;;  %6518 = vmatprep.subr.bf16.mxu0 %v9491_v59  ;;  %v9527_v37 = vld [vmem:[#allocation9 + $0x4ec] ss:$16 sps:$4 sm:$0xff]   ;;  %v9522_v16 = vld [vmem:[#allocation9 + $0x4e0] ss:$16 sps:$4 sm:$0xff]  }
 0x690   :  { %v8742_v47 = vadd.f32 %v4904_v39, %v3696_v40  ;;  %v4906_v50 = vpop.f32.mrb[106].mxu0 }
 0x691   :  { %v4938_v19 = vsel %vm4909_vm7, %v8741_v11, 0.0  ;;  %v4907_v62 = vpop.f32.mrb[107].mxu0 }
 0x692   :  { %v4939_v51 = vrot.slane %v4938_v19, 4  ;;  %v4945_v52 = vsel %vm4909_vm7, %v8742_v47, 0.0  ;;  %6396 = vmatpush1.bf16.msra.mxu1 %v9486_v9  ;;  %6519 = vmatpush1.bf16.msra.mxu0 %v9489_v44  ;;  %v9530_v9 = vld [vmem:[#allocation9 + $0x504] ss:$16 sps:$4 sm:$0xff]   ;;  %v9533_v44 = vld [vmem:[#allocation9 + $0x50c] ss:$16 sps:$4 sm:$0xff]  }
 0x693   :  { %v4946_v25 = vrot.slane %v4945_v52, 4  ;;  %6397 = vmatprep.subr.bf16.mxu1 %v9494_v41  ;;  %6520 = vmatprep.subr.bf16.mxu0 %v9497_v43  ;;  %v9528_v43 = vld [vmem:[#allocation9 + $0x500] ss:$16 sps:$4 sm:$0xff]  }
 0x694   :  { %v4940_v0 = vadd.f32 %v4939_v51, %v4938_v19  ;;  %v9531_v19 = vld [vmem:[#allocation9 + $0x508] ss:$16 sps:$4 sm:$0xff]   ;;  %v9536_v51 = vld [vmem:[#allocation9 + $0x524] ss:$16 sps:$4 sm:$0xff]  }
 0x695   :  { %v4947_v45 = vadd.f32 %v4946_v25, %v4945_v52  ;;  %v9539_v52 = vld [vmem:[#allocation9 + $0x52c] ss:$16 sps:$4 sm:$0xff]  }
 0x696   :  { %v4941_v60 = vrot.slane %v4940_v0, 2  ;;  %6398 = vmatpush1.bf16.msra.mxu1 %v9492_v38  ;;  %6521 = vmatpush1.bf16.msra.mxu0 %v9495_v55 }
 0x697   :  { %v4948_v61 = vrot.slane %v4947_v45, 2  ;;  %6399 = vmatprep.subr.bf16.mxu1 %v9500_v56  ;;  %6522 = vmatprep.subr.bf16.mxu0 %v9503_v20  ;;  %v9537_v56 = vld [vmem:[#allocation9 + $0x528] ss:$16 sps:$4 sm:$0xff]  }
 0x698   :  { %v4942_v2 = vadd.f32 %v4941_v60, %v4940_v0  ;;  %v9534_v0 = vld [vmem:[#allocation9 + $0x520] ss:$16 sps:$4 sm:$0xff]   ;;  %v9545_v60 = vld [vmem:[#allocation9 + $0x54c] ss:$16 sps:$4 sm:$0xff]  }
 0x699   :  { %v4949_v6 = vadd.f32 %v4948_v61, %v4947_v45  ;;  %v9542_v45 = vld [vmem:[#allocation9 + $0x544] ss:$16 sps:$4 sm:$0xff]  }
 0x69a   :  { %v4943_v49 = vrot.slane %v4942_v2, 1  ;;  %6400 = vmatpush1.bf16.msra.mxu1 %v9498_v36  ;;  %6523 = vmatpush1.bf16.msra.mxu0 %v9501_v22 }
 0x69b   :  { %v4950_v8 = vrot.slane %v4949_v6, 1  ;;  %6401 = vmatprep.subr.bf16.mxu1 %v9506_v46  ;;  %6524 = vmatprep.subr.bf16.mxu0 %v9509_v4  ;;  %v9543_v46 = vld [vmem:[#allocation9 + $0x548] ss:$16 sps:$4 sm:$0xff]  }
 0x69c   :  { %v4944_v12 = vadd.f32 %v4943_v49, %v4942_v2  ;;  %v9540_v2 = vld [vmem:[#allocation9 + $0x540] ss:$16 sps:$4 sm:$0xff]   ;;  %v9551_v49 = vld [vmem:[#allocation9 + $0x56c] ss:$16 sps:$4 sm:$0xff]  }
 0x69d   :  { %v4951_v63 = vadd.f32 %v4950_v8, %v4949_v6  ;;  %v9548_v6 = vld [vmem:[#allocation9 + $0x564] ss:$16 sps:$4 sm:$0xff]   ;;  %v9546_v8 = vld [vmem:[#allocation9 + $0x560] ss:$16 sps:$4 sm:$0xff]  }
 0x69e   :  { %v4957_v17 = vmul.f32 0.5, %v4944_v12  ;;  %6402 = vmatpush1.bf16.msra.mxu1 %v9504_v24  ;;  %6525 = vmatpush1.bf16.msra.mxu0 %v9507_v10  ;;  %v9549_v24 = vld [vmem:[#allocation9 + $0x568] ss:$16 sps:$4 sm:$0xff]   ;;  %v9554_v10 = vld [vmem:[#allocation9 + $0x584] ss:$16 sps:$4 sm:$0xff]  }
 0x69f   :  { %v4958_v14 = vmul.f32 0.5, %v4951_v63  ;;  %6403 = vmatprep.subr.bf16.mxu1 %v9512_v13  ;;  %6526 = vmatprep.subr.bf16.mxu0 %v9515_v53  ;;  %v9557_v12 = vld [vmem:[#allocation9 + $0x58c] ss:$16 sps:$4 sm:$0xff]   ;;  %v9552_v13 = vld [vmem:[#allocation9 + $0x580] ss:$16 sps:$4 sm:$0xff]  }
 0x6a0   :  { %v10535_v23 = vsub.f32 %v8741_v11, %v4957_v17  ;;  %v9525_v11 = vld [vmem:[#allocation9 + $0x4e8] ss:$16 sps:$4 sm:$0xff]   ;;  %v9560_v63 = vld [vmem:[#allocation9 + $0x5a4] ss:$16 sps:$4 sm:$0xff]   ;;  %v9563_v17 = vld [vmem:[#allocation9 + $0x5ac] ss:$16 sps:$4 sm:$0xff]  }
 0x6a1   :  { %v10537_v26 = vsub.f32 %v8742_v47, %v4958_v14  ;;  %v9555_v53 = vld [vmem:[#allocation9 + $0x588] ss:$16 sps:$4 sm:$0xff]   ;;  %v5058_v14 = vrot.slane %v10494_v29, %v10524_v48 }
 0x6a2   :  { %v4969_v28 = vmul.f32 %v10535_v23, %v10535_v23  ;;  %6404 = vmatpush1.bf16.msra.mxu1 %v9510_v7  ;;  %6527 = vmatpush1.bf16.msra.mxu0 %v9513_v21  ;;  %v5062_v21 = vrot.slane %v10494_v29, %v10527_v33 }
 0x6a3   :  { %v4970_v30 = vmul.f32 %v10537_v26, %v10537_v26  ;;  %6405 = vmatprep.subr.bf16.mxu1 %v9518_v27  ;;  %6528 = vmatprep.subr.bf16.mxu0 %v9521_v54  ;;  %v9558_v27 = vld [vmem:[#allocation9 + $0x5a0] ss:$16 sps:$4 sm:$0xff]   ;;  %v9561_v54 = vld [vmem:[#allocation9 + $0x5a8] ss:$16 sps:$4 sm:$0xff]  }
 0x6a4   :  { %v4999_v35 = vsel %vm4909_vm7, %v4969_v28, 0.0 }
 0x6a5   :  { %v5000_v58 = vrot.slane %v4999_v35, 4  ;;  %v5006_v40 = vsel %vm4909_vm7, %v4970_v30, 0.0 }
 0x6a6   :  { %v5007_v42 = vrot.slane %v5006_v40, 4  ;;  %6406 = vmatpush1.bf16.msra.mxu1 %v9516_v32  ;;  %6529 = vmatpush1.bf16.msra.mxu0 %v9519_v31  ;;  %v5096_v32 = vrot.slane %v10499_v57, %v10524_v48  ;;  %v9566_v31 = vld [vmem:[#allocation9 + $0x5c4] ss:$16 sps:$4 sm:$0xff]   ;;  %v9575_v48 = vld [vmem:[#allocation9 + $0x5ec] ss:$16 sps:$4 sm:$0xff]  }
 0x6a7   :  { %v5001_v59 = vadd.f32 %v5000_v58, %v4999_v35  ;;  %6407 = vmatprep.subr.bf16.mxu1 %v9524_v34  ;;  %6530 = vmatprep.subr.bf16.mxu0 %v9527_v37  ;;  %v9569_v35 = vld [vmem:[#allocation9 + $0x5cc] ss:$16 sps:$4 sm:$0xff]   ;;  %v5100_v37 = vrot.slane %v10499_v57, %v10527_v33 }
 0x6a8   :  { %v5008_v39 = vadd.f32 %v5007_v42, %v5006_v40  ;;  %v9564_v40 = vld [vmem:[#allocation9 + $0x5c0] ss:$16 sps:$4 sm:$0xff]   ;;  %v9567_v42 = vld [vmem:[#allocation9 + $0x5c8] ss:$16 sps:$4 sm:$0xff]  }
 0x6a9   :  { %v5002_v47 = vrot.slane %v5001_v59, 2 }
 0x6aa   :  { %v5009_v50 = vrot.slane %v5008_v39, 2  ;;  %6408 = vmatpush1.bf16.msra.mxu1 %v9522_v16  ;;  %6531 = vmatpush1.bf16.msra.mxu0 %v9525_v11  ;;  %v9570_v11 = vld [vmem:[#allocation9 + $0x5e0] ss:$16 sps:$4 sm:$0xff]  }
 0x6ab   :  { %v5003_v41 = vadd.f32 %v5002_v47, %v5001_v59  ;;  %6409 = vmatprep.subr.bf16.mxu1 %v9530_v9  ;;  %6532 = vmatprep.subr.bf16.mxu0 %v9533_v44  ;;  %v9578_v44 = vld [vmem:[#allocation10 + $0x4] ss:$12 sps:$4 sm:$0xff]  }
 0x6ac   :  { %v5010_v62 = vadd.f32 %v5009_v50, %v5008_v39  ;;  %v9576_v50 = vld [vmem:[#allocation10] ss:$12 sps:$4 sm:$0xff]  }
 0x6ad   :  { %v5004_v25 = vrot.slane %v5003_v41, 1 }
 0x6ae   :  { %v5011_v38 = vrot.slane %v5010_v62, 1  ;;  %6410 = vmatpush1.bf16.msra.mxu1 %v9528_v43  ;;  %6533 = vmatpush1.bf16.msra.mxu0 %v9531_v19  ;;  %v9581_v43 = vld [vmem:[#allocation10 + $0x1c] ss:$12 sps:$4 sm:$0xff]   ;;  %v9579_v19 = vld [vmem:[#allocation10 + $0x18] ss:$12 sps:$4 sm:$0xff]  }
 0x6af   :  { %v5005_v55 = vadd.f32 %v5004_v25, %v5003_v41  ;;  %6411 = vmatprep.subr.bf16.mxu1 %v9536_v51  ;;  %6534 = vmatprep.subr.bf16.mxu0 %v9539_v52  ;;  %v9582_v51 = vld [vmem:[#allocation10 + $0x30] ss:$12 sps:$4 sm:$0xff]   ;;  %v9587_v52 = vld [vmem:[#allocation10 + $0x4c] ss:$12 sps:$4 sm:$0xff]   ;;  %v9585_v25 = vld [vmem:[#allocation10 + $0x48] ss:$12 sps:$4 sm:$0xff]  }
 0x6b0   :  { %v5012_v20 = vadd.f32 %v5011_v38, %v5010_v62  ;;  %v9584_v62 = vld [vmem:[#allocation10 + $0x34] ss:$12 sps:$4 sm:$0xff]   ;;  %v9590_v38 = vld [vmem:[#allocation10 + $0x64] ss:$12 sps:$4 sm:$0xff]  }
 0x6b1   :  { %v5017_v61 = vmul.f32 0.5, %v5005_v55  ;;  %v9588_v55 = vld [vmem:[#allocation10 + $0x60] ss:$12 sps:$4 sm:$0xff]  }
 0x6b2   :  { %v5018_v36 = vmul.f32 0.5, %v5012_v20  ;;  %6412 = vmatpush1.bf16.msra.mxu1 %v9534_v0  ;;  %6535 = vmatpush1.bf16.msra.mxu0 %v9537_v56  ;;  %v9593_v0 = vld [vmem:[#allocation10 + $0x7c] ss:$12 sps:$4 sm:$0xff]   ;;  %v9591_v56 = vld [vmem:[#allocation10 + $0x78] ss:$12 sps:$4 sm:$0xff]  }
 0x6b3   :  { %v5023_v22 = vadd.f32 0.9, %v5017_v61  ;;  %6413 = vmatprep.subr.bf16.mxu1 %v9542_v45  ;;  %6536 = vmatprep.subr.bf16.mxu0 %v9545_v60  ;;  %v9596_v20 = vld [vmem:[#allocation10 + $0x94] ss:$12 sps:$4 sm:$0xff]   ;;  %v9594_v45 = vld [vmem:[#allocation10 + $0x90] ss:$12 sps:$4 sm:$0xff]  }
 0x6b4   :  { %v5024_v4 = vadd.f32 0.9, %v5018_v36  ;;  %v9599_v60 = vld [vmem:[#allocation10 + $0xac] ss:$12 sps:$4 sm:$0xff]   ;;  %v9597_v61 = vld [vmem:[#allocation10 + $0xa8] ss:$12 sps:$4 sm:$0xff]  }
 0x6b5   :  { %9736 = vrsqrt.f32 %v5023_v22  ;;  %v9602_v36 = vld [vmem:[#allocation10 + $0xc4] ss:$12 sps:$4 sm:$0xff]   ;;  %v9600_v22 = vld [vmem:[#allocation10 + $0xc0] ss:$12 sps:$4 sm:$0xff]  }
 0x6b6   :  { %9738 = vrsqrt.f32 %v5024_v4  ;;  %6414 = vmatpush1.bf16.msra.mxu1 %v9540_v2  ;;  %6537 = vmatpush1.bf16.msra.mxu0 %v9543_v46  ;;  %v9603_v2 = vld [vmem:[#allocation10 + $0xc8] ss:$12 sps:$4 sm:$0xff]  }
 0x6b7   :  { %6415 = vmatprep.subr.bf16.mxu1 %v9548_v6  ;;  %6538 = vmatprep.subr.bf16.mxu0 %v9551_v49  ;;  %v9604_v46 = vld [vmem:[#allocation10 + $0x8] ss:$12 sps:$4 sm:$0xff]   ;;  %v9605_v6 = vld [vmem:[#allocation10 + $0xd8] ss:$12 sps:$4 sm:$0xff]   ;;  %v9608_v49 = vld [vmem:[#allocation10 + $0xe0] ss:$12 sps:$4 sm:$0xff]  }
 0x6b8   :  { %v9607_v4 = vld [vmem:[#allocation10 + $0xdc] ss:$12 sps:$4 sm:$0xff]  }
 0x6ba   :  { %6416 = vmatpush1.bf16.msra.mxu1 %v9546_v8  ;;  %6539 = vmatpush1.bf16.msra.mxu0 %v9549_v24  ;;  %v9609_v8 = vld [vmem:[#allocation10 + $0x20] ss:$12 sps:$4 sm:$0xff]  }
 0x6bb   :  { %6417 = vmatprep.subr.bf16.mxu1 %v9554_v10  ;;  %6540 = vmatprep.subr.bf16.mxu0 %v9557_v12  ;;  %v9612_v24 = vld [vmem:[#allocation10 + $0xf4] ss:$12 sps:$4 sm:$0xff]   ;;  %v9610_v10 = vld [vmem:[#allocation10 + $0xf0] ss:$12 sps:$4 sm:$0xff]   ;;  %v9613_v12 = vld [vmem:[#allocation10 + $0xf8] ss:$12 sps:$4 sm:$0xff]  }
 0x6be   :  { %6418 = vmatpush1.bf16.msra.mxu1 %v9552_v13  ;;  %6541 = vmatpush1.bf16.msra.mxu0 %v9555_v53  ;;  %v9614_v13 = vld [vmem:[#allocation10 + $0x38] ss:$12 sps:$4 sm:$0xff]  }
 0x6bf   :  { %v9737_v7 = vpop.eup %9736  ;;  %6419 = vmatprep.subr.bf16.mxu1 %v9560_v63  ;;  %6542 = vmatprep.subr.bf16.mxu0 %v9563_v17  ;;  %v9617_v53 = vld [vmem:[#allocation10 + $0x10c] ss:$12 sps:$4 sm:$0xff]   ;;  %v9615_v63 = vld [vmem:[#allocation10 + $0x108] ss:$12 sps:$4 sm:$0xff]   ;;  %v9618_v17 = vld [vmem:[#allocation10 + $0x110] ss:$12 sps:$4 sm:$0xff]  }
 0x6c0   :  { %v9739_v28 = vpop.eup %9738  ;;  %v5035_v30 = vmul.f32 %v9737_v7, %v10535_v23  ;;  %v9572_v23 = vld [vmem:[#allocation9 + $0x5e4] ss:$16 sps:$4 sm:$0xff]   ;;  %v9620_v7 = vld [vmem:[#allocation10 + $0x120] ss:$12 sps:$4 sm:$0xff]  }
 0x6c1   :  { %v5036_v34 = vmul.f32 %v9739_v28, %v10537_v26  ;;  %v9573_v26 = vld [vmem:[#allocation9 + $0x5e8] ss:$16 sps:$4 sm:$0xff]  }
 0x6c2   :  { %v5073_v29 = vmul.f32 %v5058_v14, %v5035_v30  ;;  %6420 = vmatpush1.bf16.msra.mxu1 %v9558_v27  ;;  %6543 = vmatpush1.bf16.msra.mxu0 %v9561_v54  ;;  %v9619_v14 = vld [vmem:[#allocation10 + $0x50] ss:$12 sps:$4 sm:$0xff]   ;;  %v9623_v27 = vld [vmem:[#allocation10 + $0x128] ss:$12 sps:$4 sm:$0xff]   ;;  %v9628_v30 = vld [vmem:[#allocation10 + $0x140] ss:$12 sps:$4 sm:$0xff]  }
 0x6c3   :  { %v5074_v58 = vmul.f32 %v5062_v21, %v5036_v34  ;;  %6421 = vmatprep.subr.bf16.mxu1 %v9566_v31  ;;  %6544 = vmatprep.subr.bf16.mxu0 %v9569_v35  ;;  %v9622_v21 = vld [vmem:[#allocation10 + $0x124] ss:$12 sps:$4 sm:$0xff]   ;;  %v9624_v54 = vld [vmem:[#allocation10 + $0x68] ss:$12 sps:$4 sm:$0xff]   ;;  %v9629_v31 = vld [vmem:[#allocation10 + $0x80] ss:$12 sps:$4 sm:$0xff]  }
 0x6c4   :  { %v5111_v59 = vadd.f32 %v5096_v32, %v5073_v29  ;;  %v9627_v28 = vld [vmem:[#allocation10 + $0x13c] ss:$12 sps:$4 sm:$0xff]   ;;  %v9625_v32 = vld [vmem:[#allocation10 + $0x138] ss:$12 sps:$4 sm:$0xff]   ;;  %v9632_v35 = vld [vmem:[#allocation10 + $0x154] ss:$12 sps:$4 sm:$0xff]  }
 0x6c5   :  { %v5112_v16 = vadd.f32 %v5100_v37, %v5074_v58  ;;  %v9633_v34 = vld [vmem:[#allocation10 + $0x158] ss:$12 sps:$4 sm:$0xff]   ;;  %v9630_v37 = vld [vmem:[#allocation10 + $0x150] ss:$12 sps:$4 sm:$0xff]  }
 0x6c6   :  { %vm5117_vm12 = vcmp.ge.f32.partialorder %v5111_v59, 0.0  ;;  %v5123_v39 = vmul.f32 0.2, %v5111_v59  ;;  %6422 = vmatpush1.bf16.msra.mxu1 %v9564_v40  ;;  %6545 = vmatpush1.bf16.msra.mxu0 %v9567_v42  ;;  %v9634_v29 = vld [vmem:[#allocation10 + $0x98] ss:$12 sps:$4 sm:$0xff]  }
 0x6c7   :  { %vm5118_vm13 = vcmp.ge.f32.partialorder %v5112_v16, 0.0  ;;  %v5124_v57 = vmul.f32 0.2, %v5112_v16  ;;  %6423 = vmatprep.subr.bf16.mxu1 %v9572_v23  ;;  %6546 = vmatprep.subr.bf16.mxu0 %v9575_v48  ;;  %v9637_v58 = vld [vmem:[#allocation10 + $0x16c] ss:$12 sps:$4 sm:$0xff]  }
 0x6c8   :  { %v5129_v9 = vsel %vm5117_vm12, %v5111_v59, %v5123_v39  ;;  %v9638_v40 = vld [vmem:[#allocation10 + $0x170] ss:$12 sps:$4 sm:$0xff]   ;;  %v9635_v42 = vld [vmem:[#allocation10 + $0x168] ss:$12 sps:$4 sm:$0xff]  }
 0x6c9   :  { %v5130_v33 = vsel %vm5118_vm13, %v5112_v16, %v5124_v57  ;;  %v5135_v41 = vpack.c.bf16 %v5129_v9, %v5129_v9  ;;  %v9639_v59 = vld [vmem:[#allocation10 + $0xb0] ss:$12 sps:$4 sm:$0xff]  }
 0x6ca   :  { %v5136_v47 = vpack.c.bf16 %v5130_v33, %v5130_v33  ;;  %6424 = vmatpush1.bf16.msra.mxu1 %v9570_v11  ;;  %6547 = vmatpush1.bf16.msra.mxu0 %v9573_v26  ;;  %v9642_v23 = vld [vmem:[#allocation10 + $0x184] ss:$12 sps:$4 sm:$0xff]   ;;  %v5329_v48 = vld [vmem:[%s10733_s12] sm:$0xf] }
 0x6cb   :  { %7366 = vmatprep.subr.bf16.mxu1 %v9578_v44  ;;  %8614 = vmatprep.subr.bf16.mxu0 %v9603_v2  ;;  %v5334_v16 = vrot.slane %v5329_v48, %v10085_v18  ;;  %v5342_v11 = vrot.slane %v5329_v48, %v10431_v3  ;;  %v5338_v39 = vrot.slane %v5329_v48, %v10437_v15 }
 0x6cc   :  { %6425 = vmatprep.mubr.bf16.mxu1 %v5136_v47  ;;  %6548 = vmatprep.mubr.bf16.mxu0 %v5136_v47  ;;  %v5346_v26 = vrot.slane %v5329_v48, %v10440_v5 }
 0x6cd   :  { %6426 = vmatmul.mubr.bf16.vlgmr.msra.gmra.mrb[104].mxu1 %v5135_v41  ;;  %6549 = vmatmul.mubr.bf16.vlgmr.msra.gmra.mrb[108].mxu0 %v5135_v41 }
 0x6ce   :  { %7367 = vmatpush1.bf16.msra.mxu1 %v9576_v50  ;;  %8615 = vmatpush3.bf16.msra.mxu0 %v9604_v46 }
 0x6cf   :  { %7368 = vmatprep.subr.bf16.mxu1 %v9581_v43  ;;  %8616 = vmatprep.subr.bf16.mxu0 %v9608_v49 }
 0x6d2   :  { %7369 = vmatpush1.bf16.msra.mxu1 %v9579_v19  ;;  %8617 = vmatpush3.bf16.msra.mxu0 %v9609_v8 }
 0x6d3   :  { %7370 = vmatprep.subr.bf16.mxu1 %v9584_v62  ;;  %8618 = vmatprep.subr.bf16.mxu0 %v9613_v12 }
 0x6d6   :  { %7371 = vmatpush1.bf16.msra.mxu1 %v9582_v51  ;;  %8619 = vmatpush3.bf16.msra.mxu0 %v9614_v13 }
 0x6d7   :  { %7372 = vmatprep.subr.bf16.mxu1 %v9587_v52  ;;  %8620 = vmatprep.subr.bf16.mxu0 %v9618_v17 }
 0x6da   :  { %7373 = vmatpush1.bf16.msra.mxu1 %v9585_v25  ;;  %8621 = vmatpush3.bf16.msra.mxu0 %v9619_v14 }
 0x6db   :  { %7374 = vmatprep.subr.bf16.mxu1 %v9590_v38  ;;  %8622 = vmatprep.subr.bf16.mxu0 %v9623_v27 }
 0x6de   :  { %7375 = vmatpush1.bf16.msra.mxu1 %v9588_v55  ;;  %8623 = vmatpush3.bf16.msra.mxu0 %v9624_v54 }
 0x6df   :  { %7376 = vmatprep.subr.bf16.mxu1 %v9593_v0  ;;  %8624 = vmatprep.subr.bf16.mxu0 %v9628_v30 }
 0x6e2   :  { %7377 = vmatpush1.bf16.msra.mxu1 %v9591_v56  ;;  %8625 = vmatpush3.bf16.msra.mxu0 %v9629_v31 }
 0x6e3   :  { %7378 = vmatprep.subr.bf16.mxu1 %v9596_v20  ;;  %8626 = vmatprep.subr.bf16.mxu0 %v9633_v34 }
 0x6e6   :  { %7379 = vmatpush1.bf16.msra.mxu1 %v9594_v45  ;;  %8627 = vmatpush3.bf16.msra.mxu0 %v9634_v29 }
 0x6e7   :  { %7380 = vmatprep.subr.bf16.mxu1 %v9599_v60  ;;  %8628 = vmatprep.subr.bf16.mxu0 %v9638_v40 }
 0x6ea   :  { %7381 = vmatpush1.bf16.msra.mxu1 %v9597_v61  ;;  %8629 = vmatpush3.bf16.msra.mxu0 %v9639_v59 }
 0x6eb   :  { %7382 = vmatprep.subr.bf16.mxu1 %v9602_v36 }
 0x6ee   :  { %7383 = vmatpush1.bf16.msra.mxu1 %v9600_v22 }
 0x6ef   :  { %7384 = vmatprep.subr.bf16.mxu1 %v9607_v4 }
 0x6f2   :  { %7385 = vmatpush1.bf16.msra.mxu1 %v9605_v6 }
 0x6f3   :  { %7386 = vmatprep.subr.bf16.mxu1 %v9612_v24 }
 0x6f6   :  { %7387 = vmatpush1.bf16.msra.mxu1 %v9610_v10 }
 0x6f7   :  { %7388 = vmatprep.subr.bf16.mxu1 %v9617_v53 }
 0x6fa   :  { %7389 = vmatpush1.bf16.msra.mxu1 %v9615_v63 }
 0x6fb   :  { %7390 = vmatprep.subr.bf16.mxu1 %v9622_v21 }
 0x6fe   :  { %7391 = vmatpush1.bf16.msra.mxu1 %v9620_v7 }
 0x6ff   :  { %7392 = vmatprep.subr.bf16.mxu1 %v9627_v28 }
 0x702   :  { %7393 = vmatpush1.bf16.msra.mxu1 %v9625_v32 }
 0x703   :  { %7394 = vmatprep.subr.bf16.mxu1 %v9632_v35 }
 0x706   :  { %7395 = vmatpush1.bf16.msra.mxu1 %v9630_v37 }
 0x707   :  { %7396 = vmatprep.subr.bf16.mxu1 %v9637_v58 }
 0x70a   :  { %7397 = vmatpush1.bf16.msra.mxu1 %v9635_v42 }
 0x70b   :  { %7407 = vmatprep.subr.bf16.mxu1 %v9642_v23 }
 0x7a0   :  { %v6427_v57 = vpop.f32.mrb[104].mxu1  ;;  %v6550_v33 = vpop.f32.mrb[108].mxu0 }
 0x7a1   :  { %v8743_v9 = vadd.f32 %v6427_v57, %v5334_v16  ;;  %v8745_v44 = vadd.f32 %v6550_v33, %v5342_v11  ;;  %v6429_v47 = vpop.f32.mrb[105].mxu1  ;;  %v6552_v50 = vpop.f32.mrb[109].mxu0 }
 0x7a2   :  { %v8744_v41 = vadd.f32 %v6429_v47, %v5338_v39  ;;  %v8746_v43 = vadd.f32 %v6552_v50, %v5346_v26  ;;  %v6431_v19 = vpop.f32.mrb[106].mxu1  ;;  %v6554_v62 = vpop.f32.mrb[110].mxu0 }
 0x7a3   :  { %v6557_v51 = vsel %vm4909_vm7, %v8743_v9, 0.0  ;;  %v6571_v52 = vsel %vm4909_vm7, %v8745_v44, 0.0  ;;  %v6432_v25 = vpop.f32.mrb[107].mxu1  ;;  %v6555_v38 = vpop.f32.mrb[111].mxu0 }
 0x7a4   :  { %v6558_v55 = vrot.slane %v6557_v51, 4  ;;  %v6572_v0 = vrot.slane %v6571_v52, 4  ;;  %v6564_v56 = vsel %vm4909_vm7, %v8744_v41, 0.0  ;;  %v6578_v20 = vsel %vm4909_vm7, %v8746_v43, 0.0 }
 0x7a5   :  { %v6565_v45 = vrot.slane %v6564_v56, 4  ;;  %v6579_v60 = vrot.slane %v6578_v20, 4 }
 0x7a6   :  { %v6559_v61 = vadd.f32 %v6558_v55, %v6557_v51  ;;  %v6573_v36 = vadd.f32 %v6572_v0, %v6571_v52 }
 0x7a7   :  { %v6566_v22 = vadd.f32 %v6565_v45, %v6564_v56  ;;  %v6580_v2 = vadd.f32 %v6579_v60, %v6578_v20 }
 0x7a8   :  { %v6560_v46 = vrot.slane %v6559_v61, 2  ;;  %v6574_v4 = vrot.slane %v6573_v36, 2 }
 0x7a9   :  { %v6567_v6 = vrot.slane %v6566_v22, 2  ;;  %v6581_v49 = vrot.slane %v6580_v2, 2 }
 0x7aa   :  { %v6561_v8 = vadd.f32 %v6560_v46, %v6559_v61  ;;  %v6575_v24 = vadd.f32 %v6574_v4, %v6573_v36 }
 0x7ab   :  { %v6568_v10 = vadd.f32 %v6567_v6, %v6566_v22  ;;  %v6582_v12 = vadd.f32 %v6581_v49, %v6580_v2 }
 0x7ac   :  { %v6562_v13 = vrot.slane %v6561_v8, 1  ;;  %v6576_v53 = vrot.slane %v6575_v24, 1 }
 0x7ad   :  { %v6569_v63 = vrot.slane %v6568_v10, 1  ;;  %v6583_v17 = vrot.slane %v6582_v12, 1 }
 0x7ae   :  { %v6563_v14 = vadd.f32 %v6562_v13, %v6561_v8  ;;  %v6577_v7 = vadd.f32 %v6576_v53, %v6575_v24  ;;  %v6641_v24 = vld [vmem:[%s10734_s13] sm:$0xf]  ;;  %s9895_s13 = smov [#allocation12]  }
 0x7af   :  { %v6570_v21 = vadd.f32 %v6569_v63, %v6568_v10  ;;  %v6584_v27 = vadd.f32 %v6583_v17, %v6582_v12  ;;  %v6667_v10 = vld [vmem:[%s10735_s14] sm:$0xf]  ;;  %v6646_v12 = vrot.slane %v6641_v24, %v10085_v18  ;;  %v6654_v53 = vrot.slane %v6641_v24, %v10431_v3  ;;  %s7933_s14 = sshll.u32 %s9895_s13, 4  ;;  %s7934_s14 = int_to_ptr.vmem [resolvable:$true] %s7933_s14 }
 0x7b0   :  { %v6585_v54 = vmul.f32 0.5, %v6563_v14  ;;  %v6587_v28 = vmul.f32 0.5, %v6577_v7  ;;  %v6672_v14 = vrot.slane %v6667_v10, %v10085_v18  ;;  %v6650_v7 = vrot.slane %v6641_v24, %v10437_v15  ;;  %s9842_s30 = scalar_lea.vmem %s7934_s14, 32  ;;  %p9847_p5 = scmp.lt.s32.totalorder %s7934_s14, %s7934_s14 }
 0x7b1   :  { %v6586_v30 = vmul.f32 0.5, %v6570_v21  ;;  %v6588_v32 = vmul.f32 0.5, %v6584_v27  ;;  %p9843_p4 = scmp.ne.s32.totalorder %s7934_s14, %s9842_s30  ;;  %p9848_p6 = scmp.lt.s32.totalorder %s9842_s30, %s9842_s30 }
 0x7b2   :  { %v6589_v31 = vsub.f32 %v8743_v9, %v6585_v54  ;;  %v6591_v35 = vsub.f32 %v8745_v44, %v6587_v28  ;;  %v6680_v54 = vrot.slane %v6667_v10, %v10431_v3  ;;  %v6658_v28 = vrot.slane %v6641_v24, %v10440_v5  ;;  %v9681_v24 = vld [vmem:[#allocation10 + $0x2bc] ss:$12 sps:$4 sm:$0xff]  }
 0x7b3   :  { %v6590_v34 = vsub.f32 %v8744_v41, %v6586_v30  ;;  %v10566_v37 = vsub.f32 %v8746_v43, %v6588_v32  ;;  %p9849_p7 = por %p9848_p6, %p9847_p5 }
 0x7b4   :  { %v6593_v29 = vmul.f32 %v6589_v31, %v6589_v31  ;;  %v6595_v58 = vmul.f32 %v6591_v35, %v6591_v35 }
 0x7b5   :  { %v6594_v40 = vmul.f32 %v6590_v34, %v6590_v34  ;;  %v6596_v42 = vmul.f32 %v10566_v37, %v10566_v37  ;;  %p9850_p8 = pnand %p9849_p7, %p9843_p4 }
 0x7b6   :  { %v6597_v59 = vsel %vm4909_vm7, %v6593_v29, 0.0  ;;  %v6611_v23 = vsel %vm4909_vm7, %v6595_v58, 0.0  ;;  %v6676_v58 = vrot.slane %v6667_v10, %v10437_v15 }
 0x7b7   :  { %v6598_v48 = vrot.slane %v6597_v59, 4  ;;  %v6612_v16 = vrot.slane %v6611_v23, 4  ;;  %v6604_v11 = vsel %vm4909_vm7, %v6594_v40, 0.0  ;;  %v6618_v39 = vsel %vm4909_vm7, %v6596_v42, 0.0 }
 0x7b8   :  { %v6605_v26 = vrot.slane %v6604_v11, 4  ;;  %v6619_v57 = vrot.slane %v6618_v39, 4 }
 0x7b9   :  { %v6599_v33 = vadd.f32 %v6598_v48, %v6597_v59  ;;  %v6613_v9 = vadd.f32 %v6612_v16, %v6611_v23 }
 0x7ba   :  { %v6606_v44 = vadd.f32 %v6605_v26, %v6604_v11  ;;  %v6620_v47 = vadd.f32 %v6619_v57, %v6618_v39 }
 0x7bb   :  { %v6600_v50 = vrot.slane %v6599_v33, 2  ;;  %v6614_v41 = vrot.slane %v6613_v9, 2 }
 0x7bc   :  { %v6607_v43 = vrot.slane %v6606_v44, 2  ;;  %v6621_v19 = vrot.slane %v6620_v47, 2 }
 0x7bd   :  { %v6601_v62 = vadd.f32 %v6600_v50, %v6599_v33  ;;  %v6615_v51 = vadd.f32 %v6614_v41, %v6613_v9  ;;  %v9643_v41 = vld [vmem:[#allocation10 + $0x198] ss:$12 sps:$4 sm:$0xff]  }
 0x7be   :  { %v6608_v52 = vadd.f32 %v6607_v43, %v6606_v44  ;;  %v6622_v25 = vadd.f32 %v6621_v19, %v6620_v47  ;;  %v9640_v44 = vld [vmem:[#allocation10 + $0x180] ss:$12 sps:$4 sm:$0xff]   ;;  %v9646_v19 = vld [vmem:[#allocation10 + $0x1b0] ss:$12 sps:$4 sm:$0xff]  }
 0x7bf   :  { %v6602_v38 = vrot.slane %v6601_v62, 1  ;;  %v6616_v55 = vrot.slane %v6615_v51, 1  ;;  %v9648_v43 = vld [vmem:[#allocation10 + $0x1b4] ss:$12 sps:$4 sm:$0xff]  }
 0x7c0   :  { %v6609_v0 = vrot.slane %v6608_v52, 1  ;;  %v6623_v56 = vrot.slane %v6622_v25, 1 }
 0x7c1   :  { %v6603_v20 = vadd.f32 %v6602_v38, %v6601_v62  ;;  %v6617_v45 = vadd.f32 %v6616_v55, %v6615_v51  ;;  %v9651_v62 = vld [vmem:[#allocation10 + $0x1cc] ss:$12 sps:$4 sm:$0xff]   ;;  %v9649_v51 = vld [vmem:[#allocation10 + $0x1c8] ss:$12 sps:$4 sm:$0xff]  }
 0x7c2   :  { %v6610_v60 = vadd.f32 %v6609_v0, %v6608_v52  ;;  %v6624_v61 = vadd.f32 %v6623_v56, %v6622_v25  ;;  %v9654_v52 = vld [vmem:[#allocation10 + $0x1e4] ss:$12 sps:$4 sm:$0xff]   ;;  %v9652_v25 = vld [vmem:[#allocation10 + $0x1e0] ss:$12 sps:$4 sm:$0xff]   ;;  %v9657_v38 = vld [vmem:[#allocation10 + $0x1fc] ss:$12 sps:$4 sm:$0xff]  }
 0x7c3   :  { %v6625_v36 = vmul.f32 0.5, %v6603_v20  ;;  %v6627_v22 = vmul.f32 0.5, %v6617_v45  ;;  %v9655_v55 = vld [vmem:[#allocation10 + $0x1f8] ss:$12 sps:$4 sm:$0xff]   ;;  %v9660_v0 = vld [vmem:[#allocation10 + $0x214] ss:$12 sps:$4 sm:$0xff]  }
 0x7c4   :  { %v6626_v2 = vmul.f32 0.5, %v6610_v60  ;;  %v6628_v46 = vmul.f32 0.5, %v6624_v61  ;;  %v9658_v56 = vld [vmem:[#allocation10 + $0x210] ss:$12 sps:$4 sm:$0xff]   ;;  %v9663_v20 = vld [vmem:[#allocation10 + $0x22c] ss:$12 sps:$4 sm:$0xff]  }
 0x7c5   :  { %v6629_v4 = vadd.f32 0.9, %v6625_v36  ;;  %v6631_v6 = vadd.f32 0.9, %v6627_v22  ;;  %v9661_v45 = vld [vmem:[#allocation10 + $0x228] ss:$12 sps:$4 sm:$0xff]  }
 0x7c6   :  { %v6630_v49 = vadd.f32 0.9, %v6626_v2  ;;  %v6632_v8 = vadd.f32 0.9, %v6628_v46  ;;  %v9666_v60 = vld [vmem:[#allocation10 + $0x244] ss:$12 sps:$4 sm:$0xff]  }
 0x7c7   :  { %9740 = vrsqrt.f32 %v6629_v4  ;;  %v9664_v61 = vld [vmem:[#allocation10 + $0x240] ss:$12 sps:$4 sm:$0xff]   ;;  %v9669_v36 = vld [vmem:[#allocation10 + $0x25c] ss:$12 sps:$4 sm:$0xff]   ;;  %v9667_v22 = vld [vmem:[#allocation10 + $0x258] ss:$12 sps:$4 sm:$0xff]  }
 0x7c8   :  { %9742 = vrsqrt.f32 %v6631_v6  ;;  %v9672_v2 = vld [vmem:[#allocation10 + $0x274] ss:$12 sps:$4 sm:$0xff]   ;;  %v9670_v46 = vld [vmem:[#allocation10 + $0x270] ss:$12 sps:$4 sm:$0xff]   ;;  %v9675_v4 = vld [vmem:[#allocation10 + $0x28c] ss:$12 sps:$4 sm:$0xff]  }
 0x7c9   :  { %9744 = vrsqrt.f32 %v6630_v49  ;;  %v9673_v6 = vld [vmem:[#allocation10 + $0x288] ss:$12 sps:$4 sm:$0xff]   ;;  %v9678_v49 = vld [vmem:[#allocation10 + $0x2a4] ss:$12 sps:$4 sm:$0xff]  }
 0x7ca   :  { %9746 = vrsqrt.f32 %v6632_v8  ;;  %v9676_v8 = vld [vmem:[#allocation10 + $0x2a0] ss:$12 sps:$4 sm:$0xff]  }
 0x7d1   :  { %v9741_v13 = vpop.eup %9740 }
 0x7d2   :  { %v9743_v63 = vpop.eup %9742  ;;  %v6637_v17 = vmul.f32 %v9741_v13, %v6589_v31  ;;  %v6684_v31 = vrot.slane %v6667_v10, %v10440_v5  ;;  %v9645_v5 = vld [vmem:[#allocation10 + $0x19c] ss:$12 sps:$4 sm:$0xff]   ;;  %v9679_v10 = vld [vmem:[#allocation10 + $0x2b8] ss:$12 sps:$4 sm:$0xff]  }
 0x7d3   :  { %v9745_v21 = vpop.eup %9744  ;;  %v6639_v27 = vmul.f32 %v9743_v63, %v6591_v35  ;;  %v9682_v13 = vld [vmem:[#allocation10 + $0x2d0] ss:$12 sps:$4 sm:$0xff]  }
 0x7d4   :  { %v9747_v30 = vpop.eup %9746  ;;  %v6663_v32 = vmul.f32 %v6646_v12, %v6637_v17  ;;  %v6638_v29 = vmul.f32 %v9745_v21, %v6590_v34  ;;  %v9684_v12 = vld [vmem:[#allocation10 + $0x2d4] ss:$12 sps:$4 sm:$0xff]  }
 0x7d5   :  { %v6665_v40 = vmul.f32 %v6654_v53, %v6639_v27  ;;  %v6640_v42 = vmul.f32 %v9747_v30, %v10566_v37  ;;  %v9687_v53 = vld [vmem:[#allocation10 + $0x2ec] ss:$12 sps:$4 sm:$0xff]   ;;  %v9685_v17 = vld [vmem:[#allocation10 + $0x2e8] ss:$12 sps:$4 sm:$0xff]  }
 0x7d6   :  { %v6689_v59 = vadd.f32 %v6672_v14, %v6663_v32  ;;  %v6664_v23 = vmul.f32 %v6650_v7, %v6638_v29  ;;  %v9688_v14 = vld [vmem:[#allocation10 + $0x248] ss:$12 sps:$4 sm:$0xff]   ;;  %v9692_v30 = vld [vmem:[#allocation10 + $0x278] ss:$12 sps:$4 sm:$0xff]   ;;  %v9694_v29 = vld [vmem:[#allocation10 + $0x290] ss:$12 sps:$4 sm:$0xff]  }
 0x7d7   :  { %v10589_v48 = vadd.f32 %v6680_v54, %v6665_v40  ;;  %v6666_v16 = vmul.f32 %v6658_v28, %v6640_v42  ;;  %v9689_v21 = vld [vmem:[#allocation10 + $0x188] ss:$12 sps:$4 sm:$0xff]   ;;  %v9690_v54 = vld [vmem:[#allocation10 + $0x260] ss:$12 sps:$4 sm:$0xff]   ;;  %v9693_v32 = vld [vmem:[#allocation10 + $0x1b8] ss:$12 sps:$4 sm:$0xff]  }
 0x7d8   :  { %v6690_v35 = vadd.f32 %v6676_v58, %v6664_v23  ;;  %vm6693_vm14 = vcmp.ge.f32.partialorder %v6689_v59, 0.0  ;;  %v6697_v11 = vmul.f32 0.2, %v6689_v59  ;;  %v9691_v28 = vld [vmem:[#allocation10 + $0x1a0] ss:$12 sps:$4 sm:$0xff]  }
 0x7d9   :  { %v6692_v39 = vadd.f32 %v6684_v31, %v6666_v16  ;;  %v6699_v63 = vmul.f32 0.2, %v10589_v48  ;;  %vm6695_vm1 = vcmp.ge.f32.partialorder %v10589_v48, 0.0  ;;  %v9695_v58 = vld [vmem:[#allocation10 + $0x1d0] ss:$12 sps:$4 sm:$0xff]  }
 0x7da   :  { %vm6694_vm15 = vcmp.ge.f32.partialorder %v6690_v35, 0.0  ;;  %v6698_v26 = vmul.f32 0.2, %v6690_v35  ;;  %v6701_v57 = vsel %vm6693_vm14, %v6689_v59, %v6697_v11  ;;  %v9696_v40 = vld [vmem:[#allocation10 + $0x2a8] ss:$12 sps:$4 sm:$0xff]   ;;  %v9704_v11 = vld [vmem:[%s10740_s19 + $0x40] sm:$0xff]  }
 0x7db   :  { %vm6696_vm0 = vcmp.ge.f32.partialorder %v6692_v39, 0.0  ;;  %v6700_v34 = vmul.f32 0.2, %v6692_v39  ;;  %v6705_v47 = vpack.c.bf16 %v6701_v57, %v6701_v57  ;;  %v6703_v7 = vsel %vm6695_vm1, %v10589_v48, %v6699_v63  ;;  %v9697_v42 = vld [vmem:[#allocation10 + $0x1e8] ss:$12 sps:$4 sm:$0xff]   ;;  %8658 = vmatprep.subr.bf16.mxu0 %v9704_v11 }
 0x7dc   :  { %v6702_v33 = vsel %vm6694_vm15, %v6690_v35, %v6698_v26  ;;  %v6707_v27 = vpack.c.bf16 %v6703_v7, %v6703_v7  ;;  %v9698_v31 = vld [vmem:[#allocation10 + $0x2c0] ss:$12 sps:$4 sm:$0xff]   ;;  %v9700_v23 = vld [vmem:[#allocation10 + $0x2d8] ss:$12 sps:$4 sm:$0xff]   ;;  %v9702_v16 = vld [vmem:[#allocation10 + $0x2f0] ss:$12 sps:$4 sm:$0xff]  }
 0x7dd   :  { %v6706_v9 = vpack.c.bf16 %v6702_v33, %v6702_v33  ;;  %v6704_v37 = vsel %vm6696_vm0, %v6692_v39, %v6700_v34  ;;  %v9699_v59 = vld [vmem:[#allocation10 + $0x200] ss:$12 sps:$4 sm:$0xff]   ;;  %v9701_v48 = vld [vmem:[#allocation10 + $0x218] ss:$12 sps:$4 sm:$0xff]   ;;  %v9703_v35 = vld [vmem:[#allocation10 + $0x230] ss:$12 sps:$4 sm:$0xff]  }
 0x7de   :  { %v10591_v50 = vpack.c.bf16 %v6704_v37, %v6704_v37  ;;  %v9705_v39 = vld [vmem:[%s10740_s19] sm:$0xff]   ;;  %v9706_v26 = vld [vmem:[%s10740_s19 + $0x48] sm:$0xff]   ;;  %v9708_v34 = vld [vmem:[%s10740_s19 + $0x50] sm:$0xff]  }
 0x7df   :  { %7398 = vmatprep.mubr.bf16.mxu1 %v6706_v9  ;;  %7480 = vmatprep.mubr.bf16.mxu0 %v6706_v9  ;;  %v9707_v57 = vld [vmem:[%s10740_s19 + $0x8] sm:$0xff]   ;;  %v9709_v33 = vld [vmem:[%s10740_s19 + $0x10] sm:$0xff]   ;;  %v9710_v9 = vld [vmem:[%s10740_s19 + $0x58] sm:$0xff]  }
 0x7e0   :  { %7399 = vmatmul.mubr.bf16.vlgmr.msra.gmra.mrb[108].mxu1 %v6705_v47  ;;  %7481 = vmatmul.mubr.bf16.vlgmr.msra.gmra.mrb[112].mxu0 %v6705_v47  ;;  %v9712_v37 = vld [vmem:[%s10740_s19 + $0x60] sm:$0xff]  }
 0x7e1   :  { %7408 = vmatpush1.bf16.msra.mxu1 %v9640_v44  ;;  %7439 = vmatprep.mubr.bf16.mxu1 %v10591_v50  ;;  %v9711_v44 = vld [vmem:[%s10740_s19 + $0x18] sm:$0xff]   ;;  %v9713_v47 = vld [vmem:[%s10740_s19 + $0x20] sm:$0xff]  }
 0x7e2   :  { %7409 = vmatprep.subr.bf16.mxu1 %v9645_v5  ;;  %8659 = vmatpush3.bf16.msra.mxu0 %v9705_v39  ;;  %v9714_v5 = vld [vmem:[%s10740_s19 + $0x68] sm:$0xff]  }
 0x7e3   :  { %8660 = vmatprep.subr.bf16.mxu0 %v9706_v26 }
 0x7e5   :  { %7410 = vmatpush1.bf16.msra.mxu1 %v9643_v41 }
 0x7e6   :  { %7411 = vmatprep.subr.bf16.mxu1 %v9648_v43  ;;  %8661 = vmatpush3.bf16.msra.mxu0 %v9707_v57  ;;  %v9716_v43 = vld [vmem:[%s10740_s19 + $0x70] sm:$0xff]  }
 0x7e7   :  { %8662 = vmatprep.subr.bf16.mxu0 %v9708_v34 }
 0x7e9   :  { %7412 = vmatpush1.bf16.msra.mxu1 %v9646_v19 }
 0x7ea   :  { %7413 = vmatprep.subr.bf16.mxu1 %v9651_v62  ;;  %8663 = vmatpush3.bf16.msra.mxu0 %v9709_v33  ;;  %v9717_v62 = vld [vmem:[%s10740_s19 + $0x30] sm:$0xff]  }
 0x7eb   :  { %8664 = vmatprep.subr.bf16.mxu0 %v9710_v9 }
 0x7ed   :  { %7414 = vmatpush1.bf16.msra.mxu1 %v9649_v51 }
 0x7ee   :  { %7415 = vmatprep.subr.bf16.mxu1 %v9654_v52  ;;  %8665 = vmatpush3.bf16.msra.mxu0 %v9711_v44 }
 0x7ef   :  { %8666 = vmatprep.subr.bf16.mxu0 %v9712_v37 }
 0x7f1   :  { %7416 = vmatpush1.bf16.msra.mxu1 %v9652_v25 }
 0x7f2   :  { %7417 = vmatprep.subr.bf16.mxu1 %v9657_v38  ;;  %8667 = vmatpush3.bf16.msra.mxu0 %v9713_v47  ;;  %v9718_v38 = vld [vmem:[%s10740_s19 + $0x78] sm:$0xff]  }
 0x7f3   :  { %8668 = vmatprep.subr.bf16.mxu0 %v9714_v5 }
 0x7f5   :  { %7418 = vmatpush1.bf16.msra.mxu1 %v9655_v55  ;;  %v9719_v55 = vld [vmem:[%s10740_s19 + $0x38] sm:$0xff]  }
 0x7f6   :  { %7419 = vmatprep.subr.bf16.mxu1 %v9660_v0  ;;  %v9720_v0 = vld [vmem:[%s10740_s19 + $0x80] sm:$0xff]  }
 0x7f9   :  { %7420 = vmatpush1.bf16.msra.mxu1 %v9658_v56  ;;  %v9721_v56 = vld [vmem:[%s10740_s19 + $0x88] sm:$0xff]  }
 0x7fa   :  { %7421 = vmatprep.subr.bf16.mxu1 %v9663_v20  ;;  %v9722_v20 = vld [vmem:[%s10740_s19 + $0x90] sm:$0xff]  }
 0x7fd   :  { %7422 = vmatpush1.bf16.msra.mxu1 %v9661_v45  ;;  %v9723_v45 = vld [vmem:[%s10740_s19 + $0x98] sm:$0xff]  }
 0x7fe   :  { %7423 = vmatprep.subr.bf16.mxu1 %v9666_v60  ;;  %v9724_v60 = vld [vmem:[%s10740_s19 + $0xa0] sm:$0xff]  }
 0x801   :  { %7424 = vmatpush1.bf16.msra.mxu1 %v9664_v61  ;;  %v9725_v61 = vld [vmem:[%s10740_s19 + $0xa8] sm:$0xff]  }
 0x802   :  { %7425 = vmatprep.subr.bf16.mxu1 %v9669_v36  ;;  %v9726_v36 = vld [vmem:[%s10740_s19 + $0xb0] sm:$0xff]  }
 0x805   :  { %7426 = vmatpush1.bf16.msra.mxu1 %v9667_v22  ;;  %v9727_v22 = vld [vmem:[%s10740_s19 + $0xb8] sm:$0xff]  }
 0x806   :  { %7427 = vmatprep.subr.bf16.mxu1 %v9672_v2  ;;  %v6837_v2 = vld [vmem:[%s10737_s16] sm:$0x7] }
 0x807   :  { %v6850_v9 = vrot.slane %v6837_v2, %v10431_v3 }
 0x809   :  { %7428 = vmatpush1.bf16.msra.mxu1 %v9670_v46  ;;  %v6842_v46 = vrot.slane %v6837_v2, %v10085_v18 }
 0x80a   :  { %7429 = vmatprep.subr.bf16.mxu1 %v9675_v4  ;;  %v6846_v4 = vrot.slane %v6837_v2, %v10437_v15  ;;  %v7611_v2 = vld [vmem:[%s10739_s18] sm:$0x7] }
 0x80d   :  { %7430 = vmatpush1.bf16.msra.mxu1 %v9673_v6 }
 0x80e   :  { %7431 = vmatprep.subr.bf16.mxu1 %v9678_v49 }
 0x811   :  { %7432 = vmatpush1.bf16.msra.mxu1 %v9676_v8 }
 0x812   :  { %7433 = vmatprep.subr.bf16.mxu1 %v9681_v24 }
 0x815   :  { %7434 = vmatpush1.bf16.msra.mxu1 %v9679_v10 }
 0x816   :  { %7435 = vmatprep.subr.bf16.mxu1 %v9684_v12 }
 0x819   :  { %7436 = vmatpush1.bf16.msra.mxu1 %v9682_v13 }
 0x81a   :  { %7437 = vmatprep.subr.bf16.mxu1 %v9687_v53 }
 0x81d   :  { %7438 = vmatpush1.bf16.msra.mxu1 %v9685_v17 }
 0x81e   :  { %8636 = vmatprep.subr.bf16.mxu1 %v9688_v14 }
 0x820   :  { %7440 = vmatmul.mubr.bf16.vlgmr.msra.gmra.mrb[108].mxu1 %v6707_v27 }
 0x821   :  { %8637 = vmatpush3.bf16.msra.mxu1 %v9689_v21  ;;  %7520 = vmatprep.mubr.bf16.mxu1 %v10591_v50  ;;  %v9715_v50 = vld [vmem:[%s10740_s19 + $0x28] sm:$0xff]  }
 0x822   :  { %8638 = vmatprep.subr.bf16.mxu1 %v9690_v54  ;;  %8669 = vmatpush3.bf16.msra.mxu0 %v9715_v50 }
 0x823   :  { %8670 = vmatprep.subr.bf16.mxu0 %v9716_v43 }
 0x825   :  { %8639 = vmatpush3.bf16.msra.mxu1 %v9691_v28 }
 0x826   :  { %8640 = vmatprep.subr.bf16.mxu1 %v9692_v30  ;;  %8671 = vmatpush3.bf16.msra.mxu0 %v9717_v62 }
 0x827   :  { %8672 = vmatprep.subr.bf16.mxu0 %v9718_v38 }
 0x829   :  { %8641 = vmatpush3.bf16.msra.mxu1 %v9693_v32 }
 0x82a   :  { %8642 = vmatprep.subr.bf16.mxu1 %v9694_v29  ;;  %8673 = vmatpush3.bf16.msra.mxu0 %v9719_v55 }
 0x82d   :  { %8643 = vmatpush3.bf16.msra.mxu1 %v9695_v58 }
 0x82e   :  { %8644 = vmatprep.subr.bf16.mxu1 %v9696_v40 }
 0x831   :  { %8645 = vmatpush3.bf16.msra.mxu1 %v9697_v42 }
 0x832   :  { %8646 = vmatprep.subr.bf16.mxu1 %v9698_v31 }
 0x835   :  { %8647 = vmatpush3.bf16.msra.mxu1 %v9699_v59 }
 0x836   :  { %8648 = vmatprep.subr.bf16.mxu1 %v9700_v23 }
 0x839   :  { %8649 = vmatpush3.bf16.msra.mxu1 %v9701_v48 }
 0x83a   :  { %8650 = vmatprep.subr.bf16.mxu1 %v9702_v16 }
 0x83d   :  { %8651 = vmatpush3.bf16.msra.mxu1 %v9703_v35 }
 0x83e   :  { %8717 = vmatprep.subr.bf16.mxu1 %v9883_v1 }
 0x840   :  { %7521 = vmatmul.mubr.bf16.vlgmr.msra.gmra.mrb[112].mxu1 %v6707_v27 }
 0x841   :  { %8718 = vmatpush3.bf16.msra.mxu1 %v9720_v0  ;;  %8733 = vmatprep.mubr.msk.bf16.mxu1 %vm9894_vm2, %v9883_v1 }
 0x842   :  { %8719 = vmatprep.subr.bf16.mxu1 %v9883_v1 }
 0x845   :  { %8720 = vmatpush3.bf16.msra.mxu1 %v9721_v56 }
 0x846   :  { %8721 = vmatprep.subr.bf16.mxu1 %v9883_v1 }
 0x849   :  { %8722 = vmatpush3.bf16.msra.mxu1 %v9722_v20 }
 0x84a   :  { %8723 = vmatprep.subr.bf16.mxu1 %v9883_v1 }
 0x84d   :  { %8724 = vmatpush3.bf16.msra.mxu1 %v9723_v45 }
 0x84e   :  { %8725 = vmatprep.subr.bf16.mxu1 %v9883_v1 }
 0x851   :  { %8726 = vmatpush3.bf16.msra.mxu1 %v9724_v60 }
 0x852   :  { %8727 = vmatprep.subr.bf16.mxu1 %v9883_v1 }
 0x855   :  { %8728 = vmatpush3.bf16.msra.mxu1 %v9725_v61 }
 0x856   :  { %8729 = vmatprep.subr.bf16.mxu1 %v9883_v1 }
 0x859   :  { %8730 = vmatpush3.bf16.msra.mxu1 %v9726_v36 }
 0x85a   :  { %8731 = vmatprep.subr.bf16.mxu1 %v9883_v1 }
 0x85d   :  { %8732 = vmatpush3.bf16.msra.mxu1 %v9727_v22 }
 0x8b3   :  { %v8630_v41 = vpop.f32.mrb[112].mxu0 }
 0x8b4   :  { %v8631_v19 = vpop.f32.mrb[113].mxu0 }
 0x8b5   :  { %v10641_v51 = vadd.f32 %v8631_v19, %v8630_v41  ;;  %v8633_v52 = vpop.f32.mrb[114].mxu0 }
 0x8b6   :  { %v8634_v25 = vpop.f32.mrb[115].mxu0 }
 0x8b7   :  { %v7483_v43 = vadd.f32 %v10641_v51, %v6850_v9  ;;  %v7591_v51 = vld [vmem:[%s10738_s17] sm:$0x7] }
 0x8f3   :  { %v7441_v6 = vpop.f32.mrb[108].mxu1 }
 0x8f4   :  { %v8747_v49 = vadd.f32 %v7441_v6, %v6842_v46  ;;  %v7443_v8 = vpop.f32.mrb[109].mxu1 }
 0x8f5   :  { %v8748_v24 = vadd.f32 %v7443_v8, %v6846_v4  ;;  %v7445_v10 = vpop.f32.mrb[110].mxu1  ;;  %v7596_v4 = vrot.slane %v7591_v51, %v10085_v18 }
 0x8f6   :  { %v7528_v12 = vsel %vm4909_vm7, %v8747_v49, 0.0  ;;  %v7446_v13 = vpop.f32.mrb[111].mxu1 }
 0x8f7   :  { %v7529_v53 = vrot.slane %v7528_v12, 4  ;;  %v7535_v1 = vsel %vm4909_vm7, %v8748_v24, 0.0 }
 0x8f8   :  { %v7536_v63 = vrot.slane %v7535_v1, 4 }
 0x8f9   :  { %v7530_v17 = vadd.f32 %v7529_v53, %v7528_v12  ;;  %v7616_v12 = vrot.slane %v7611_v2, %v10085_v18  ;;  %v7620_v53 = vrot.slane %v7611_v2, %v10437_v15 }
 0x8fa   :  { %v7537_v14 = vadd.f32 %v7536_v63, %v7535_v1 }
 0x8fb   :  { %v7531_v7 = vrot.slane %v7530_v17, 2 }
 0x8fc   :  { %v7538_v21 = vrot.slane %v7537_v14, 2 }
 0x8fd   :  { %v7532_v27 = vadd.f32 %v7531_v7, %v7530_v17 }
 0x8fe   :  { %v7539_v54 = vadd.f32 %v7538_v21, %v7537_v14 }
 0x8ff   :  { %v7533_v28 = vrot.slane %v7532_v27, 1 }
 0x900   :  { %v7540_v30 = vrot.slane %v7539_v54, 1 }
 0x901   :  { %v7534_v32 = vadd.f32 %v7533_v28, %v7532_v27 }
 0x902   :  { %v7541_v29 = vadd.f32 %v7540_v30, %v7539_v54 }
 0x903   :  { %v7549_v58 = vmul.f32 0.5, %v7534_v32 }
 0x904   :  { %v7550_v40 = vmul.f32 0.5, %v7541_v29 }
 0x905   :  { %v7552_v42 = vsub.f32 %v8747_v49, %v7549_v58  ;;  %v7600_v49 = vrot.slane %v7591_v51, %v10437_v15 }
 0x906   :  { %v7553_v31 = vsub.f32 %v8748_v24, %v7550_v40 }
 0x907   :  { %v7555_v59 = vmul.f32 %v7552_v42, %v7552_v42 }
 0x908   :  { %v7556_v23 = vmul.f32 %v7553_v31, %v7553_v31 }
 0x909   :  { %v7558_v48 = vsel %vm4909_vm7, %v7555_v59, 0.0 }
 0x90a   :  { %v7559_v16 = vrot.slane %v7558_v48, 4  ;;  %v7565_v35 = vsel %vm4909_vm7, %v7556_v23, 0.0 }
 0x90b   :  { %v7566_v11 = vrot.slane %v7565_v35, 4 }
 0x90c   :  { %v7560_v39 = vadd.f32 %v7559_v16, %v7558_v48 }
 0x90d   :  { %v7567_v26 = vadd.f32 %v7566_v11, %v7565_v35  ;;  %v7604_v35 = vrot.slane %v7591_v51, %v10431_v3 }
 0x90e   :  { %v7561_v57 = vrot.slane %v7560_v39, 2 }
 0x90f   :  { %v7568_v34 = vrot.slane %v7567_v26, 2 }
 0x910   :  { %v7562_v33 = vadd.f32 %v7561_v57, %v7560_v39 }
 0x911   :  { %v7569_v44 = vadd.f32 %v7568_v34, %v7567_v26  ;;  %v7624_v26 = vrot.slane %v7611_v2, %v10431_v3 }
 0x912   :  { %v7563_v37 = vrot.slane %v7562_v33, 1 }
 0x913   :  { %v7570_v47 = vrot.slane %v7569_v44, 1  ;;  %v8652_v5 = vpop.f32.mrb[112].mxu1 }
 0x914   :  { %v7564_v50 = vadd.f32 %v7563_v37, %v7562_v33  ;;  %v8653_v41 = vpop.f32.mrb[113].mxu1 }
 0x915   :  { %v7571_v19 = vadd.f32 %v7570_v47, %v7569_v44  ;;  %v8654_v62 = vadd.f32 %v8653_v41, %v8652_v5  ;;  %v8655_v52 = vpop.f32.mrb[114].mxu1 }
 0x916   :  { %v7579_v25 = vmul.f32 0.5, %v7564_v50  ;;  %v8656_v38 = vpop.f32.mrb[115].mxu1 }
 0x917   :  { %v7580_v55 = vmul.f32 0.5, %v7571_v19  ;;  %v7523_v0 = vadd.f32 %v8654_v62, %v7483_v43  ;;  %v8575_v43 = vld [vmem:[%s10741_s20] ss:$0 sm:$0xff] }
 0x918   :  { %v7582_v56 = vadd.f32 0.9, %v7579_v25 }
 0x919   :  { %v7583_v20 = vadd.f32 0.9, %v7580_v55  ;;  %v7542_v45 = vsel %vm4909_vm7, %v7523_v0, 0.0 }
 0x91a   :  { %9748 = vrsqrt.f32 %v7582_v56  ;;  %v7543_v60 = vrot.slane %v7542_v45, 4 }
 0x91b   :  { %9750 = vrsqrt.f32 %v7583_v20 }
 0x91c   :  { %v7544_v61 = vadd.f32 %v7543_v60, %v7542_v45 }
 0x91e   :  { %v7545_v36 = vrot.slane %v7544_v61, 2 }
 0x920   :  { %v7546_v22 = vadd.f32 %v7545_v36, %v7544_v61 }
 0x922   :  { %v7547_v46 = vrot.slane %v7546_v22, 1 }
 0x924   :  { %v9749_v6 = vpop.eup %9748  ;;  %v7548_v8 = vadd.f32 %v7547_v46, %v7546_v22 }
 0x925   :  { %v9751_v24 = vpop.eup %9750  ;;  %v7588_v10 = vmul.f32 %v9749_v6, %v7552_v42 }
 0x926   :  { %v7589_v13 = vmul.f32 %v9751_v24, %v7553_v31  ;;  %v7551_v1 = vmul.f32 0.5, %v7548_v8 }
 0x927   :  { %v7608_v63 = vmul.f32 %v7596_v4, %v7588_v10 }
 0x928   :  { %v7609_v17 = vmul.f32 %v7600_v49, %v7589_v13  ;;  %v7554_v14 = vsub.f32 %v7523_v0, %v7551_v1 }
 0x929   :  { %v7628_v7 = vadd.f32 %v7616_v12, %v7608_v63 }
 0x92a   :  { %v7629_v21 = vadd.f32 %v7620_v53, %v7609_v17  ;;  %v7557_v27 = vmul.f32 %v7554_v14, %v7554_v14 }
 0x92b   :  { %vm7631_vm3 = vcmp.ge.f32.partialorder %v7628_v7, 0.0  ;;  %v7634_v54 = vmul.f32 0.2, %v7628_v7 }
 0x92c   :  { %v7572_v28 = vsel %vm4909_vm7, %v7557_v27, 0.0  ;;  %vm7632_vm4 = vcmp.ge.f32.partialorder %v7629_v21, 0.0  ;;  %v7635_v30 = vmul.f32 0.2, %v7629_v21  ;;  %vm7925_vm7 = vcmask 123904  }
 0x92d   :  { %v7573_v32 = vrot.slane %v7572_v28, 4  ;;  %v7637_v29 = vsel %vm7631_vm3, %v7628_v7, %v7634_v54 }
 0x92e   :  { %v7638_v58 = vsel %vm7632_vm4, %v7629_v21, %v7635_v30  ;;  %v7640_v42 = vpack.c.bf16 %v7637_v29, %v7637_v29 }
 0x92f   :  { %v7574_v18 = vadd.f32 %v7573_v32, %v7572_v28  ;;  %v7641_v40 = vpack.c.bf16 %v7638_v58, %v7638_v58 }
 0x931   :  { %v7575_v15 = vrot.slane %v7574_v18, 2  ;;  %7874 = vmatprep.mubr.bf16.mxu0 %v7641_v40 }
 0x932   :  { %7875 = vmatmul.mubr.bf16.vlgmr.msra.gmra.mrb[116].mxu0 %v7640_v42 }
 0x933   :  { %v7576_v31 = vadd.f32 %v7575_v15, %v7574_v18 }
 0x935   :  { %v7577_v59 = vrot.slane %v7576_v31, 1 }
 0x937   :  { %v7578_v23 = vadd.f32 %v7577_v59, %v7576_v31 }
 0x939   :  { %v7581_v48 = vmul.f32 0.5, %v7578_v23 }
 0x93b   :  { %v7584_v16 = vadd.f32 0.9, %v7581_v48 }
 0x93d   :  { %9752 = vrsqrt.f32 %v7584_v16 }
 0x947   :  { %v9753_v11 = vpop.eup %9752 }
 0x948   :  { %v7590_v39 = vmul.f32 %v9753_v11, %v7554_v14 }
 0x94a   :  { %v7610_v57 = vmul.f32 %v7604_v35, %v7590_v39 }
 0x94c   :  { %v7630_v34 = vadd.f32 %v7624_v26, %v7610_v57 }
 0x94e   :  { %vm7633_vm5 = vcmp.ge.f32.partialorder %v7630_v34, 0.0  ;;  %v7636_v33 = vmul.f32 0.2, %v7630_v34 }
 0x950   :  { %v7639_v9 = vsel %vm7633_vm5, %v7630_v34, %v7636_v33 }
 0x951   :  { %v7642_v44 = vpack.c.bf16 %v7639_v9, %v7639_v9 }
 0x953   :  { %8734 = vmatmul.mubr.bf16.vlgmr.msra.gmra.mrb[116].mxu1 %v7642_v44 }
 0xa05   :  { %v8674_v37 = vpop.f32.mrb[116].mxu0 }
 0xa06   :  { %v8675_v47 = vpop.f32.mrb[117].mxu0 }
 0xa07   :  { %v8676_v5 = vadd.f32 %v8675_v47, %v8674_v37  ;;  %v8677_v50 = vpop.f32.mrb[118].mxu0 }
 0xa08   :  { %v8678_v41 = vpop.f32.mrb[119].mxu0 }
 0xa09   :  { %v7877_v19 = vadd.f32 %v8676_v5, %v8575_v43 }
 0xa26   :  { %v7916_v62 = vpop.f32.mrb[116].mxu1 }
 0xa27   :  { %v7917_v52 = vadd.f32 %v7916_v62, %v7877_v19  ;;  %v8735_v3 = vpop.f32.mrb[117].mxu1 }
 0xa28   :  { %v7919_v25 = vpop.f32.mrb[118].mxu1 }
 0xa29   :  { %vm7922_vm6 = vcmp.ge.f32.partialorder %v7917_v52, 0.0  ;;  %v7923_v38 = vmul.f32 0.01, %v7917_v52  ;;  %v8736_v55 = vpop.f32.mrb[119].mxu1 }
 0xa2b   :  { %v7924_v0 = vsel %vm7922_vm6, %v7917_v52, %v7923_v38 }
 0xa2c   :  { %7926 = vst.msk [vmem:[#allocation12] sm:$0x3] %vm7925_vm7, %v7924_v0 }
 0xa2d   :  { %9853 = shalt.err (!%p9850_p8)
}
 0xa2e   :  { %s10762_s15 = sld [smem:[#allocation23_spill]] }
 0xa34   :  { %s9854_s26 = scalar_lea.hbm %s10762_s15, 32 }
 0xa35   :  { %p9855_p9 = scmp.ne.s32.totalorder %s10762_s15, %s9854_s26  ;;  %p9858_p10 = scmp.lt.u32.totalorder %s9854_s26, %s10762_s15 }
 0xa37   :  { %p9860_p11 = pnand %p9858_p10, %p9855_p9 }
 0xa39   :  { %9863 = shalt.err (!%p9860_p11)
}
 0xa3a   :  { %7936 = dma.vmem_to_hbm [thread:$0]  %s7934_s14, 32, %s10762_s15, [#allocation6]  }
 0xa3b   :  { %9870 = dma.done.wait [#allocation6], 32  }
 0xa3c   :  { %9871 = vsyncadd [#allocation6], 4294967264 }
 0xa3d   :  { %7940 = vsyncpa [#allocation5], 1 }
 0xa3e   :  { %7941 = vsyncpa [#allocation8], 1 }
 0xa3f   :  { %7942 = vsyncpa [#allocation11], 1 }
 0xa40   :  { %7943 = vsyncpa [#allocation6], 1 }

</bundles_post_ra>
